<compile_context>
chip_gen: v7x
topology: tpu7x:2x2x1
jax: 0.10.0
libtpu: 0.0.40
codegen_flags: <defaults>
</compile_context>

<pallas_src>
import functools

import jax
import jax.numpy as jnp
from jax import lax
from jax.experimental import pallas as pl
from jax.experimental.pallas import tpu as pltpu

BN_EPS = 1e-5


# ----------------------------- kernel helpers ---------------------------------
def _fill_padded(pad_ref, interior, *, p, H, W, C):
    """Write `interior` (N, H, W*C) into pad_ref (N, H+2p, (W+2p)*C), zeroing only the halo."""
    N = interior.shape[0]
    Hp = H + 2 * p
    WpC = (W + 2 * p) * C
    dt = pad_ref.dtype
    if p > 0:
        # Halo-only zeroing: p rows top/bottom (full lane width), p*C lanes left/right.
        pad_ref[:, 0:p, :] = jnp.zeros((N, p, WpC), dt)
        pad_ref[:, p + H:Hp, :] = jnp.zeros((N, p, WpC), dt)
        pad_ref[:, p:p + H, 0:p * C] = jnp.zeros((N, H, p * C), dt)
        pad_ref[:, p:p + H, (p + W) * C:WpC] = jnp.zeros((N, H, p * C), dt)
    pad_ref[:, p:p + H, p * C:(p + W) * C] = interior.astype(dt)


def _conv_taps(pad_ref, wblk_ref, *, K, N, H, W, C, Cout):
    """SAME conv as K*K per-tap matmuls against block-diagonal kron(I_W, W[kh,kw]) weights.

    pad_ref : (N, H+2p, (W+2p)*C)   lane-dense padded activation (f32 or bf16)
    wblk_ref: (K*K, W*C, W*Cout)    block-diagonal weights (same dtype as pad_ref)
    returns : (N*H, W*Cout) float32 accumulator
    """
    acc = jnp.zeros((N * H, W * Cout), jnp.float32)
    for kh in range(K):
        for kw in range(K):
            slab = pad_ref[:, kh:kh + H, kw * C:kw * C + W * C]     # (N, H, W*C)
            slab = slab.reshape(N * H, W * C)
            wt = wblk_ref[kh * K + kw]                              # (W*C, W*Cout)
            acc += jnp.dot(slab, wt, preferred_element_type=jnp.float32)
    return acc


def _bn_relu(y, gamma, beta, *, W, Cout, inv_count):
    """Training-mode BatchNorm (batch mean / biased var) folded into one FMA, then ReLU.

    y: (rows, W*Cout) f32; gamma/beta: (1, Cout) f32.
    The big buffer y is traversed once for the two lane-wise sums; the per-channel
    fold over the W lane-groups happens on tiny (1, W*Cout) rows only.
    """
    s_l = jnp.sum(y, axis=0, keepdims=True)             # (1, W*Cout)
    ss_l = jnp.sum(y * y, axis=0, keepdims=True)        # (1, W*Cout)
    s = jnp.zeros((1, Cout), jnp.float32)
    ss = jnp.zeros((1, Cout), jnp.float32)
    for w in range(W):                                   # tiny lane slices, static offsets
        s = s + s_l[:, w * Cout:(w + 1) * Cout]
        ss = ss + ss_l[:, w * Cout:(w + 1) * Cout]
    mean = s * inv_count
    var = jnp.maximum(ss * inv_count - mean * mean, 0.0)  # clamp one-pass variance
    scale = gamma * lax.rsqrt(var + BN_EPS)                # (1, Cout), EUP rsqrt
    shift = beta - mean * scale
    scale_l = jnp.concatenate([scale] * W, axis=1)         # (1, W*Cout)
    shift_l = jnp.concatenate([shift] * W, axis=1)
    return jnp.maximum(y * scale_l + shift_l, 0.0)


# ----------------------------------- kernel -----------------------------------
def double_conv_kernel(x_ref, wb1_ref, wb2_ref, g1_ref, be1_ref, g2_ref, be2_ref,
                       o_ref, *, K, N, H, W, C_in, C_out, pad_dtype):
    p = K // 2
    Hp = H + 2 * p
    inv_count = 1.0 / float(N * H * W)

    # ---- stage 1: conv(K, SAME) -> BN -> ReLU --------------------------------
    # o_ref doubles as the parking spot for the stage-1 activation (same shape),
    # so the intermediate never touches HBM and no persistent scratch is needed.
    def stage1(xpad_ref):
        _fill_padded(xpad_ref, x_ref[...], p=p, H=H, W=W, C=C_in)
        y1 = _conv_taps(xpad_ref, wb1_ref, K=K, N=N, H=H, W=W, C=C_in, Cout=C_out)
        o_ref[...] = _bn_relu(y1, g1_ref[...], be1_ref[...],
                              W=W, Cout=C_out, inv_count=inv_count)

    pl.run_scoped(stage1, pltpu.VMEM((N, Hp, (W + 2 * p) * C_in), pad_dtype))

    # ---- stage 2: conv -> BN -> ReLU, reading stage-1 activation from o_ref --
    # Sequential run_scoped regions => peak scratch = max(stage1, stage2), not sum
    # (matters for v7x's 64 MiB VMEM once shapes grow).
    def stage2(ypad_ref):
        a1 = o_ref[...].reshape(N, H, W * C_out)
        _fill_padded(ypad_ref, a1, p=p, H=H, W=W, C=C_out)
        y2 = _conv_taps(ypad_ref, wb2_ref, K=K, N=N, H=H, W=W, C=C_out, Cout=C_out)
        o_ref[...] = _bn_relu(y2, g2_ref[...], be2_ref[...],
                              W=W, Cout=C_out, inv_count=inv_count)

    pl.run_scoped(stage2, pltpu.VMEM((N, Hp, (W + 2 * p) * C_out), pad_dtype))


# ----------------------------------- wrapper ----------------------------------
def _block_diag_weights(w_hwio, width, dtype):
    """Per-tap block-diagonal weights kron(I_W, w[kh,kw]): (K*K, W*Cin, W*Cout)."""
    K, _, Cin, Cout = w_hwio.shape
    eye = jnp.eye(width, dtype=jnp.float32)
    blk = jnp.einsum("ab,tio->taibo", eye, w_hwio.reshape(K * K, Cin, Cout))
    return blk.reshape(K * K, width * Cin, width * Cout).astype(dtype)


def double_conv_block_nhwc(x_nhwc, params, *, matmul_dtype=jnp.float32):
    """Core entry point: (N, H, W, Cin) -> (N, H, W, Cout)."""
    N, H, W, C_in = x_nhwc.shape
    K = params["w1"].shape[0]
    C_out = params["w1"].shape[-1]

    # Lane-dense (N, H, W*Cin) slab; free reshape (last two dims merge).
    x_slab = x_nhwc.reshape(N, H, W * C_in).astype(matmul_dtype)
    wb1 = _block_diag_weights(params["w1"].astype(jnp.float32), W, matmul_dtype)
    wb2 = _block_diag_weights(params["w2"].astype(jnp.float32), W, matmul_dtype)

    kernel = functools.partial(double_conv_kernel, K=K, N=N, H=H, W=W,
                               C_in=C_in, C_out=C_out, pad_dtype=matmul_dtype)
    vmem = pl.BlockSpec(memory_space=pltpu.MemorySpace.VMEM)

    out = pl.pallas_call(
        kernel,
        out_shape=jax.ShapeDtypeStruct((N * H, W * C_out), jnp.float32),
        in_specs=[vmem] * 7,
        out_specs=vmem,
    )(
        x_slab, wb1, wb2,
        params["g1"].reshape(1, -1).astype(jnp.float32),
        params["be1"].reshape(1, -1).astype(jnp.float32),
        params["g2"].reshape(1, -1).astype(jnp.float32),
        params["be2"].reshape(1, -1).astype(jnp.float32),
    )
    return out.reshape(N, H, W, C_out)


def double_conv_block(x_nchw, params, *, matmul_dtype=jnp.float32):
    """Thin NCHW adapter matching the PyTorch module's (N, Cin, H, W) interface."""
    x = jnp.transpose(x_nchw, (0, 2, 3, 1))
    y = double_conv_block_nhwc(x, params, matmul_dtype=matmul_dtype)
    return jnp.transpose(y, (0, 3, 1, 2))


def init_params(key, in_channels, out_channels, kernel_size):
    """He-normal (fan_out, relu) conv weights, zero conv bias, BN gamma=1 beta=0."""
    k1, k2 = jax.random.split(key)
    fan_out = out_channels * kernel_size * kernel_size
    std = (2.0 / fan_out) ** 0.5
    w1 = std * jax.random.normal(
        k1, (kernel_size, kernel_size, in_channels, out_channels), jnp.float32)
    w2 = std * jax.random.normal(
        k2, (kernel_size, kernel_size, out_channels, out_channels), jnp.float32)
    zeros = jnp.zeros((out_channels,), jnp.float32)
    ones = jnp.ones((out_channels,), jnp.float32)
    return {
        "w1": w1, "b1": zeros, "g1": ones, "be1": zeros,
        "w2": w2, "b2": zeros, "g2": ones, "be2": zeros,
    }


# ----------------------------- pure-JAX reference -----------------------------
def _ref_stage(x_nhwc, w, b, gamma, beta, cast_dtype=None):
    if cast_dtype is not None:  # mimic the kernel's matmul-operand rounding
        x_nhwc = x_nhwc.astype(cast_dtype).astype(jnp.float32)
        w = w.astype(cast_dtype).astype(jnp.float32)
    y = lax.conv_general_dilated(
        x_nhwc, w, window_strides=(1, 1), padding="SAME",
        dimension_numbers=("NHWC", "HWIO", "NHWC")) + b
    mean = jnp.mean(y, axis=(0, 1, 2), keepdims=True)
    var = jnp.mean((y - mean) ** 2, axis=(0, 1, 2), keepdims=True)
    yn = (y - mean) * lax.rsqrt(var + BN_EPS) * gamma + beta
    return jnp.maximum(yn, 0.0)


def _ref_double_conv(x_nchw, params, cast_dtype=None):
    x = jnp.transpose(x_nchw, (0, 2, 3, 1))
    y = _ref_stage(x, params["w1"], params["b1"], params["g1"], params["be1"], cast_dtype)
    y = _ref_stage(y, params["w2"], params["b2"], params["g2"], params["be2"], cast_dtype)
    return jnp.transpose(y, (0, 3, 1, 2))


if __name__ == "__main__":
    key = jax.random.PRNGKey(0)
    kx, kp = jax.random.split(key)

    # Small shapes consistent with the module: N=2, Cin=4, H=W=16, Cout=8, K=3.
    N, Cin, H, W = 2, 4, 16, 16
    Cout, K = 8, 3

    x = jax.random.normal(kx, (N, Cin, H, W), jnp.float32)
    params = init_params(kp, Cin, Cout, K)

    # Exact path (f32 MXU operands) vs the f32 reference.
    fwd_f32 = jax.jit(functools.partial(double_conv_block, matmul_dtype=jnp.float32))
    out_f32 = jax.block_until_ready(fwd_f32(x, params))
    assert out_f32.shape == (N, Cout, H, W), out_f32.shape
    ref_f32 = jax.block_until_ready(_ref_double_conv(x, params))
    assert jnp.allclose(out_f32, ref_f32, rtol=1e-3, atol=1e-3), "f32 mismatch vs JAX reference"

    # bf16-operand path (MXU-native inputs, f32 accumulation, f32 BN/ReLU epilogue)
    # vs a reference with identical bf16 input/weight rounding.
    fwd_bf16 = jax.jit(functools.partial(double_conv_block, matmul_dtype=jnp.bfloat16))
    out_bf16 = jax.block_until_ready(fwd_bf16(x, params))
    ref_bf16 = jax.block_until_ready(_ref_double_conv(x, params, cast_dtype=jnp.bfloat16))
    assert jnp.allclose(out_bf16, ref_bf16, rtol=1e-2, atol=1e-2), \
        "bf16 mismatch vs rounding-matched JAX reference"

    print("KERNEL_OK")
</pallas_src>

<mosaic_0001>
module attributes {stable_mosaic.version = 11 : i64} {
  func.func @double_conv_kernel(%arg0: memref<2x16x64xf32, #tpu.memory_space<vmem>>, %arg1: memref<9x64x128xf32, #tpu.memory_space<vmem>>, %arg2: memref<9x128x128xf32, #tpu.memory_space<vmem>>, %arg3: memref<1x8xf32, #tpu.memory_space<vmem>>, %arg4: memref<1x8xf32, #tpu.memory_space<vmem>>, %arg5: memref<1x8xf32, #tpu.memory_space<vmem>>, %arg6: memref<1x8xf32, #tpu.memory_space<vmem>>, %arg7: memref<32x128xf32, #tpu.memory_space<vmem>>) attributes {dimension_semantics = [], scalar_prefetch = 0 : i64, scratch_operands = 0 : i64, tpu.core_type = #tpu.core_type<tc>} {
    "tpu.region"() ({
      %alloca = memref.alloca() : memref<2x18x72xf32, #tpu.memory_space<vmem>>
      %c0 = arith.constant 0 : index
      %c0_0 = arith.constant 0 : index
      %c0_1 = arith.constant 0 : index
      %0 = vector.load %arg0[%c0, %c0_0, %c0_1] : memref<2x16x64xf32, #tpu.memory_space<vmem>>, vector<2x16x64xf32>
      %cst = arith.constant 0.000000e+00 : f32
      %1 = vector.broadcast %cst : f32 to vector<2x1x72xf32>
      %c0_2 = arith.constant 0 : index
      %c0_3 = arith.constant 0 : index
      %c0_4 = arith.constant 0 : index
      %2 = vector.load %alloca[%c0_2, %c0_3, %c0_4] : memref<2x18x72xf32, #tpu.memory_space<vmem>>, vector<2x1x72xf32>
      tpu.vector_store %alloca[%c0_2, %c0_3, %c0_4], %1 {strides = array<i32>} : memref<2x18x72xf32, #tpu.memory_space<vmem>>, vector<2x1x72xf32>,
      %cst_5 = arith.constant 0.000000e+00 : f32
      %3 = vector.broadcast %cst_5 : f32 to vector<2x1x72xf32>
      %c0_6 = arith.constant 0 : index
      %c17 = arith.constant 17 : index
      %c0_7 = arith.constant 0 : index
      %4 = vector.load %alloca[%c0_6, %c17, %c0_7] : memref<2x18x72xf32, #tpu.memory_space<vmem>>, vector<2x1x72xf32>
      tpu.vector_store %alloca[%c0_6, %c17, %c0_7], %3 {strides = array<i32>} : memref<2x18x72xf32, #tpu.memory_space<vmem>>, vector<2x1x72xf32>,
      %cst_8 = arith.constant 0.000000e+00 : f32
      %5 = vector.broadcast %cst_8 : f32 to vector<2x16x4xf32>
      %c0_9 = arith.constant 0 : index
      %c1 = arith.constant 1 : index
      %c0_10 = arith.constant 0 : index
      %6 = vector.load %alloca[%c0_9, %c1, %c0_10] : memref<2x18x72xf32, #tpu.memory_space<vmem>>, vector<2x16x4xf32>
      tpu.vector_store %alloca[%c0_9, %c1, %c0_10], %5 {strides = array<i32>} : memref<2x18x72xf32, #tpu.memory_space<vmem>>, vector<2x16x4xf32>,
      %cst_11 = arith.constant 0.000000e+00 : f32
      %7 = vector.broadcast %cst_11 : f32 to vector<2x16x4xf32>
      %c0_12 = arith.constant 0 : index
      %c1_13 = arith.constant 1 : index
      %c68 = arith.constant 68 : index
      %8 = vector.load %alloca[%c0_12, %c1_13, %c68] : memref<2x18x72xf32, #tpu.memory_space<vmem>>, vector<2x16x4xf32>
      tpu.vector_store %alloca[%c0_12, %c1_13, %c68], %7 {strides = array<i32>} : memref<2x18x72xf32, #tpu.memory_space<vmem>>, vector<2x16x4xf32>,
      %c0_14 = arith.constant 0 : index
      %c1_15 = arith.constant 1 : index
      %c4 = arith.constant 4 : index
      %9 = vector.load %alloca[%c0_14, %c1_15, %c4] : memref<2x18x72xf32, #tpu.memory_space<vmem>>, vector<2x16x64xf32>
      tpu.vector_store %alloca[%c0_14, %c1_15, %c4], %0 {strides = array<i32>} : memref<2x18x72xf32, #tpu.memory_space<vmem>>, vector<2x16x64xf32>,
      %cst_16 = arith.constant 0.000000e+00 : f32
      %10 = vector.broadcast %cst_16 : f32 to vector<32x128xf32>
      %c0_17 = arith.constant 0 : index
      %c0_18 = arith.constant 0 : index
      %c0_19 = arith.constant 0 : index
      %11 = vector.load %alloca[%c0_17, %c0_18, %c0_19] : memref<2x18x72xf32, #tpu.memory_space<vmem>>, vector<2x16x64xf32>
      %12 = vector.shape_cast %11 : vector<2x16x64xf32> to vector<32x64xf32>
      %c0_20 = arith.constant 0 : index
      %c0_21 = arith.constant 0 : index
      %c0_22 = arith.constant 0 : index
      %13 = vector.load %arg1[%c0_20, %c0_21, %c0_22] : memref<9x64x128xf32, #tpu.memory_space<vmem>>, vector<1x64x128xf32>
      %14 = vector.shape_cast %13 : vector<1x64x128xf32> to vector<64x128xf32>
      %cst_23 = arith.constant dense<0.000000e+00> : vector<32x128xf32>
      %15 = tpu.matmul %12, %14, %cst_23 {dimension_numbers = #tpu.dot_dimension_numbers<[1], [0], [0], [1], [0, 0, 1, 1], [], []>} : vector<32x64xf32>, vector<64x128xf32>, vector<32x128xf32> -> vector<32x128xf32>
      %16 = arith.addf %10, %15 : vector<32x128xf32>
      %c0_24 = arith.constant 0 : index
      %c0_25 = arith.constant 0 : index
      %c4_26 = arith.constant 4 : index
      %17 = vector.load %alloca[%c0_24, %c0_25, %c4_26] : memref<2x18x72xf32, #tpu.memory_space<vmem>>, vector<2x16x64xf32>
      %18 = vector.shape_cast %17 : vector<2x16x64xf32> to vector<32x64xf32>
      %c1_27 = arith.constant 1 : index
      %c0_28 = arith.constant 0 : index
      %c0_29 = arith.constant 0 : index
      %19 = vector.load %arg1[%c1_27, %c0_28, %c0_29] : memref<9x64x128xf32, #tpu.memory_space<vmem>>, vector<1x64x128xf32>
      %20 = vector.shape_cast %19 : vector<1x64x128xf32> to vector<64x128xf32>
      %cst_30 = arith.constant dense<0.000000e+00> : vector<32x128xf32>
      %21 = tpu.matmul %18, %20, %cst_30 {dimension_numbers = #tpu.dot_dimension_numbers<[1], [0], [0], [1], [0, 0, 1, 1], [], []>} : vector<32x64xf32>, vector<64x128xf32>, vector<32x128xf32> -> vector<32x128xf32>
      %22 = arith.addf %16, %21 : vector<32x128xf32>
      %c0_31 = arith.constant 0 : index
      %c0_32 = arith.constant 0 : index
      %c8 = arith.constant 8 : index
      %23 = vector.load %alloca[%c0_31, %c0_32, %c8] : memref<2x18x72xf32, #tpu.memory_space<vmem>>, vector<2x16x64xf32>
      %24 = vector.shape_cast %23 : vector<2x16x64xf32> to vector<32x64xf32>
      %c2 = arith.constant 2 : index
      %c0_33 = arith.constant 0 : index
      %c0_34 = arith.constant 0 : index
      %25 = vector.load %arg1[%c2, %c0_33, %c0_34] : memref<9x64x128xf32, #tpu.memory_space<vmem>>, vector<1x64x128xf32>
      %26 = vector.shape_cast %25 : vector<1x64x128xf32> to vector<64x128xf32>
      %cst_35 = arith.constant dense<0.000000e+00> : vector<32x128xf32>
      %27 = tpu.matmul %24, %26, %cst_35 {dimension_numbers = #tpu.dot_dimension_numbers<[1], [0], [0], [1], [0, 0, 1, 1], [], []>} : vector<32x64xf32>, vector<64x128xf32>, vector<32x128xf32> -> vector<32x128xf32>
      %28 = arith.addf %22, %27 : vector<32x128xf32>
      %c0_36 = arith.constant 0 : index
      %c1_37 = arith.constant 1 : index
      %c0_38 = arith.constant 0 : index
      %29 = vector.load %alloca[%c0_36, %c1_37, %c0_38] : memref<2x18x72xf32, #tpu.memory_space<vmem>>, vector<2x16x64xf32>
      %30 = vector.shape_cast %29 : vector<2x16x64xf32> to vector<32x64xf32>
      %c3 = arith.constant 3 : index
      %c0_39 = arith.constant 0 : index
      %c0_40 = arith.constant 0 : index
      %31 = vector.load %arg1[%c3, %c0_39, %c0_40] : memref<9x64x128xf32, #tpu.memory_space<vmem>>, vector<1x64x128xf32>
      %32 = vector.shape_cast %31 : vector<1x64x128xf32> to vector<64x128xf32>
      %cst_41 = arith.constant dense<0.000000e+00> : vector<32x128xf32>
      %33 = tpu.matmul %30, %32, %cst_41 {dimension_numbers = #tpu.dot_dimension_numbers<[1], [0], [0], [1], [0, 0, 1, 1], [], []>} : vector<32x64xf32>, vector<64x128xf32>, vector<32x128xf32> -> vector<32x128xf32>
      %34 = arith.addf %28, %33 : vector<32x128xf32>
      %c0_42 = arith.constant 0 : index
      %c1_43 = arith.constant 1 : index
      %c4_44 = arith.constant 4 : index
      %35 = vector.load %alloca[%c0_42, %c1_43, %c4_44] : memref<2x18x72xf32, #tpu.memory_space<vmem>>, vector<2x16x64xf32>
      %36 = vector.shape_cast %35 : vector<2x16x64xf32> to vector<32x64xf32>
      %c4_45 = arith.constant 4 : index
      %c0_46 = arith.constant 0 : index
      %c0_47 = arith.constant 0 : index
      %37 = vector.load %arg1[%c4_45, %c0_46, %c0_47] : memref<9x64x128xf32, #tpu.memory_space<vmem>>, vector<1x64x128xf32>
      %38 = vector.shape_cast %37 : vector<1x64x128xf32> to vector<64x128xf32>
      %cst_48 = arith.constant dense<0.000000e+00> : vector<32x128xf32>
      %39 = tpu.matmul %36, %38, %cst_48 {dimension_numbers = #tpu.dot_dimension_numbers<[1], [0], [0], [1], [0, 0, 1, 1], [], []>} : vector<32x64xf32>, vector<64x128xf32>, vector<32x128xf32> -> vector<32x128xf32>
      %40 = arith.addf %34, %39 : vector<32x128xf32>
      %c0_49 = arith.constant 0 : index
      %c1_50 = arith.constant 1 : index
      %c8_51 = arith.constant 8 : index
      %41 = vector.load %alloca[%c0_49, %c1_50, %c8_51] : memref<2x18x72xf32, #tpu.memory_space<vmem>>, vector<2x16x64xf32>
      %42 = vector.shape_cast %41 : vector<2x16x64xf32> to vector<32x64xf32>
      %c5 = arith.constant 5 : index
      %c0_52 = arith.constant 0 : index
      %c0_53 = arith.constant 0 : index
      %43 = vector.load %arg1[%c5, %c0_52, %c0_53] : memref<9x64x128xf32, #tpu.memory_space<vmem>>, vector<1x64x128xf32>
      %44 = vector.shape_cast %43 : vector<1x64x128xf32> to vector<64x128xf32>
      %cst_54 = arith.constant dense<0.000000e+00> : vector<32x128xf32>
      %45 = tpu.matmul %42, %44, %cst_54 {dimension_numbers = #tpu.dot_dimension_numbers<[1], [0], [0], [1], [0, 0, 1, 1], [], []>} : vector<32x64xf32>, vector<64x128xf32>, vector<32x128xf32> -> vector<32x128xf32>
      %46 = arith.addf %40, %45 : vector<32x128xf32>
      %c0_55 = arith.constant 0 : index
      %c2_56 = arith.constant 2 : index
      %c0_57 = arith.constant 0 : index
      %47 = vector.load %alloca[%c0_55, %c2_56, %c0_57] : memref<2x18x72xf32, #tpu.memory_space<vmem>>, vector<2x16x64xf32>
      %48 = vector.shape_cast %47 : vector<2x16x64xf32> to vector<32x64xf32>
      %c6 = arith.constant 6 : index
      %c0_58 = arith.constant 0 : index
      %c0_59 = arith.constant 0 : index
      %49 = vector.load %arg1[%c6, %c0_58, %c0_59] : memref<9x64x128xf32, #tpu.memory_space<vmem>>, vector<1x64x128xf32>
      %50 = vector.shape_cast %49 : vector<1x64x128xf32> to vector<64x128xf32>
      %cst_60 = arith.constant dense<0.000000e+00> : vector<32x128xf32>
      %51 = tpu.matmul %48, %50, %cst_60 {dimension_numbers = #tpu.dot_dimension_numbers<[1], [0], [0], [1], [0, 0, 1, 1], [], []>} : vector<32x64xf32>, vector<64x128xf32>, vector<32x128xf32> -> vector<32x128xf32>
      %52 = arith.addf %46, %51 : vector<32x128xf32>
      %c0_61 = arith.constant 0 : index
      %c2_62 = arith.constant 2 : index
      %c4_63 = arith.constant 4 : index
      %53 = vector.load %alloca[%c0_61, %c2_62, %c4_63] : memref<2x18x72xf32, #tpu.memory_space<vmem>>, vector<2x16x64xf32>
      %54 = vector.shape_cast %53 : vector<2x16x64xf32> to vector<32x64xf32>
      %c7 = arith.constant 7 : index
      %c0_64 = arith.constant 0 : index
      %c0_65 = arith.constant 0 : index
      %55 = vector.load %arg1[%c7, %c0_64, %c0_65] : memref<9x64x128xf32, #tpu.memory_space<vmem>>, vector<1x64x128xf32>
      %56 = vector.shape_cast %55 : vector<1x64x128xf32> to vector<64x128xf32>
      %cst_66 = arith.constant dense<0.000000e+00> : vector<32x128xf32>
      %57 = tpu.matmul %54, %56, %cst_66 {dimension_numbers = #tpu.dot_dimension_numbers<[1], [0], [0], [1], [0, 0, 1, 1], [], []>} : vector<32x64xf32>, vector<64x128xf32>, vector<32x128xf32> -> vector<32x128xf32>
      %58 = arith.addf %52, %57 : vector<32x128xf32>
      %c0_67 = arith.constant 0 : index
      %c2_68 = arith.constant 2 : index
      %c8_69 = arith.constant 8 : index
      %59 = vector.load %alloca[%c0_67, %c2_68, %c8_69] : memref<2x18x72xf32, #tpu.memory_space<vmem>>, vector<2x16x64xf32>
      %60 = vector.shape_cast %59 : vector<2x16x64xf32> to vector<32x64xf32>
      %c8_70 = arith.constant 8 : index
      %c0_71 = arith.constant 0 : index
      %c0_72 = arith.constant 0 : index
      %61 = vector.load %arg1[%c8_70, %c0_71, %c0_72] : memref<9x64x128xf32, #tpu.memory_space<vmem>>, vector<1x64x128xf32>
      %62 = vector.shape_cast %61 : vector<1x64x128xf32> to vector<64x128xf32>
      %cst_73 = arith.constant dense<0.000000e+00> : vector<32x128xf32>
      %63 = tpu.matmul %60, %62, %cst_73 {dimension_numbers = #tpu.dot_dimension_numbers<[1], [0], [0], [1], [0, 0, 1, 1], [], []>} : vector<32x64xf32>, vector<64x128xf32>, vector<32x128xf32> -> vector<32x128xf32>
      %64 = arith.addf %58, %63 : vector<32x128xf32>
      %c0_74 = arith.constant 0 : index
      %c0_75 = arith.constant 0 : index
      %65 = vector.load %arg3[%c0_74, %c0_75] : memref<1x8xf32, #tpu.memory_space<vmem>>, vector<1x8xf32>
      %c0_76 = arith.constant 0 : index
      %c0_77 = arith.constant 0 : index
      %66 = vector.load %arg4[%c0_76, %c0_77] : memref<1x8xf32, #tpu.memory_space<vmem>>, vector<1x8xf32>
      %cst_78 = arith.constant dense<0.000000e+00> : vector<128xf32>
      %67 = vector.multi_reduction <add>, %64, %cst_78 [0] : vector<32x128xf32> to vector<128xf32>
      %68 = vector.shape_cast %67 : vector<128xf32> to vector<1x128xf32>
      %69 = arith.mulf %64, %64 : vector<32x128xf32>
      %cst_79 = arith.constant dense<0.000000e+00> : vector<128xf32>
      %70 = vector.multi_reduction <add>, %69, %cst_79 [0] : vector<32x128xf32> to vector<128xf32>
      %71 = vector.shape_cast %70 : vector<128xf32> to vector<1x128xf32>
      %cst_80 = arith.constant 0.000000e+00 : f32
      %72 = vector.broadcast %cst_80 : f32 to vector<1x8xf32>
      %cst_81 = arith.constant 0.000000e+00 : f32
      %73 = vector.broadcast %cst_81 : f32 to vector<1x8xf32>
      %74 = vector.extract_strided_slice %68 {offsets = [0, 0], sizes = [1, 8], strides = [1, 1]} : vector<1x128xf32> to vector<1x8xf32>
      %75 = arith.addf %72, %74 : vector<1x8xf32>
      %76 = vector.extract_strided_slice %71 {offsets = [0, 0], sizes = [1, 8], strides = [1, 1]} : vector<1x128xf32> to vector<1x8xf32>
      %77 = arith.addf %73, %76 : vector<1x8xf32>
      %78 = vector.extract_strided_slice %68 {offsets = [0, 8], sizes = [1, 8], strides = [1, 1]} : vector<1x128xf32> to vector<1x8xf32>
      %79 = arith.addf %75, %78 : vector<1x8xf32>
      %80 = vector.extract_strided_slice %71 {offsets = [0, 8], sizes = [1, 8], strides = [1, 1]} : vector<1x128xf32> to vector<1x8xf32>
      %81 = arith.addf %77, %80 : vector<1x8xf32>
      %82 = vector.extract_strided_slice %68 {offsets = [0, 16], sizes = [1, 8], strides = [1, 1]} : vector<1x128xf32> to vector<1x8xf32>
      %83 = arith.addf %79, %82 : vector<1x8xf32>
      %84 = vector.extract_strided_slice %71 {offsets = [0, 16], sizes = [1, 8], strides = [1, 1]} : vector<1x128xf32> to vector<1x8xf32>
      %85 = arith.addf %81, %84 : vector<1x8xf32>
      %86 = vector.extract_strided_slice %68 {offsets = [0, 24], sizes = [1, 8], strides = [1, 1]} : vector<1x128xf32> to vector<1x8xf32>
      %87 = arith.addf %83, %86 : vector<1x8xf32>
      %88 = vector.extract_strided_slice %71 {offsets = [0, 24], sizes = [1, 8], strides = [1, 1]} : vector<1x128xf32> to vector<1x8xf32>
      %89 = arith.addf %85, %88 : vector<1x8xf32>
      %90 = vector.extract_strided_slice %68 {offsets = [0, 32], sizes = [1, 8], strides = [1, 1]} : vector<1x128xf32> to vector<1x8xf32>
      %91 = arith.addf %87, %90 : vector<1x8xf32>
      %92 = vector.extract_strided_slice %71 {offsets = [0, 32], sizes = [1, 8], strides = [1, 1]} : vector<1x128xf32> to vector<1x8xf32>
      %93 = arith.addf %89, %92 : vector<1x8xf32>
      %94 = vector.extract_strided_slice %68 {offsets = [0, 40], sizes = [1, 8], strides = [1, 1]} : vector<1x128xf32> to vector<1x8xf32>
      %95 = arith.addf %91, %94 : vector<1x8xf32>
      %96 = vector.extract_strided_slice %71 {offsets = [0, 40], sizes = [1, 8], strides = [1, 1]} : vector<1x128xf32> to vector<1x8xf32>
      %97 = arith.addf %93, %96 : vector<1x8xf32>
      %98 = vector.extract_strided_slice %68 {offsets = [0, 48], sizes = [1, 8], strides = [1, 1]} : vector<1x128xf32> to vector<1x8xf32>
      %99 = arith.addf %95, %98 : vector<1x8xf32>
      %100 = vector.extract_strided_slice %71 {offsets = [0, 48], sizes = [1, 8], strides = [1, 1]} : vector<1x128xf32> to vector<1x8xf32>
      %101 = arith.addf %97, %100 : vector<1x8xf32>
      %102 = vector.extract_strided_slice %68 {offsets = [0, 56], sizes = [1, 8], strides = [1, 1]} : vector<1x128xf32> to vector<1x8xf32>
      %103 = arith.addf %99, %102 : vector<1x8xf32>
      %104 = vector.extract_strided_slice %71 {offsets = [0, 56], sizes = [1, 8], strides = [1, 1]} : vector<1x128xf32> to vector<1x8xf32>
      %105 = arith.addf %101, %104 : vector<1x8xf32>
      %106 = vector.extract_strided_slice %68 {offsets = [0, 64], sizes = [1, 8], strides = [1, 1]} : vector<1x128xf32> to vector<1x8xf32>
      %107 = arith.addf %103, %106 : vector<1x8xf32>
      %108 = vector.extract_strided_slice %71 {offsets = [0, 64], sizes = [1, 8], strides = [1, 1]} : vector<1x128xf32> to vector<1x8xf32>
      %109 = arith.addf %105, %108 : vector<1x8xf32>
      %110 = vector.extract_strided_slice %68 {offsets = [0, 72], sizes = [1, 8], strides = [1, 1]} : vector<1x128xf32> to vector<1x8xf32>
      %111 = arith.addf %107, %110 : vector<1x8xf32>
      %112 = vector.extract_strided_slice %71 {offsets = [0, 72], sizes = [1, 8], strides = [1, 1]} : vector<1x128xf32> to vector<1x8xf32>
      %113 = arith.addf %109, %112 : vector<1x8xf32>
      %114 = vector.extract_strided_slice %68 {offsets = [0, 80], sizes = [1, 8], strides = [1, 1]} : vector<1x128xf32> to vector<1x8xf32>
      %115 = arith.addf %111, %114 : vector<1x8xf32>
      %116 = vector.extract_strided_slice %71 {offsets = [0, 80], sizes = [1, 8], strides = [1, 1]} : vector<1x128xf32> to vector<1x8xf32>
      %117 = arith.addf %113, %116 : vector<1x8xf32>
      %118 = vector.extract_strided_slice %68 {offsets = [0, 88], sizes = [1, 8], strides = [1, 1]} : vector<1x128xf32> to vector<1x8xf32>
      %119 = arith.addf %115, %118 : vector<1x8xf32>
      %120 = vector.extract_strided_slice %71 {offsets = [0, 88], sizes = [1, 8], strides = [1, 1]} : vector<1x128xf32> to vector<1x8xf32>
      %121 = arith.addf %117, %120 : vector<1x8xf32>
      %122 = vector.extract_strided_slice %68 {offsets = [0, 96], sizes = [1, 8], strides = [1, 1]} : vector<1x128xf32> to vector<1x8xf32>
      %123 = arith.addf %119, %122 : vector<1x8xf32>
      %124 = vector.extract_strided_slice %71 {offsets = [0, 96], sizes = [1, 8], strides = [1, 1]} : vector<1x128xf32> to vector<1x8xf32>
      %125 = arith.addf %121, %124 : vector<1x8xf32>
      %126 = vector.extract_strided_slice %68 {offsets = [0, 104], sizes = [1, 8], strides = [1, 1]} : vector<1x128xf32> to vector<1x8xf32>
      %127 = arith.addf %123, %126 : vector<1x8xf32>
      %128 = vector.extract_strided_slice %71 {offsets = [0, 104], sizes = [1, 8], strides = [1, 1]} : vector<1x128xf32> to vector<1x8xf32>
      %129 = arith.addf %125, %128 : vector<1x8xf32>
      %130 = vector.extract_strided_slice %68 {offsets = [0, 112], sizes = [1, 8], strides = [1, 1]} : vector<1x128xf32> to vector<1x8xf32>
      %131 = arith.addf %127, %130 : vector<1x8xf32>
      %132 = vector.extract_strided_slice %71 {offsets = [0, 112], sizes = [1, 8], strides = [1, 1]} : vector<1x128xf32> to vector<1x8xf32>
      %133 = arith.addf %129, %132 : vector<1x8xf32>
      %134 = vector.extract_strided_slice %68 {offsets = [0, 120], sizes = [1, 8], strides = [1, 1]} : vector<1x128xf32> to vector<1x8xf32>
      %135 = arith.addf %131, %134 : vector<1x8xf32>
      %136 = vector.extract_strided_slice %71 {offsets = [0, 120], sizes = [1, 8], strides = [1, 1]} : vector<1x128xf32> to vector<1x8xf32>
      %137 = arith.addf %133, %136 : vector<1x8xf32>
      %cst_82 = arith.constant 0.001953125 : f32
      %138 = vector.broadcast %cst_82 : f32 to vector<1x8xf32>
      %139 = arith.mulf %135, %138 : vector<1x8xf32>
      %cst_83 = arith.constant 0.001953125 : f32
      %140 = vector.broadcast %cst_83 : f32 to vector<1x8xf32>
      %141 = arith.mulf %137, %140 : vector<1x8xf32>
      %142 = arith.mulf %139, %139 : vector<1x8xf32>
      %143 = arith.subf %141, %142 : vector<1x8xf32>
      %cst_84 = arith.constant 0.000000e+00 : f32
      %144 = vector.broadcast %cst_84 : f32 to vector<1x8xf32>
      %145 = arith.maximumf %143, %144 : vector<1x8xf32>
      %cst_85 = arith.constant 9.99999974E-6 : f32
      %146 = vector.broadcast %cst_85 : f32 to vector<1x8xf32>
      %147 = arith.addf %145, %146 : vector<1x8xf32>
      %148 = math.rsqrt %147 : vector<1x8xf32>
      %149 = arith.mulf %65, %148 : vector<1x8xf32>
      %150 = arith.mulf %139, %149 : vector<1x8xf32>
      %151 = arith.subf %66, %150 : vector<1x8xf32>
      %152 = tpu.concatenate %149, %149, %149, %149, %149, %149, %149, %149, %149, %149, %149, %149, %149, %149, %149, %149 in 1 : vector<1x8xf32>, vector<1x8xf32>, vector<1x8xf32>, vector<1x8xf32>, vector<1x8xf32>, vector<1x8xf32>, vector<1x8xf32>, vector<1x8xf32>, vector<1x8xf32>, vector<1x8xf32>, vector<1x8xf32>, vector<1x8xf32>, vector<1x8xf32>, vector<1x8xf32>, vector<1x8xf32>, vector<1x8xf32> -> vector<1x128xf32>
      %153 = tpu.concatenate %151, %151, %151, %151, %151, %151, %151, %151, %151, %151, %151, %151, %151, %151, %151, %151 in 1 : vector<1x8xf32>, vector<1x8xf32>, vector<1x8xf32>, vector<1x8xf32>, vector<1x8xf32>, vector<1x8xf32>, vector<1x8xf32>, vector<1x8xf32>, vector<1x8xf32>, vector<1x8xf32>, vector<1x8xf32>, vector<1x8xf32>, vector<1x8xf32>, vector<1x8xf32>, vector<1x8xf32>, vector<1x8xf32> -> vector<1x128xf32>
      %154 = vector.broadcast %152 : vector<1x128xf32> to vector<32x128xf32>
      %155 = arith.mulf %64, %154 : vector<32x128xf32>
      %156 = vector.broadcast %153 : vector<1x128xf32> to vector<32x128xf32>
      %157 = arith.addf %155, %156 : vector<32x128xf32>
      %cst_86 = arith.constant 0.000000e+00 : f32
      %158 = vector.broadcast %cst_86 : f32 to vector<32x128xf32>
      %159 = arith.maximumf %157, %158 : vector<32x128xf32>
      %c0_87 = arith.constant 0 : index
      %c0_88 = arith.constant 0 : index
      %160 = vector.load %arg7[%c0_87, %c0_88] : memref<32x128xf32, #tpu.memory_space<vmem>>, vector<32x128xf32>
      tpu.vector_store %arg7[%c0_87, %c0_88], %159 {strides = array<i32>} : memref<32x128xf32, #tpu.memory_space<vmem>>, vector<32x128xf32>,
      tpu.yield
    }) : () -> ()
    "tpu.region"() ({
      %alloca = memref.alloca() : memref<2x18x144xf32, #tpu.memory_space<vmem>>
      %c0 = arith.constant 0 : index
      %c0_0 = arith.constant 0 : index
      %0 = vector.load %arg7[%c0, %c0_0] : memref<32x128xf32, #tpu.memory_space<vmem>>, vector<32x128xf32>
      %1 = vector.shape_cast %0 : vector<32x128xf32> to vector<2x16x128xf32>
      %cst = arith.constant 0.000000e+00 : f32
      %2 = vector.broadcast %cst : f32 to vector<2x1x144xf32>
      %c0_1 = arith.constant 0 : index
      %c0_2 = arith.constant 0 : index
      %c0_3 = arith.constant 0 : index
      %3 = vector.load %alloca[%c0_1, %c0_2, %c0_3] : memref<2x18x144xf32, #tpu.memory_space<vmem>>, vector<2x1x144xf32>
      tpu.vector_store %alloca[%c0_1, %c0_2, %c0_3], %2 {strides = array<i32>} : memref<2x18x144xf32, #tpu.memory_space<vmem>>, vector<2x1x144xf32>,
      %cst_4 = arith.constant 0.000000e+00 : f32
      %4 = vector.broadcast %cst_4 : f32 to vector<2x1x144xf32>
      %c0_5 = arith.constant 0 : index
      %c17 = arith.constant 17 : index
      %c0_6 = arith.constant 0 : index
      %5 = vector.load %alloca[%c0_5, %c17, %c0_6] : memref<2x18x144xf32, #tpu.memory_space<vmem>>, vector<2x1x144xf32>
      tpu.vector_store %alloca[%c0_5, %c17, %c0_6], %4 {strides = array<i32>} : memref<2x18x144xf32, #tpu.memory_space<vmem>>, vector<2x1x144xf32>,
      %cst_7 = arith.constant 0.000000e+00 : f32
      %6 = vector.broadcast %cst_7 : f32 to vector<2x16x8xf32>
      %c0_8 = arith.constant 0 : index
      %c1 = arith.constant 1 : index
      %c0_9 = arith.constant 0 : index
      %7 = vector.load %alloca[%c0_8, %c1, %c0_9] : memref<2x18x144xf32, #tpu.memory_space<vmem>>, vector<2x16x8xf32>
      tpu.vector_store %alloca[%c0_8, %c1, %c0_9], %6 {strides = array<i32>} : memref<2x18x144xf32, #tpu.memory_space<vmem>>, vector<2x16x8xf32>,
      %cst_10 = arith.constant 0.000000e+00 : f32
      %8 = vector.broadcast %cst_10 : f32 to vector<2x16x8xf32>
      %c0_11 = arith.constant 0 : index
      %c1_12 = arith.constant 1 : index
      %c136 = arith.constant 136 : index
      %9 = vector.load %alloca[%c0_11, %c1_12, %c136] : memref<2x18x144xf32, #tpu.memory_space<vmem>>, vector<2x16x8xf32>
      tpu.vector_store %alloca[%c0_11, %c1_12, %c136], %8 {strides = array<i32>} : memref<2x18x144xf32, #tpu.memory_space<vmem>>, vector<2x16x8xf32>,
      %c0_13 = arith.constant 0 : index
      %c1_14 = arith.constant 1 : index
      %c8 = arith.constant 8 : index
      %10 = vector.load %alloca[%c0_13, %c1_14, %c8] : memref<2x18x144xf32, #tpu.memory_space<vmem>>, vector<2x16x128xf32>
      tpu.vector_store %alloca[%c0_13, %c1_14, %c8], %1 {strides = array<i32>} : memref<2x18x144xf32, #tpu.memory_space<vmem>>, vector<2x16x128xf32>,
      %cst_15 = arith.constant 0.000000e+00 : f32
      %11 = vector.broadcast %cst_15 : f32 to vector<32x128xf32>
      %c0_16 = arith.constant 0 : index
      %c0_17 = arith.constant 0 : index
      %c0_18 = arith.constant 0 : index
      %12 = vector.load %alloca[%c0_16, %c0_17, %c0_18] : memref<2x18x144xf32, #tpu.memory_space<vmem>>, vector<2x16x128xf32>
      %13 = vector.shape_cast %12 : vector<2x16x128xf32> to vector<32x128xf32>
      %c0_19 = arith.constant 0 : index
      %c0_20 = arith.constant 0 : index
      %c0_21 = arith.constant 0 : index
      %14 = vector.load %arg2[%c0_19, %c0_20, %c0_21] : memref<9x128x128xf32, #tpu.memory_space<vmem>>, vector<1x128x128xf32>
      %15 = vector.shape_cast %14 : vector<1x128x128xf32> to vector<128x128xf32>
      %cst_22 = arith.constant dense<0.000000e+00> : vector<32x128xf32>
      %16 = tpu.matmul %13, %15, %cst_22 {dimension_numbers = #tpu.dot_dimension_numbers<[1], [0], [0], [1], [0, 0, 1, 1], [], []>} : vector<32x128xf32>, vector<128x128xf32>, vector<32x128xf32> -> vector<32x128xf32>
      %17 = arith.addf %11, %16 : vector<32x128xf32>
      %c0_23 = arith.constant 0 : index
      %c0_24 = arith.constant 0 : index
      %c8_25 = arith.constant 8 : index
      %18 = vector.load %alloca[%c0_23, %c0_24, %c8_25] : memref<2x18x144xf32, #tpu.memory_space<vmem>>, vector<2x16x128xf32>
      %19 = vector.shape_cast %18 : vector<2x16x128xf32> to vector<32x128xf32>
      %c1_26 = arith.constant 1 : index
      %c0_27 = arith.constant 0 : index
      %c0_28 = arith.constant 0 : index
      %20 = vector.load %arg2[%c1_26, %c0_27, %c0_28] : memref<9x128x128xf32, #tpu.memory_space<vmem>>, vector<1x128x128xf32>
      %21 = vector.shape_cast %20 : vector<1x128x128xf32> to vector<128x128xf32>
      %cst_29 = arith.constant dense<0.000000e+00> : vector<32x128xf32>
      %22 = tpu.matmul %19, %21, %cst_29 {dimension_numbers = #tpu.dot_dimension_numbers<[1], [0], [0], [1], [0, 0, 1, 1], [], []>} : vector<32x128xf32>, vector<128x128xf32>, vector<32x128xf32> -> vector<32x128xf32>
      %23 = arith.addf %17, %22 : vector<32x128xf32>
      %c0_30 = arith.constant 0 : index
      %c0_31 = arith.constant 0 : index
      %c16 = arith.constant 16 : index
      %24 = vector.load %alloca[%c0_30, %c0_31, %c16] : memref<2x18x144xf32, #tpu.memory_space<vmem>>, vector<2x16x128xf32>
      %25 = vector.shape_cast %24 : vector<2x16x128xf32> to vector<32x128xf32>
      %c2 = arith.constant 2 : index
      %c0_32 = arith.constant 0 : index
      %c0_33 = arith.constant 0 : index
      %26 = vector.load %arg2[%c2, %c0_32, %c0_33] : memref<9x128x128xf32, #tpu.memory_space<vmem>>, vector<1x128x128xf32>
      %27 = vector.shape_cast %26 : vector<1x128x128xf32> to vector<128x128xf32>
      %cst_34 = arith.constant dense<0.000000e+00> : vector<32x128xf32>
      %28 = tpu.matmul %25, %27, %cst_34 {dimension_numbers = #tpu.dot_dimension_numbers<[1], [0], [0], [1], [0, 0, 1, 1], [], []>} : vector<32x128xf32>, vector<128x128xf32>, vector<32x128xf32> -> vector<32x128xf32>
      %29 = arith.addf %23, %28 : vector<32x128xf32>
      %c0_35 = arith.constant 0 : index
      %c1_36 = arith.constant 1 : index
      %c0_37 = arith.constant 0 : index
      %30 = vector.load %alloca[%c0_35, %c1_36, %c0_37] : memref<2x18x144xf32, #tpu.memory_space<vmem>>, vector<2x16x128xf32>
      %31 = vector.shape_cast %30 : vector<2x16x128xf32> to vector<32x128xf32>
      %c3 = arith.constant 3 : index
      %c0_38 = arith.constant 0 : index
      %c0_39 = arith.constant 0 : index
      %32 = vector.load %arg2[%c3, %c0_38, %c0_39] : memref<9x128x128xf32, #tpu.memory_space<vmem>>, vector<1x128x128xf32>
      %33 = vector.shape_cast %32 : vector<1x128x128xf32> to vector<128x128xf32>
      %cst_40 = arith.constant dense<0.000000e+00> : vector<32x128xf32>
      %34 = tpu.matmul %31, %33, %cst_40 {dimension_numbers = #tpu.dot_dimension_numbers<[1], [0], [0], [1], [0, 0, 1, 1], [], []>} : vector<32x128xf32>, vector<128x128xf32>, vector<32x128xf32> -> vector<32x128xf32>
      %35 = arith.addf %29, %34 : vector<32x128xf32>
      %c0_41 = arith.constant 0 : index
      %c1_42 = arith.constant 1 : index
      %c8_43 = arith.constant 8 : index
      %36 = vector.load %alloca[%c0_41, %c1_42, %c8_43] : memref<2x18x144xf32, #tpu.memory_space<vmem>>, vector<2x16x128xf32>
      %37 = vector.shape_cast %36 : vector<2x16x128xf32> to vector<32x128xf32>
      %c4 = arith.constant 4 : index
      %c0_44 = arith.constant 0 : index
      %c0_45 = arith.constant 0 : index
      %38 = vector.load %arg2[%c4, %c0_44, %c0_45] : memref<9x128x128xf32, #tpu.memory_space<vmem>>, vector<1x128x128xf32>
      %39 = vector.shape_cast %38 : vector<1x128x128xf32> to vector<128x128xf32>
      %cst_46 = arith.constant dense<0.000000e+00> : vector<32x128xf32>
      %40 = tpu.matmul %37, %39, %cst_46 {dimension_numbers = #tpu.dot_dimension_numbers<[1], [0], [0], [1], [0, 0, 1, 1], [], []>} : vector<32x128xf32>, vector<128x128xf32>, vector<32x128xf32> -> vector<32x128xf32>
      %41 = arith.addf %35, %40 : vector<32x128xf32>
      %c0_47 = arith.constant 0 : index
      %c1_48 = arith.constant 1 : index
      %c16_49 = arith.constant 16 : index
      %42 = vector.load %alloca[%c0_47, %c1_48, %c16_49] : memref<2x18x144xf32, #tpu.memory_space<vmem>>, vector<2x16x128xf32>
      %43 = vector.shape_cast %42 : vector<2x16x128xf32> to vector<32x128xf32>
      %c5 = arith.constant 5 : index
      %c0_50 = arith.constant 0 : index
      %c0_51 = arith.constant 0 : index
      %44 = vector.load %arg2[%c5, %c0_50, %c0_51] : memref<9x128x128xf32, #tpu.memory_space<vmem>>, vector<1x128x128xf32>
      %45 = vector.shape_cast %44 : vector<1x128x128xf32> to vector<128x128xf32>
      %cst_52 = arith.constant dense<0.000000e+00> : vector<32x128xf32>
      %46 = tpu.matmul %43, %45, %cst_52 {dimension_numbers = #tpu.dot_dimension_numbers<[1], [0], [0], [1], [0, 0, 1, 1], [], []>} : vector<32x128xf32>, vector<128x128xf32>, vector<32x128xf32> -> vector<32x128xf32>
      %47 = arith.addf %41, %46 : vector<32x128xf32>
      %c0_53 = arith.constant 0 : index
      %c2_54 = arith.constant 2 : index
      %c0_55 = arith.constant 0 : index
      %48 = vector.load %alloca[%c0_53, %c2_54, %c0_55] : memref<2x18x144xf32, #tpu.memory_space<vmem>>, vector<2x16x128xf32>
      %49 = vector.shape_cast %48 : vector<2x16x128xf32> to vector<32x128xf32>
      %c6 = arith.constant 6 : index
      %c0_56 = arith.constant 0 : index
      %c0_57 = arith.constant 0 : index
      %50 = vector.load %arg2[%c6, %c0_56, %c0_57] : memref<9x128x128xf32, #tpu.memory_space<vmem>>, vector<1x128x128xf32>
      %51 = vector.shape_cast %50 : vector<1x128x128xf32> to vector<128x128xf32>
      %cst_58 = arith.constant dense<0.000000e+00> : vector<32x128xf32>
      %52 = tpu.matmul %49, %51, %cst_58 {dimension_numbers = #tpu.dot_dimension_numbers<[1], [0], [0], [1], [0, 0, 1, 1], [], []>} : vector<32x128xf32>, vector<128x128xf32>, vector<32x128xf32> -> vector<32x128xf32>
      %53 = arith.addf %47, %52 : vector<32x128xf32>
      %c0_59 = arith.constant 0 : index
      %c2_60 = arith.constant 2 : index
      %c8_61 = arith.constant 8 : index
      %54 = vector.load %alloca[%c0_59, %c2_60, %c8_61] : memref<2x18x144xf32, #tpu.memory_space<vmem>>, vector<2x16x128xf32>
      %55 = vector.shape_cast %54 : vector<2x16x128xf32> to vector<32x128xf32>
      %c7 = arith.constant 7 : index
      %c0_62 = arith.constant 0 : index
      %c0_63 = arith.constant 0 : index
      %56 = vector.load %arg2[%c7, %c0_62, %c0_63] : memref<9x128x128xf32, #tpu.memory_space<vmem>>, vector<1x128x128xf32>
      %57 = vector.shape_cast %56 : vector<1x128x128xf32> to vector<128x128xf32>
      %cst_64 = arith.constant dense<0.000000e+00> : vector<32x128xf32>
      %58 = tpu.matmul %55, %57, %cst_64 {dimension_numbers = #tpu.dot_dimension_numbers<[1], [0], [0], [1], [0, 0, 1, 1], [], []>} : vector<32x128xf32>, vector<128x128xf32>, vector<32x128xf32> -> vector<32x128xf32>
      %59 = arith.addf %53, %58 : vector<32x128xf32>
      %c0_65 = arith.constant 0 : index
      %c2_66 = arith.constant 2 : index
      %c16_67 = arith.constant 16 : index
      %60 = vector.load %alloca[%c0_65, %c2_66, %c16_67] : memref<2x18x144xf32, #tpu.memory_space<vmem>>, vector<2x16x128xf32>
      %61 = vector.shape_cast %60 : vector<2x16x128xf32> to vector<32x128xf32>
      %c8_68 = arith.constant 8 : index
      %c0_69 = arith.constant 0 : index
      %c0_70 = arith.constant 0 : index
      %62 = vector.load %arg2[%c8_68, %c0_69, %c0_70] : memref<9x128x128xf32, #tpu.memory_space<vmem>>, vector<1x128x128xf32>
      %63 = vector.shape_cast %62 : vector<1x128x128xf32> to vector<128x128xf32>
      %cst_71 = arith.constant dense<0.000000e+00> : vector<32x128xf32>
      %64 = tpu.matmul %61, %63, %cst_71 {dimension_numbers = #tpu.dot_dimension_numbers<[1], [0], [0], [1], [0, 0, 1, 1], [], []>} : vector<32x128xf32>, vector<128x128xf32>, vector<32x128xf32> -> vector<32x128xf32>
      %65 = arith.addf %59, %64 : vector<32x128xf32>
      %c0_72 = arith.constant 0 : index
      %c0_73 = arith.constant 0 : index
      %66 = vector.load %arg5[%c0_72, %c0_73] : memref<1x8xf32, #tpu.memory_space<vmem>>, vector<1x8xf32>
      %c0_74 = arith.constant 0 : index
      %c0_75 = arith.constant 0 : index
      %67 = vector.load %arg6[%c0_74, %c0_75] : memref<1x8xf32, #tpu.memory_space<vmem>>, vector<1x8xf32>
      %cst_76 = arith.constant dense<0.000000e+00> : vector<128xf32>
      %68 = vector.multi_reduction <add>, %65, %cst_76 [0] : vector<32x128xf32> to vector<128xf32>
      %69 = vector.shape_cast %68 : vector<128xf32> to vector<1x128xf32>
      %70 = arith.mulf %65, %65 : vector<32x128xf32>
      %cst_77 = arith.constant dense<0.000000e+00> : vector<128xf32>
      %71 = vector.multi_reduction <add>, %70, %cst_77 [0] : vector<32x128xf32> to vector<128xf32>
      %72 = vector.shape_cast %71 : vector<128xf32> to vector<1x128xf32>
      %cst_78 = arith.constant 0.000000e+00 : f32
      %73 = vector.broadcast %cst_78 : f32 to vector<1x8xf32>
      %cst_79 = arith.constant 0.000000e+00 : f32
      %74 = vector.broadcast %cst_79 : f32 to vector<1x8xf32>
      %75 = vector.extract_strided_slice %69 {offsets = [0, 0], sizes = [1, 8], strides = [1, 1]} : vector<1x128xf32> to vector<1x8xf32>
      %76 = arith.addf %73, %75 : vector<1x8xf32>
      %77 = vector.extract_strided_slice %72 {offsets = [0, 0], sizes = [1, 8], strides = [1, 1]} : vector<1x128xf32> to vector<1x8xf32>
      %78 = arith.addf %74, %77 : vector<1x8xf32>
      %79 = vector.extract_strided_slice %69 {offsets = [0, 8], sizes = [1, 8], strides = [1, 1]} : vector<1x128xf32> to vector<1x8xf32>
      %80 = arith.addf %76, %79 : vector<1x8xf32>
      %81 = vector.extract_strided_slice %72 {offsets = [0, 8], sizes = [1, 8], strides = [1, 1]} : vector<1x128xf32> to vector<1x8xf32>
      %82 = arith.addf %78, %81 : vector<1x8xf32>
      %83 = vector.extract_strided_slice %69 {offsets = [0, 16], sizes = [1, 8], strides = [1, 1]} : vector<1x128xf32> to vector<1x8xf32>
      %84 = arith.addf %80, %83 : vector<1x8xf32>
      %85 = vector.extract_strided_slice %72 {offsets = [0, 16], sizes = [1, 8], strides = [1, 1]} : vector<1x128xf32> to vector<1x8xf32>
      %86 = arith.addf %82, %85 : vector<1x8xf32>
      %87 = vector.extract_strided_slice %69 {offsets = [0, 24], sizes = [1, 8], strides = [1, 1]} : vector<1x128xf32> to vector<1x8xf32>
      %88 = arith.addf %84, %87 : vector<1x8xf32>
      %89 = vector.extract_strided_slice %72 {offsets = [0, 24], sizes = [1, 8], strides = [1, 1]} : vector<1x128xf32> to vector<1x8xf32>
      %90 = arith.addf %86, %89 : vector<1x8xf32>
      %91 = vector.extract_strided_slice %69 {offsets = [0, 32], sizes = [1, 8], strides = [1, 1]} : vector<1x128xf32> to vector<1x8xf32>
      %92 = arith.addf %88, %91 : vector<1x8xf32>
      %93 = vector.extract_strided_slice %72 {offsets = [0, 32], sizes = [1, 8], strides = [1, 1]} : vector<1x128xf32> to vector<1x8xf32>
      %94 = arith.addf %90, %93 : vector<1x8xf32>
      %95 = vector.extract_strided_slice %69 {offsets = [0, 40], sizes = [1, 8], strides = [1, 1]} : vector<1x128xf32> to vector<1x8xf32>
      %96 = arith.addf %92, %95 : vector<1x8xf32>
      %97 = vector.extract_strided_slice %72 {offsets = [0, 40], sizes = [1, 8], strides = [1, 1]} : vector<1x128xf32> to vector<1x8xf32>
      %98 = arith.addf %94, %97 : vector<1x8xf32>
      %99 = vector.extract_strided_slice %69 {offsets = [0, 48], sizes = [1, 8], strides = [1, 1]} : vector<1x128xf32> to vector<1x8xf32>
      %100 = arith.addf %96, %99 : vector<1x8xf32>
      %101 = vector.extract_strided_slice %72 {offsets = [0, 48], sizes = [1, 8], strides = [1, 1]} : vector<1x128xf32> to vector<1x8xf32>
      %102 = arith.addf %98, %101 : vector<1x8xf32>
      %103 = vector.extract_strided_slice %69 {offsets = [0, 56], sizes = [1, 8], strides = [1, 1]} : vector<1x128xf32> to vector<1x8xf32>
      %104 = arith.addf %100, %103 : vector<1x8xf32>
      %105 = vector.extract_strided_slice %72 {offsets = [0, 56], sizes = [1, 8], strides = [1, 1]} : vector<1x128xf32> to vector<1x8xf32>
      %106 = arith.addf %102, %105 : vector<1x8xf32>
      %107 = vector.extract_strided_slice %69 {offsets = [0, 64], sizes = [1, 8], strides = [1, 1]} : vector<1x128xf32> to vector<1x8xf32>
      %108 = arith.addf %104, %107 : vector<1x8xf32>
      %109 = vector.extract_strided_slice %72 {offsets = [0, 64], sizes = [1, 8], strides = [1, 1]} : vector<1x128xf32> to vector<1x8xf32>
      %110 = arith.addf %106, %109 : vector<1x8xf32>
      %111 = vector.extract_strided_slice %69 {offsets = [0, 72], sizes = [1, 8], strides = [1, 1]} : vector<1x128xf32> to vector<1x8xf32>
      %112 = arith.addf %108, %111 : vector<1x8xf32>
      %113 = vector.extract_strided_slice %72 {offsets = [0, 72], sizes = [1, 8], strides = [1, 1]} : vector<1x128xf32> to vector<1x8xf32>
      %114 = arith.addf %110, %113 : vector<1x8xf32>
      %115 = vector.extract_strided_slice %69 {offsets = [0, 80], sizes = [1, 8], strides = [1, 1]} : vector<1x128xf32> to vector<1x8xf32>
      %116 = arith.addf %112, %115 : vector<1x8xf32>
      %117 = vector.extract_strided_slice %72 {offsets = [0, 80], sizes = [1, 8], strides = [1, 1]} : vector<1x128xf32> to vector<1x8xf32>
      %118 = arith.addf %114, %117 : vector<1x8xf32>
      %119 = vector.extract_strided_slice %69 {offsets = [0, 88], sizes = [1, 8], strides = [1, 1]} : vector<1x128xf32> to vector<1x8xf32>
      %120 = arith.addf %116, %119 : vector<1x8xf32>
      %121 = vector.extract_strided_slice %72 {offsets = [0, 88], sizes = [1, 8], strides = [1, 1]} : vector<1x128xf32> to vector<1x8xf32>
      %122 = arith.addf %118, %121 : vector<1x8xf32>
      %123 = vector.extract_strided_slice %69 {offsets = [0, 96], sizes = [1, 8], strides = [1, 1]} : vector<1x128xf32> to vector<1x8xf32>
      %124 = arith.addf %120, %123 : vector<1x8xf32>
      %125 = vector.extract_strided_slice %72 {offsets = [0, 96], sizes = [1, 8], strides = [1, 1]} : vector<1x128xf32> to vector<1x8xf32>
      %126 = arith.addf %122, %125 : vector<1x8xf32>
      %127 = vector.extract_strided_slice %69 {offsets = [0, 104], sizes = [1, 8], strides = [1, 1]} : vector<1x128xf32> to vector<1x8xf32>
      %128 = arith.addf %124, %127 : vector<1x8xf32>
      %129 = vector.extract_strided_slice %72 {offsets = [0, 104], sizes = [1, 8], strides = [1, 1]} : vector<1x128xf32> to vector<1x8xf32>
      %130 = arith.addf %126, %129 : vector<1x8xf32>
      %131 = vector.extract_strided_slice %69 {offsets = [0, 112], sizes = [1, 8], strides = [1, 1]} : vector<1x128xf32> to vector<1x8xf32>
      %132 = arith.addf %128, %131 : vector<1x8xf32>
      %133 = vector.extract_strided_slice %72 {offsets = [0, 112], sizes = [1, 8], strides = [1, 1]} : vector<1x128xf32> to vector<1x8xf32>
      %134 = arith.addf %130, %133 : vector<1x8xf32>
      %135 = vector.extract_strided_slice %69 {offsets = [0, 120], sizes = [1, 8], strides = [1, 1]} : vector<1x128xf32> to vector<1x8xf32>
      %136 = arith.addf %132, %135 : vector<1x8xf32>
      %137 = vector.extract_strided_slice %72 {offsets = [0, 120], sizes = [1, 8], strides = [1, 1]} : vector<1x128xf32> to vector<1x8xf32>
      %138 = arith.addf %134, %137 : vector<1x8xf32>
      %cst_80 = arith.constant 0.001953125 : f32
      %139 = vector.broadcast %cst_80 : f32 to vector<1x8xf32>
      %140 = arith.mulf %136, %139 : vector<1x8xf32>
      %cst_81 = arith.constant 0.001953125 : f32
      %141 = vector.broadcast %cst_81 : f32 to vector<1x8xf32>
      %142 = arith.mulf %138, %141 : vector<1x8xf32>
      %143 = arith.mulf %140, %140 : vector<1x8xf32>
      %144 = arith.subf %142, %143 : vector<1x8xf32>
      %cst_82 = arith.constant 0.000000e+00 : f32
      %145 = vector.broadcast %cst_82 : f32 to vector<1x8xf32>
      %146 = arith.maximumf %144, %145 : vector<1x8xf32>
      %cst_83 = arith.constant 9.99999974E-6 : f32
      %147 = vector.broadcast %cst_83 : f32 to vector<1x8xf32>
      %148 = arith.addf %146, %147 : vector<1x8xf32>
      %149 = math.rsqrt %148 : vector<1x8xf32>
      %150 = arith.mulf %66, %149 : vector<1x8xf32>
      %151 = arith.mulf %140, %150 : vector<1x8xf32>
      %152 = arith.subf %67, %151 : vector<1x8xf32>
      %153 = tpu.concatenate %150, %150, %150, %150, %150, %150, %150, %150, %150, %150, %150, %150, %150, %150, %150, %150 in 1 : vector<1x8xf32>, vector<1x8xf32>, vector<1x8xf32>, vector<1x8xf32>, vector<1x8xf32>, vector<1x8xf32>, vector<1x8xf32>, vector<1x8xf32>, vector<1x8xf32>, vector<1x8xf32>, vector<1x8xf32>, vector<1x8xf32>, vector<1x8xf32>, vector<1x8xf32>, vector<1x8xf32>, vector<1x8xf32> -> vector<1x128xf32>
      %154 = tpu.concatenate %152, %152, %152, %152, %152, %152, %152, %152, %152, %152, %152, %152, %152, %152, %152, %152 in 1 : vector<1x8xf32>, vector<1x8xf32>, vector<1x8xf32>, vector<1x8xf32>, vector<1x8xf32>, vector<1x8xf32>, vector<1x8xf32>, vector<1x8xf32>, vector<1x8xf32>, vector<1x8xf32>, vector<1x8xf32>, vector<1x8xf32>, vector<1x8xf32>, vector<1x8xf32>, vector<1x8xf32>, vector<1x8xf32> -> vector<1x128xf32>
      %155 = vector.broadcast %153 : vector<1x128xf32> to vector<32x128xf32>
      %156 = arith.mulf %65, %155 : vector<32x128xf32>
      %157 = vector.broadcast %154 : vector<1x128xf32> to vector<32x128xf32>
      %158 = arith.addf %156, %157 : vector<32x128xf32>
      %cst_84 = arith.constant 0.000000e+00 : f32
      %159 = vector.broadcast %cst_84 : f32 to vector<32x128xf32>
      %160 = arith.maximumf %158, %159 : vector<32x128xf32>
      %c0_85 = arith.constant 0 : index
      %c0_86 = arith.constant 0 : index
      %161 = vector.load %arg7[%c0_85, %c0_86] : memref<32x128xf32, #tpu.memory_space<vmem>>, vector<32x128xf32>
      tpu.vector_store %arg7[%c0_85, %c0_86], %160 {strides = array<i32>} : memref<32x128xf32, #tpu.memory_space<vmem>>, vector<32x128xf32>,
      tpu.yield
    }) : () -> ()
    return
  }
}

</mosaic_0001>

<bundles_post_ra>
// kernel: double_conv_block.1
= control target key start
LH: loop header
LB: loop body
LE: loop exit
PB: predicated region body
PF: predicated region fallthrough
CT: control target
= control target key end

     0   :  { %vm35_vm0 = vcmask 31744   ;;  %s4766_s28 = smov 4   ;;  %v4767_v2 = vmov 0.0   ;;  %vm40_vm1 = vcmask 589344   ;;  %vm30_vm2 = vcmask 581632   ;;  %s4768_s29 = smov 124   ;;  %s6126_s0 = inlined_call_operand.vmem [shape: f32[2,16,64], index: 0, kind: input, shape index: {}]   ;;  %s6127_s1 = inlined_call_operand.vmem [shape: f32[9,64,128], index: 1, kind: input, shape index: {}]   ;;  %s6128_s2 = inlined_call_operand.vmem [shape: f32[9,128,128], index: 2, kind: input, shape index: {}]   ;;  %s6129_s3 = inlined_call_operand.vmem [shape: f32[1,8], index: 3, kind: input, shape index: {}]   ;;  %s6130_s4 = inlined_call_operand.vmem [shape: f32[1,8], index: 4, kind: input, shape index: {}]   ;;  %s6131_s5 = inlined_call_operand.vmem [shape: f32[1,8], index: 5, kind: input, shape index: {}]   ;;  %s6132_s6 = inlined_call_operand.vmem [shape: f32[1,8], index: 6, kind: input, shape index: {}]   ;;  %s6133_s7 = inlined_call_operand.vmem [shape: f32[32,128], index: 7, kind: output, shape index: {}]  }
   0x1   :  { %v26_v0 = vld [vmem:[%s6126_s0] sm:$0xff]  ;;  %v28_v1 = vld [vmem:[%s6126_s0 + $0x10] sm:$0xff]  ;;  %36 = vst.msk [vmem:[#allocation2 + $0x1] sm:$0xff] %vm35_vm0, %v4767_v2  ;;  %37 = vst.msk [vmem:[#allocation2 + $0x9] sm:$0xff] %vm35_vm0, %v4767_v2  ;;  %vm61_vm3 = vcmask 556064   ;;  %s4769_s30 = smov 120  }
   0x2   :  { %49 = vrot.lane.b32.xlu0 %v26_v0, %s4766_s28  ;;  %53 = vrot.lane.b32.xlu1 %v28_v1, %s4766_s28  ;;  %38 = vst.msk [vmem:[#allocation2 + $0x13] sm:$0xff] %vm35_vm0, %v4767_v2  ;;  %39 = vst.msk [vmem:[#allocation2 + $0x1b] sm:$0xff] %vm35_vm0, %v4767_v2  ;;  %v27_v3 = vld [vmem:[%s6126_s0 + $0x8] sm:$0xff]  ;;  %v29_v4 = vld [vmem:[%s6126_s0 + $0x18] sm:$0xff]  ;;  %vm99_vm4 = vcmask 523264   ;;  %s4771_s16 = smov 104  }
   0x3   :  { %41 = vst.msk [vmem:[#allocation2 + $0x1] sm:$0xff] %vm40_vm1, %v4767_v2  ;;  %43 = vst.msk [vmem:[#allocation2 + $0x13] sm:$0xff] %vm40_vm1, %v4767_v2  ;;  %v3056_v5 = vld [vmem:[%s6127_s1 + $0x40] sm:$0xff]  ;;  %v3057_v6 = vld [vmem:[%s6127_s1 + $0x48] sm:$0xff]  ;;  %s4772_s17 = smov 96   ;;  %s4773_s18 = smov 88  }
   0x4   :  { %42 = vst.msk [vmem:[#allocation2 + $0x9] sm:$0xff] %vm40_vm1, %v4767_v2  ;;  %44 = vst.msk [vmem:[#allocation2 + $0x1b] sm:$0xff] %vm40_vm1, %v4767_v2  ;;  %v3058_v7 = vld [vmem:[%s6127_s1 + $0x50] sm:$0xff]  ;;  %v4112_v8 = vpack.c.bf16 %v3057_v6, %v3056_v5  ;;  %v3059_v9 = vld [vmem:[%s6127_s1 + $0x58] sm:$0xff]  ;;  %s4774_s19 = smov 80   ;;  %s4775_s20 = smov 72  }
   0x5   :  { %31 = vst.msk [vmem:[#allocation2] sm:$0x1] %vm30_vm2, %v4767_v2  ;;  %32 = vst.msk [vmem:[#allocation2 + $0x12] sm:$0x1] %vm30_vm2, %v4767_v2  ;;  %v4116_v10 = vpack.c.bf16 %v3059_v9, %v3058_v7  ;;  %v3060_v11 = vld [vmem:[%s6127_s1 + $0x60] sm:$0xff]  ;;  %v3061_v12 = vld [vmem:[%s6127_s1 + $0x68] sm:$0xff] }
   0x6   :  { %33 = vst.msk [vmem:[#allocation2 + $0x11] sm:$0x1] %vm30_vm2, %v4767_v2  ;;  %34 = vst.msk [vmem:[#allocation2 + $0x23] sm:$0x1] %vm30_vm2, %v4767_v2  ;;  %51 = vrot.lane.b32.xlu0 %v27_v3, %s4766_s28  ;;  %55 = vrot.lane.b32.xlu1 %v29_v4, %s4766_s28  ;;  %v4120_v13 = vpack.c.bf16 %v3061_v12, %v3060_v11  ;;  %v3062_v14 = vld [vmem:[%s6127_s1 + $0x70] sm:$0xff]  ;;  %v3063_v15 = vld [vmem:[%s6127_s1 + $0x78] sm:$0xff] }
   0x7   :  { %4113 = vmatprep.subr.bf16.mxu0 %v4112_v8  ;;  %v4124_v16 = vpack.c.bf16 %v3063_v15, %v3062_v14  ;;  %v70_v17 = vld [vmem:[%s6127_s1] sm:$0xff]  ;;  %v71_v18 = vld [vmem:[%s6127_s1 + $0x8] sm:$0xff]  ;;  %v72_v37 = vld [vmem:[%s6127_s1 + $0x10] sm:$0xff]  ;;  %s4776_s21 = smov 64   ;;  %s4777_s22 = smov 56   ;;  %vm1292_vm5 = vcmask 64512  }
   0x8   :  { %4115 = vmatpush3.bf16.msra.mxu0 %v4112_v8  ;;  %v4128_v19 = vpack.c.bf16 %v71_v18, %v70_v17  ;;  %v73_v38 = vld [vmem:[%s6127_s1 + $0x18] sm:$0xff]  ;;  %v74_v41 = vld [vmem:[%s6127_s1 + $0x20] sm:$0xff]  ;;  %v75_v42 = vld [vmem:[%s6127_s1 + $0x28] sm:$0xff]  ;;  %s4778_s23 = smov 48   ;;  %s4779_s24 = smov 40   ;;  %vm1294_vm6 = vcmask 130048  }
   0x9   :  { %4117 = vmatprep.subr.bf16.mxu0 %v4116_v10  ;;  %v4132_v39 = vpack.c.bf16 %v73_v38, %v72_v37  ;;  %v4136_v44 = vpack.c.bf16 %v75_v42, %v74_v41  ;;  %v76_v46 = vld [vmem:[%s6127_s1 + $0x30] sm:$0xff]  ;;  %v77_v47 = vld [vmem:[%s6127_s1 + $0x38] sm:$0xff]  ;;  %v3072_v49 = vld [vmem:[%s6127_s1 + $0x80] sm:$0xff]  ;;  %s4780_s25 = smov 32   ;;  %s4781_s26 = smov 24   ;;  %vm1296_vm7 = vcmask 195584  }
   0xa   :  { %v4140_v48 = vpack.c.bf16 %v77_v47, %v76_v46  ;;  %v3073_v50 = vld [vmem:[%s6127_s1 + $0x88] sm:$0xff]  ;;  %v3074_v52 = vld [vmem:[%s6127_s1 + $0x90] sm:$0xff]  ;;  %v3075_v53 = vld [vmem:[%s6127_s1 + $0x98] sm:$0xff]  ;;  %s4782_s27 = smov 16   ;;  %s4783_s28 = smov 8   ;;  %vm1298_vm8 = vcmask 261120  }
   0xb   :  { %v4144_v51 = vpack.c.bf16 %v3073_v50, %v3072_v49  ;;  %v4148_v54 = vpack.c.bf16 %v3075_v53, %v3074_v52  ;;  %v3076_v55 = vld [vmem:[%s6127_s1 + $0xa0] sm:$0xff]  ;;  %v3077_v56 = vld [vmem:[%s6127_s1 + $0xa8] sm:$0xff]  ;;  %v3078_v58 = vld [vmem:[%s6127_s1 + $0xb0] sm:$0xff]  ;;  %vm1300_vm9 = vcmask 326656   ;;  %vm1302_vm10 = vcmask 392192  }
   0xc   :  { %4119 = vmatpush3.bf16.msra.mxu0 %v4116_v10  ;;  %v4152_v57 = vpack.c.bf16 %v3077_v56, %v3076_v55  ;;  %v3079_v59 = vld [vmem:[%s6127_s1 + $0xb8] sm:$0xff]  ;;  %v3084_v62 = vld [vmem:[%s6127_s1 + $0xc0] sm:$0xff]  ;;  %v3085_v63 = vld [vmem:[%s6127_s1 + $0xc8] sm:$0xff]  ;;  %vm1304_vm11 = vcmask 457728   ;;  %vm1307_vm12 = vcmask 588800   ;;  %vm6137_vm13 = vcmask 654336  }
   0xd   :  { %4121 = vmatprep.subr.bf16.mxu0 %v4120_v13  ;;  %v4156_v61 = vpack.c.bf16 %v3079_v59, %v3078_v58  ;;  %v4160_v0 = vpack.c.bf16 %v3085_v63, %v3084_v62  ;;  %v3086_v1 = vld [vmem:[%s6127_s1 + $0xd0] sm:$0xff]  ;;  %v3087_v2 = vld [vmem:[%s6127_s1 + $0xd8] sm:$0xff]  ;;  %v3088_v5 = vld [vmem:[%s6127_s1 + $0xe0] sm:$0xff]  ;;  %vm6136_vm14 = vcmask 719872   ;;  %vm6135_vm15 = vcmask 785408  }
   0xe   :  { %v4164_v4 = vpack.c.bf16 %v3087_v2, %v3086_v1  ;;  %v3089_v6 = vld [vmem:[%s6127_s1 + $0xe8] sm:$0xff]  ;;  %v3090_v10 = vld [vmem:[%s6127_s1 + $0xf0] sm:$0xff]  ;;  %v3091_v11 = vld [vmem:[%s6127_s1 + $0xf8] sm:$0xff]  ;;  %vm6134_vm0 = vcmask 850944   ;;  %vm1317_vm1 = vcmask 916480   ;;  %vm1319_vm2 = vcmask 982016  }
   0xf   :  { %v4168_v8 = vpack.c.bf16 %v3089_v6, %v3088_v5  ;;  %v4172_v12 = vpack.c.bf16 %v3091_v11, %v3090_v10  ;;  %v3097_v14 = vld [vmem:[%s6127_s1 + $0x108] sm:$0xff]  ;;  %v3099_v17 = vld [vmem:[%s6127_s1 + $0x118] sm:$0xff]  ;;  %v3112_v38 = vld [vmem:[%s6127_s1 + $0x160] sm:$0xff] }
  0x10   :  { %4123 = vmatpush3.bf16.msra.mxu0 %v4120_v13  ;;  %v3096_v13 = vld [vmem:[%s6127_s1 + $0x100] sm:$0xff]  ;;  %v3114_v42 = vld [vmem:[%s6127_s1 + $0x170] sm:$0xff]  ;;  %v3121_v47 = vld [vmem:[%s6127_s1 + $0x188] sm:$0xff] }
  0x11   :  { %4125 = vmatprep.subr.bf16.mxu0 %v4124_v16  ;;  %v4176_v15 = vpack.c.bf16 %v3097_v14, %v3096_v13  ;;  %v3120_v46 = vld [vmem:[%s6127_s1 + $0x180] sm:$0xff]  ;;  %v3122_v49 = vld [vmem:[%s6127_s1 + $0x190] sm:$0xff]  ;;  %v3123_v50 = vld [vmem:[%s6127_s1 + $0x198] sm:$0xff] }
  0x12   :  { %v4212_v52 = vpack.c.bf16 %v3123_v50, %v3122_v49  ;;  %v3124_v53 = vld [vmem:[%s6127_s1 + $0x1a0] sm:$0xff]  ;;  %v3126_v58 = vld [vmem:[%s6127_s1 + $0x1b0] sm:$0xff]  ;;  %v3127_v59 = vld [vmem:[%s6127_s1 + $0x1b8] sm:$0xff] }
  0x13   :  { %v3133_v62 = vld [vmem:[%s6127_s1 + $0x1c8] sm:$0xff]  ;;  %v3136_v2 = vld [vmem:[%s6127_s1 + $0x1e0] sm:$0xff]  ;;  %v3138_v5 = vld [vmem:[%s6127_s1 + $0x1f0] sm:$0xff] }
  0x14   :  { %4127 = vmatpush3.bf16.msra.mxu0 %v4124_v16  ;;  %v3098_v16 = vld [vmem:[%s6127_s1 + $0x110] sm:$0xff]  ;;  %v3139_v6 = vld [vmem:[%s6127_s1 + $0x1f8] sm:$0xff]  ;;  %v3148_v14 = vld [vmem:[%s6127_s1 + $0x220] sm:$0xff] }
  0x15   :  { %4129 = vmatprep.subr.bf16.mxu0 %v4128_v19  ;;  %v4180_v18 = vpack.c.bf16 %v3099_v17, %v3098_v16  ;;  %v3147_v10 = vld [vmem:[%s6127_s1 + $0x218] sm:$0xff] }
  0x74   :  { %v50_v20 = vpop.permute.xlu0 %49  ;;  %v54_v21 = vpop.permute.xlu1 %53 }
  0x75   :  { %62 = vst.msk [vmem:[#allocation2 + $0x1] sm:$0xff] %vm61_vm3, %v50_v20  ;;  %64 = vst.msk [vmem:[#allocation2 + $0x13] sm:$0xff] %vm61_vm3, %v54_v21  ;;  %v3101_v20 = vld [vmem:[%s6127_s1 + $0x128] sm:$0xff] }
  0x78   :  { %v52_v22 = vpop.permute.xlu0 %51  ;;  %v56_v23 = vpop.permute.xlu1 %55 }
  0x79   :  { %63 = vst.msk [vmem:[#allocation2 + $0x9] sm:$0xff] %vm61_vm3, %v52_v22  ;;  %65 = vst.msk [vmem:[#allocation2 + $0x1b] sm:$0xff] %vm61_vm3, %v56_v23  ;;  %v3102_v22 = vld [vmem:[%s6127_s1 + $0x130] sm:$0xff]  ;;  %v3103_v23 = vld [vmem:[%s6127_s1 + $0x138] sm:$0xff] }
  0x7c   :  { %v66_v24 = vld [vmem:[#allocation2] sm:$0xff]  ;;  %v4883_v25 = vld [vmem:[#allocation2 + $0x12] sm:$0xff] }
  0x7d   :  { %91 = vrot.lane.b32.xlu0 %v66_v24, %s4768_s29  ;;  %v4900_v28 = vld [vmem:[#allocation2 + $0x1] sm:$0xff]  ;;  %v4906_v29 = vld [vmem:[#allocation2 + $0x13] sm:$0xff] }
  0x80   :  { %v4885_v26 = vld [vmem:[#allocation2 + $0x8] sm:$0xff]  ;;  %v4891_v27 = vld [vmem:[#allocation2 + $0x1a] sm:$0xff] }
  0x81   :  { %95 = vrot.lane.b32.xlu0 %v4883_v25, %s4768_s29  ;;  %93 = vrot.lane.b32.xlu1 %v4885_v26, %s4768_s29  ;;  %v4908_v30 = vld [vmem:[#allocation2 + $0x9] sm:$0xff]  ;;  %v4914_v31 = vld [vmem:[#allocation2 + $0x1b] sm:$0xff] }
  0x82   :  { %v4924_v32 = vld [vmem:[#allocation2 + $0x2] sm:$0xff]  ;;  %v4930_v33 = vld [vmem:[#allocation2 + $0x14] sm:$0xff]  ;;  %v4932_v34 = vld [vmem:[#allocation2 + $0xa] sm:$0xff] }
  0x83   :  { %v4938_v35 = vld [vmem:[#allocation2 + $0x1c] sm:$0xff] }
  0x85   :  { %295 = vrot.lane.b32.xlu0 %v66_v24, %s4769_s30  ;;  %97 = vrot.lane.b32.xlu1 %v4891_v27, %s4768_s29 }
  0x89   :  { %299 = vrot.lane.b32.xlu0 %v4883_v25, %s4769_s30  ;;  %297 = vrot.lane.b32.xlu1 %v4885_v26, %s4769_s30 }
  0x8d   :  { %523 = vrot.lane.b32.xlu0 %v4900_v28, %s4768_s29  ;;  %301 = vrot.lane.b32.xlu1 %v4891_v27, %s4769_s30 }
  0x91   :  { %527 = vrot.lane.b32.xlu0 %v4906_v29, %s4768_s29  ;;  %525 = vrot.lane.b32.xlu1 %v4908_v30, %s4768_s29 }
  0x95   :  { %637 = vrot.lane.b32.xlu0 %v4900_v28, %s4769_s30  ;;  %529 = vrot.lane.b32.xlu1 %v4914_v31, %s4768_s29 }
  0x99   :  { %641 = vrot.lane.b32.xlu0 %v4906_v29, %s4769_s30  ;;  %639 = vrot.lane.b32.xlu1 %v4908_v30, %s4769_s30 }
  0x9d   :  { %865 = vrot.lane.b32.xlu0 %v4924_v32, %s4768_s29  ;;  %643 = vrot.lane.b32.xlu1 %v4914_v31, %s4769_s30 }
  0xa1   :  { %869 = vrot.lane.b32.xlu0 %v4930_v33, %s4768_s29  ;;  %867 = vrot.lane.b32.xlu1 %v4932_v34, %s4768_s29 }
  0xa5   :  { %979 = vrot.lane.b32.xlu0 %v4924_v32, %s4769_s30  ;;  %871 = vrot.lane.b32.xlu1 %v4938_v35, %s4768_s29 }
  0xa9   :  { %983 = vrot.lane.b32.xlu0 %v4930_v33, %s4769_s30  ;;  %981 = vrot.lane.b32.xlu1 %v4932_v34, %s4769_s30 }
  0xad   :  { %985 = vrot.lane.b32.xlu1 %v4938_v35, %s4769_s30 }
  0xef   :  { %v92_v36 = vpop.permute.xlu0 %91 }
  0xf0   :  { %3588 = vmatprep.mubr.msk.f32.mxu0 %vm99_vm4, %v92_v36 }
  0xf3   :  { %v94_v40 = vpop.permute.xlu1 %93  ;;  %v96_v43 = vpop.permute.xlu0 %95 }
  0xf4   :  { %3589 = vmatmul.mubr.msk.f32.vlgmr.msra.gmra.mrb[0].mxu0 %vm99_vm4, %v94_v40 }
  0xf5   :  { %4131 = vmatpush3.bf16.msra.mxu0 %v4128_v19  ;;  %3591 = vmatprep.mubr.msk.f32.mxu0 %vm99_vm4, %v96_v43  ;;  %v3100_v19 = vld [vmem:[%s6127_s1 + $0x120] sm:$0xff]  ;;  %v3115_v43 = vld [vmem:[%s6127_s1 + $0x178] sm:$0xff] }
  0xf6   :  { %4133 = vmatprep.subr.bf16.mxu0 %v4132_v39  ;;  %v4184_v21 = vpack.c.bf16 %v3101_v20, %v3100_v19  ;;  %v3151_v19 = vld [vmem:[%s6127_s1 + $0x238] sm:$0xff] }
  0xf7   :  { %v98_v45 = vpop.permute.xlu1 %97  ;;  %v296_v60 = vpop.permute.xlu0 %295 }
  0xf8   :  { %3592 = vmatmul.mubr.msk.f32.gmra.mrb[2].mxu0 %vm99_vm4, %v98_v45  ;;  %v4204_v45 = vpack.c.bf16 %v3115_v43, %v3114_v42 }
  0xf9   :  { %4135 = vmatpush3.bf16.msra.mxu0 %v4132_v39  ;;  %3610 = vmatprep.mubr.msk.f32.mxu0 %vm99_vm4, %v66_v24  ;;  %v3113_v39 = vld [vmem:[%s6127_s1 + $0x168] sm:$0xff] }
  0xfa   :  { %4137 = vmatprep.subr.bf16.mxu0 %v4136_v44  ;;  %v4200_v40 = vpack.c.bf16 %v3113_v39, %v3112_v38 }
  0xfb   :  { %v298_v3 = vpop.permute.xlu1 %297  ;;  %v300_v7 = vpop.permute.xlu0 %299 }
  0xfd   :  { %4139 = vmatpush3.bf16.msra.mxu0 %v4136_v44 }
  0xfe   :  { %4141 = vmatprep.subr.bf16.mxu0 %v4140_v48 }
  0xff   :  { %v302_v9 = vpop.permute.xlu1 %301  ;;  %v524_v24 = vpop.permute.xlu0 %523 }
 0x101   :  { %4143 = vmatpush3.bf16.msra.mxu0 %v4140_v48  ;;  %v4208_v48 = vpack.c.bf16 %v3121_v47, %v3120_v46 }
 0x102   :  { %4145 = vmatprep.subr.bf16.mxu0 %v4144_v51 }
 0x103   :  { %v528_v36 = vpop.permute.xlu0 %527 }
 0x104   :  { %3611 = vmatmul.mubr.msk.f32.vlgmr.msra.gmra.mrb[0].mxu0 %vm99_vm4, %v4885_v26  ;;  %v3108_v26 = vld [vmem:[%s6127_s1 + $0x140] sm:$0xff] }
 0x105   :  { %3613 = vmatprep.mubr.msk.f32.mxu0 %vm99_vm4, %v4883_v25  ;;  %4147 = vmatpush3.bf16.msra.mxu0 %v4144_v51  ;;  %v4188_v25 = vpack.c.bf16 %v3103_v23, %v3102_v22 }
 0x106   :  { %4149 = vmatprep.subr.bf16.mxu0 %v4148_v54 }
 0x107   :  { %v638_v44 = vpop.permute.xlu0 %637 }
 0x108   :  { %3614 = vmatmul.mubr.msk.f32.gmra.mrb[2].mxu0 %vm99_vm4, %v4891_v27  ;;  %v3109_v27 = vld [vmem:[%s6127_s1 + $0x148] sm:$0xff] }
 0x109   :  { %4151 = vmatpush3.bf16.msra.mxu0 %v4148_v54  ;;  %3632 = vmatprep.mubr.msk.f32.mxu0 %vm99_vm4, %v296_v60  ;;  %v3125_v54 = vld [vmem:[%s6127_s1 + $0x1a8] sm:$0xff]  ;;  %v4220_v60 = vpack.c.bf16 %v3127_v59, %v3126_v58 }
 0x10a   :  { %4153 = vmatprep.subr.bf16.mxu0 %v4152_v57  ;;  %v4216_v56 = vpack.c.bf16 %v3125_v54, %v3124_v53 }
 0x10b   :  { %v642_v55 = vpop.permute.xlu0 %641 }
 0x10d   :  { %4155 = vmatpush3.bf16.msra.mxu0 %v4152_v57 }
 0x10e   :  { %4157 = vmatprep.subr.bf16.mxu0 %v4156_v61 }
 0x111   :  { %4159 = vmatpush3.bf16.msra.mxu0 %v4156_v61  ;;  %v3132_v61 = vld [vmem:[%s6127_s1 + $0x1c0] sm:$0xff] }
 0x112   :  { %4161 = vmatprep.subr.bf16.mxu0 %v4160_v0  ;;  %v4224_v63 = vpack.c.bf16 %v3133_v62, %v3132_v61 }
 0x114   :  { %3633 = vmatmul.mubr.msk.f32.vlgmr.msra.gmra.mrb[0].mxu0 %vm99_vm4, %v298_v3  ;;  %v3137_v3 = vld [vmem:[%s6127_s1 + $0x1e8] sm:$0xff] }
 0x115   :  { %3635 = vmatprep.mubr.msk.f32.mxu0 %vm99_vm4, %v300_v7  ;;  %4163 = vmatpush3.bf16.msra.mxu0 %v4160_v0  ;;  %v3134_v0 = vld [vmem:[%s6127_s1 + $0x1d0] sm:$0xff]  ;;  %v866_v7 = vpop.permute.xlu0 %865 }
 0x116   :  { %4165 = vmatprep.subr.bf16.mxu0 %v4164_v4 }
 0x118   :  { %3636 = vmatmul.mubr.msk.f32.gmra.mrb[2].mxu0 %vm99_vm4, %v302_v9 }
 0x119   :  { %4167 = vmatpush3.bf16.msra.mxu0 %v4164_v4  ;;  %3654 = vmatprep.mubr.msk.f32.mxu0 %vm99_vm4, %v4900_v28  ;;  %v4192_v28 = vpack.c.bf16 %v3109_v27, %v3108_v26  ;;  %v4232_v4 = vpack.c.bf16 %v3137_v3, %v3136_v2 }
 0x11a   :  { %4169 = vmatprep.subr.bf16.mxu0 %v4168_v8 }
 0x11d   :  { %4171 = vmatpush3.bf16.msra.mxu0 %v4168_v8  ;;  %v3145_v8 = vld [vmem:[%s6127_s1 + $0x208] sm:$0xff] }
 0x11e   :  { %4173 = vmatprep.subr.bf16.mxu0 %v4172_v12 }
 0x121   :  { %4175 = vmatpush3.bf16.msra.mxu0 %v4172_v12  ;;  %v870_v12 = vpop.permute.xlu0 %869 }
 0x122   :  { %4177 = vmatprep.subr.bf16.mxu0 %v4176_v15 }
 0x124   :  { %3655 = vmatmul.mubr.msk.f32.vlgmr.msra.gmra.mrb[0].mxu0 %vm99_vm4, %v4908_v30  ;;  %v3111_v30 = vld [vmem:[%s6127_s1 + $0x158] sm:$0xff] }
 0x125   :  { %3657 = vmatprep.mubr.msk.f32.mxu0 %vm99_vm4, %v4906_v29  ;;  %4179 = vmatpush3.bf16.msra.mxu0 %v4176_v15  ;;  %v3110_v29 = vld [vmem:[%s6127_s1 + $0x150] sm:$0xff]  ;;  %v3149_v15 = vld [vmem:[%s6127_s1 + $0x228] sm:$0xff]  ;;  %v980_v20 = vpop.permute.xlu0 %979 }
 0x126   :  { %4181 = vmatprep.subr.bf16.mxu0 %v4180_v18  ;;  %v4196_v37 = vpack.c.bf16 %v3111_v30, %v3110_v29  ;;  %v4248_v16 = vpack.c.bf16 %v3149_v15, %v3148_v14 }
 0x128   :  { %3658 = vmatmul.mubr.msk.f32.gmra.mrb[2].mxu0 %vm99_vm4, %v4914_v31  ;;  %v526_v31 = vpop.permute.xlu1 %525 }
 0x129   :  { %4183 = vmatpush3.bf16.msra.mxu0 %v4180_v18  ;;  %3676 = vmatprep.mubr.msk.f32.mxu0 %vm99_vm4, %v524_v24  ;;  %v3150_v18 = vld [vmem:[%s6127_s1 + $0x230] sm:$0xff]  ;;  %v984_v23 = vpop.permute.xlu0 %983 }
 0x12a   :  { %4185 = vmatprep.subr.bf16.mxu0 %v4184_v21 }
 0x12c   :  { %v530_v41 = vpop.permute.xlu1 %529 }
 0x12d   :  { %4187 = vmatpush3.bf16.msra.mxu0 %v4184_v21  ;;  %v4252_v21 = vpack.c.bf16 %v3151_v19, %v3150_v18 }
 0x12e   :  { %4189 = vmatprep.subr.bf16.mxu0 %v4188_v25 }
 0x130   :  { %v640_v51 = vpop.permute.xlu1 %639 }
 0x131   :  { %4191 = vmatpush3.bf16.msra.mxu0 %v4188_v25 }
 0x132   :  { %4193 = vmatprep.subr.bf16.mxu0 %v4192_v28 }
 0x134   :  { %3677 = vmatmul.mubr.msk.f32.vlgmr.msra.gmra.mrb[0].mxu0 %vm99_vm4, %v526_v31  ;;  %v644_v57 = vpop.permute.xlu1 %643 }
 0x135   :  { %3679 = vmatprep.mubr.msk.f32.mxu0 %vm99_vm4, %v528_v36  ;;  %4195 = vmatpush3.bf16.msra.mxu0 %v4192_v28 }
 0x136   :  { %4197 = vmatprep.subr.bf16.mxu0 %v4196_v37 }
 0x138   :  { %3680 = vmatmul.mubr.msk.f32.gmra.mrb[2].mxu0 %vm99_vm4, %v530_v41  ;;  %v868_v11 = vpop.permute.xlu1 %867 }
 0x139   :  { %4199 = vmatpush3.bf16.msra.mxu0 %v4196_v37  ;;  %3698 = vmatprep.mubr.msk.f32.mxu0 %vm99_vm4, %v638_v44 }
 0x13a   :  { %4201 = vmatprep.subr.bf16.mxu0 %v4200_v40 }
 0x13c   :  { %v872_v17 = vpop.permute.xlu1 %871 }
 0x13d   :  { %4203 = vmatpush3.bf16.msra.mxu0 %v4200_v40 }
 0x13e   :  { %4205 = vmatprep.subr.bf16.mxu0 %v4204_v45 }
 0x140   :  { %v982_v22 = vpop.permute.xlu1 %981 }
 0x141   :  { %4207 = vmatpush3.bf16.msra.mxu0 %v4204_v45 }
 0x142   :  { %4209 = vmatprep.subr.bf16.mxu0 %v4208_v48 }
 0x144   :  { %3699 = vmatmul.mubr.msk.f32.vlgmr.msra.gmra.mrb[0].mxu0 %vm99_vm4, %v640_v51  ;;  %v986_v24 = vpop.permute.xlu1 %985 }
 0x145   :  { %3701 = vmatprep.mubr.msk.f32.mxu0 %vm99_vm4, %v642_v55  ;;  %4211 = vmatpush3.bf16.msra.mxu0 %v4208_v48 }
 0x146   :  { %4213 = vmatprep.subr.bf16.mxu0 %v4212_v52 }
 0x148   :  { %3702 = vmatmul.mubr.msk.f32.gmra.mrb[2].mxu0 %vm99_vm4, %v644_v57 }
 0x149   :  { %4215 = vmatpush3.bf16.msra.mxu0 %v4212_v52  ;;  %3720 = vmatprep.mubr.msk.f32.mxu0 %vm99_vm4, %v4924_v32  ;;  %v3135_v32 = vld [vmem:[%s6127_s1 + $0x1d8] sm:$0xff] }
 0x14a   :  { %4217 = vmatprep.subr.bf16.mxu0 %v4216_v56  ;;  %v4228_v1 = vpack.c.bf16 %v3135_v32, %v3134_v0 }
 0x14d   :  { %4219 = vmatpush3.bf16.msra.mxu0 %v4216_v56 }
 0x14e   :  { %4221 = vmatprep.subr.bf16.mxu0 %v4220_v60 }
 0x151   :  { %4223 = vmatpush3.bf16.msra.mxu0 %v4220_v60 }
 0x152   :  { %4225 = vmatprep.subr.bf16.mxu0 %v4224_v63 }
 0x154   :  { %3721 = vmatmul.mubr.msk.f32.vlgmr.msra.gmra.mrb[0].mxu0 %vm99_vm4, %v4932_v34  ;;  %v3144_v34 = vld [vmem:[%s6127_s1 + $0x200] sm:$0xff] }
 0x155   :  { %3723 = vmatprep.mubr.msk.f32.mxu0 %vm99_vm4, %v4930_v33  ;;  %4227 = vmatpush3.bf16.msra.mxu0 %v4224_v63  ;;  %v4236_v33 = vpack.c.bf16 %v3139_v6, %v3138_v5  ;;  %v4240_v9 = vpack.c.bf16 %v3145_v8, %v3144_v34 }
 0x156   :  { %4229 = vmatprep.subr.bf16.mxu0 %v4228_v1 }
 0x158   :  { %3724 = vmatmul.mubr.msk.f32.gmra.mrb[2].mxu0 %vm99_vm4, %v4938_v35  ;;  %v3146_v35 = vld [vmem:[%s6127_s1 + $0x210] sm:$0xff]  ;;  %s4770_s1 = smov 112  }
 0x159   :  { %4231 = vmatpush3.bf16.msra.mxu0 %v4228_v1  ;;  %3742 = vmatprep.mubr.msk.f32.mxu0 %vm99_vm4, %v866_v7  ;;  %v4244_v13 = vpack.c.bf16 %v3147_v10, %v3146_v35 }
 0x15a   :  { %4233 = vmatprep.subr.bf16.mxu0 %v4232_v4 }
 0x15d   :  { %4235 = vmatpush3.bf16.msra.mxu0 %v4232_v4 }
 0x15e   :  { %4237 = vmatprep.subr.bf16.mxu0 %v4236_v33 }
 0x161   :  { %4239 = vmatpush3.bf16.msra.mxu0 %v4236_v33 }
 0x162   :  { %4241 = vmatprep.subr.bf16.mxu0 %v4240_v9 }
 0x164   :  { %3743 = vmatmul.mubr.msk.f32.vlgmr.msra.gmra.mrb[0].mxu0 %vm99_vm4, %v868_v11 }
 0x165   :  { %3745 = vmatprep.mubr.msk.f32.mxu0 %vm99_vm4, %v870_v12  ;;  %4243 = vmatpush3.bf16.msra.mxu0 %v4240_v9 }
 0x166   :  { %4245 = vmatprep.subr.bf16.mxu0 %v4244_v13 }
 0x168   :  { %3746 = vmatmul.mubr.msk.f32.gmra.mrb[2].mxu0 %vm99_vm4, %v872_v17 }
 0x169   :  { %4247 = vmatpush3.bf16.msra.mxu0 %v4244_v13  ;;  %3764 = vmatprep.mubr.msk.f32.mxu0 %vm99_vm4, %v980_v20 }
 0x16a   :  { %4249 = vmatprep.subr.bf16.mxu0 %v4248_v16 }
 0x16d   :  { %4251 = vmatpush3.bf16.msra.mxu0 %v4248_v16 }
 0x16e   :  { %4253 = vmatprep.subr.bf16.mxu0 %v4252_v21 }
 0x171   :  { %4255 = vmatpush3.bf16.msra.mxu0 %v4252_v21 }
 0x174   :  { %3765 = vmatmul.mubr.msk.f32.vlgmr.msra.gmra.mrb[0].mxu0 %vm99_vm4, %v982_v22 }
 0x175   :  { %3767 = vmatprep.mubr.msk.f32.mxu0 %vm99_vm4, %v984_v23 }
 0x178   :  { %3768 = vmatmul.mubr.msk.f32.gmra.mrb[2].mxu0 %vm99_vm4, %v986_v24 }
 0x247   :  { %v5183_v25 = vpop.f32.mrb[0].mxu0 }
 0x248   :  { %v1096_v26 = vmul.f32 %v5183_v25, %v5183_v25  ;;  %v5187_v27 = vpop.f32.mrb[1].mxu0 }
 0x249   :  { %v1086_v28 = vadd.f32 %v5183_v25, %v5187_v27  ;;  %v1095_v29 = vmul.f32 %v5187_v27, %v5187_v27 }
 0x24b   :  { %v1099_v30 = vadd.f32 %v1096_v26, %v1095_v29  ;;  %v5193_v31 = vpop.f32.mrb[2].mxu0 }
 0x24c   :  { %v5195_v36 = vpop.f32.mrb[3].mxu0  ;;  %v1098_v39 = vmul.f32 %v5193_v31, %v5193_v31 }
 0x24d   :  { %v1087_v37 = vadd.f32 %v1086_v28, %v5195_v36  ;;  %v1097_v38 = vmul.f32 %v5195_v36, %v5195_v36 }
 0x24f   :  { %v1088_v40 = vadd.f32 %v5193_v31, %v1087_v37  ;;  %v1100_v41 = vadd.f32 %v1099_v30, %v1097_v38 }
 0x251   :  { %v1089_v42 = vrot.slane %v1088_v40, 4  ;;  %v1101_v43 = vadd.f32 %v1100_v41, %v1098_v39 }
 0x253   :  { %v1090_v44 = vadd.f32 %v1089_v42, %v1088_v40  ;;  %v1102_v45 = vrot.slane %v1101_v43, 4 }
 0x255   :  { %v1091_v46 = vrot.slane %v1090_v44, 2  ;;  %v1103_v47 = vadd.f32 %v1102_v45, %v1101_v43 }
 0x257   :  { %v1092_v48 = vadd.f32 %v1091_v46, %v1090_v44  ;;  %v1104_v49 = vrot.slane %v1103_v47, 2 }
 0x259   :  { %v1093_v50 = vrot.slane %v1092_v48, 1  ;;  %v1105_v51 = vadd.f32 %v1104_v49, %v1103_v47 }
 0x25b   :  { %v1094_v52 = vadd.f32 %v1093_v50, %v1092_v48  ;;  %v1106_v53 = vrot.slane %v1105_v51, 1 }
 0x25d   :  { %v1107_v54 = vadd.f32 %v1106_v53, %v1105_v51  ;;  %1111 = vrot.lane.b32.xlu0 %v1094_v52, %s4769_s30 }
 0x25f   :  { %1116 = vrot.lane.b32.xlu1 %v1107_v54, %s4769_s30 }
 0x261   :  { %1120 = vrot.lane.b32.xlu0 %v1094_v52, %s4770_s1 }
 0x263   :  { %1124 = vrot.lane.b32.xlu1 %v1107_v54, %s4770_s1 }
 0x265   :  { %1128 = vrot.lane.b32.xlu0 %v1094_v52, %s4771_s16 }
 0x267   :  { %1132 = vrot.lane.b32.xlu1 %v1107_v54, %s4771_s16 }
 0x269   :  { %1136 = vrot.lane.b32.xlu0 %v1094_v52, %s4772_s17 }
 0x26b   :  { %1140 = vrot.lane.b32.xlu1 %v1107_v54, %s4772_s17 }
 0x26d   :  { %1144 = vrot.lane.b32.xlu0 %v1094_v52, %s4773_s18 }
 0x26f   :  { %1148 = vrot.lane.b32.xlu1 %v1107_v54, %s4773_s18 }
 0x271   :  { %1152 = vrot.lane.b32.xlu0 %v1094_v52, %s4774_s19 }
 0x273   :  { %1156 = vrot.lane.b32.xlu1 %v1107_v54, %s4774_s19 }
 0x275   :  { %1160 = vrot.lane.b32.xlu0 %v1094_v52, %s4775_s20 }
 0x277   :  { %1164 = vrot.lane.b32.xlu1 %v1107_v54, %s4775_s20 }
 0x279   :  { %1168 = vrot.lane.b32.xlu0 %v1094_v52, %s4776_s21 }
 0x27b   :  { %1172 = vrot.lane.b32.xlu1 %v1107_v54, %s4776_s21 }
 0x27d   :  { %1176 = vrot.lane.b32.xlu0 %v1094_v52, %s4777_s22 }
 0x27f   :  { %1180 = vrot.lane.b32.xlu1 %v1107_v54, %s4777_s22 }
 0x281   :  { %1184 = vrot.lane.b32.xlu0 %v1094_v52, %s4778_s23 }
 0x283   :  { %1188 = vrot.lane.b32.xlu1 %v1107_v54, %s4778_s23 }
 0x285   :  { %1192 = vrot.lane.b32.xlu0 %v1094_v52, %s4779_s24 }
 0x287   :  { %1196 = vrot.lane.b32.xlu1 %v1107_v54, %s4779_s24 }
 0x289   :  { %1200 = vrot.lane.b32.xlu0 %v1094_v52, %s4780_s25 }
 0x28b   :  { %1204 = vrot.lane.b32.xlu1 %v1107_v54, %s4780_s25 }
 0x28d   :  { %1208 = vrot.lane.b32.xlu0 %v1094_v52, %s4781_s26 }
 0x28f   :  { %1212 = vrot.lane.b32.xlu1 %v1107_v54, %s4781_s26 }
 0x291   :  { %1216 = vrot.lane.b32.xlu0 %v1094_v52, %s4782_s27 }
 0x293   :  { %1220 = vrot.lane.b32.xlu1 %v1107_v54, %s4782_s27 }
 0x295   :  { %1224 = vrot.lane.b32.xlu0 %v1094_v52, %s4783_s28 }
 0x297   :  { %1228 = vrot.lane.b32.xlu1 %v1107_v54, %s4783_s28 }
 0x2cf   :  { %v1112_v55 = vpop.permute.xlu0 %1111 }
 0x2d0   :  { %v1114_v5 = vadd.f32 %v1112_v55, %v1094_v52 }
 0x2d1   :  { %v1117_v56 = vpop.permute.xlu1 %1116 }
 0x2d2   :  { %v1119_v7 = vadd.f32 %v1117_v56, %v1107_v54 }
 0x2d3   :  { %v1121_v57 = vpop.permute.xlu0 %1120 }
 0x2d4   :  { %v1123_v33 = vadd.f32 %v1121_v57, %v1114_v5 }
 0x2d5   :  { %v1125_v58 = vpop.permute.xlu1 %1124 }
 0x2d6   :  { %v1127_v8 = vadd.f32 %v1125_v58, %v1119_v7 }
 0x2d7   :  { %v1129_v59 = vpop.permute.xlu0 %1128 }
 0x2d8   :  { %v1131_v9 = vadd.f32 %v1129_v59, %v1123_v33 }
 0x2d9   :  { %v1133_v60 = vpop.permute.xlu1 %1132 }
 0x2da   :  { %v1135_v10 = vadd.f32 %v1133_v60, %v1127_v8 }
 0x2db   :  { %v1137_v61 = vpop.permute.xlu0 %1136 }
 0x2dc   :  { %v1139_v11 = vadd.f32 %v1137_v61, %v1131_v9  ;;  %v1243_v61 = vlaneseq }
 0x2dd   :  { %v1141_v62 = vpop.permute.xlu1 %1140 }
 0x2de   :  { %v1143_v13 = vadd.f32 %v1141_v62, %v1135_v10  ;;  %v1244_v62 = vshrl.u32 %v1243_v61, 7 }
 0x2df   :  { %v1145_v63 = vpop.permute.xlu0 %1144 }
 0x2e0   :  { %v1147_v14 = vadd.f32 %v1145_v63, %v1139_v11  ;;  %v1084_v63 = vld [vmem:[%s6129_s3] sm:$0x1] }
 0x2e1   :  { %v1149_v0 = vpop.permute.xlu1 %1148 }
 0x2e2   :  { %v1151_v16 = vadd.f32 %v1149_v0, %v1143_v13  ;;  %v5237_v0 = vsub.s32 0, %v1244_v62 }
 0x2e3   :  { %v1153_v32 = vpop.permute.xlu0 %1152 }
 0x2e4   :  { %v1155_v17 = vadd.f32 %v1153_v32, %v1147_v14 }
 0x2e5   :  { %v1157_v1 = vpop.permute.xlu1 %1156 }
 0x2e6   :  { %v1159_v19 = vadd.f32 %v1157_v1, %v1151_v16 }
 0x2e7   :  { %v1161_v2 = vpop.permute.xlu0 %1160 }
 0x2e8   :  { %v1163_v20 = vadd.f32 %v1161_v2, %v1155_v17  ;;  %v1085_v2 = vld [vmem:[%s6130_s4] sm:$0x1] }
 0x2e9   :  { %v1165_v3 = vpop.permute.xlu1 %1164 }
 0x2ea   :  { %v1167_v22 = vadd.f32 %v1165_v3, %v1159_v19 }
 0x2eb   :  { %v1169_v4 = vpop.permute.xlu0 %1168 }
 0x2ec   :  { %v1171_v23 = vadd.f32 %v1169_v4, %v1163_v20 }
 0x2ed   :  { %v1173_v6 = vpop.permute.xlu1 %1172 }
 0x2ee   :  { %v1175_v26 = vadd.f32 %v1173_v6, %v1167_v22 }
 0x2ef   :  { %v1177_v34 = vpop.permute.xlu0 %1176 }
 0x2f0   :  { %v1179_v28 = vadd.f32 %v1177_v34, %v1171_v23 }
 0x2f1   :  { %v1181_v35 = vpop.permute.xlu1 %1180 }
 0x2f2   :  { %v1183_v30 = vadd.f32 %v1181_v35, %v1175_v26 }
 0x2f3   :  { %v1185_v12 = vpop.permute.xlu0 %1184 }
 0x2f4   :  { %v1187_v37 = vadd.f32 %v1185_v12, %v1179_v28 }
 0x2f5   :  { %v1189_v15 = vpop.permute.xlu1 %1188 }
 0x2f6   :  { %v1191_v39 = vadd.f32 %v1189_v15, %v1183_v30 }
 0x2f7   :  { %v1193_v18 = vpop.permute.xlu0 %1192 }
 0x2f8   :  { %v1195_v40 = vadd.f32 %v1193_v18, %v1187_v37 }
 0x2f9   :  { %v1197_v21 = vpop.permute.xlu1 %1196 }
 0x2fa   :  { %v1199_v42 = vadd.f32 %v1197_v21, %v1191_v39 }
 0x2fb   :  { %v1201_v24 = vpop.permute.xlu0 %1200 }
 0x2fc   :  { %v1203_v43 = vadd.f32 %v1201_v24, %v1195_v40 }
 0x2fd   :  { %v1205_v29 = vpop.permute.xlu1 %1204 }
 0x2fe   :  { %v1207_v45 = vadd.f32 %v1205_v29, %v1199_v42 }
 0x2ff   :  { %v1209_v38 = vpop.permute.xlu0 %1208 }
 0x300   :  { %v1211_v46 = vadd.f32 %v1209_v38, %v1203_v43 }
 0x301   :  { %v1213_v41 = vpop.permute.xlu1 %1212 }
 0x302   :  { %v1215_v48 = vadd.f32 %v1213_v41, %v1207_v45 }
 0x303   :  { %v1217_v44 = vpop.permute.xlu0 %1216 }
 0x304   :  { %v1219_v49 = vadd.f32 %v1217_v44, %v1211_v46 }
 0x305   :  { %v1221_v47 = vpop.permute.xlu1 %1220 }
 0x306   :  { %v1223_v51 = vadd.f32 %v1221_v47, %v1215_v48 }
 0x307   :  { %v1225_v50 = vpop.permute.xlu0 %1224 }
 0x308   :  { %v1227_v52 = vadd.f32 %v1225_v50, %v1219_v49 }
 0x309   :  { %v1229_v53 = vpop.permute.xlu1 %1228 }
 0x30a   :  { %v1232_v54 = vmul.f32 0.001953125, %v1227_v52  ;;  %v1231_v55 = vadd.f32 %v1229_v53, %v1223_v51 }
 0x30c   :  { %v1234_v56 = vmul.f32 %v1232_v54, %v1232_v54  ;;  %v1233_v57 = vmul.f32 0.001953125, %v1231_v55 }
 0x30e   :  { %v1235_v58 = vsub.f32 %v1233_v57, %v1234_v56 }
 0x310   :  { %v1236_v59 = vmax.f32 %v1235_v58, 0.0 }
 0x312   :  { %v1237_v60 = vadd.f32 1e-05, %v1236_v59 }
 0x314   :  { %4642 = vrsqrt.f32 %v1237_v60 }
 0x31e   :  { %v4643_v32 = vpop.eup %4642 }
 0x31f   :  { %v1239_v1 = vmul.f32 %v4643_v32, %v1084_v63 }
 0x321   :  { %v1240_v3 = vmul.f32 %v1239_v1, %v1232_v54  ;;  %v1246_v4 = vrot.slane %v1239_v1, %v5237_v0 }
 0x323   :  { %v5243_v5 = vsub.f32 %v1085_v2, %v1240_v3  ;;  %1250 = vrot.lane.b32.xlu1 %v1246_v4, %s4782_s27  ;;  %1247 = vrot.lane.b32.xlu0 %v1246_v4, %s4783_s28 }
 0x325   :  { %v1325_v6 = vrot.slane %v5243_v5, %v5237_v0 }
 0x327   :  { %1253 = vrot.lane.b32.xlu0 %v1246_v4, %s4781_s26  ;;  %1326 = vrot.lane.b32.xlu1 %v1325_v6, %s4783_s28 }
 0x32b   :  { %1256 = vrot.lane.b32.xlu0 %v1246_v4, %s4780_s25  ;;  %1329 = vrot.lane.b32.xlu1 %v1325_v6, %s4782_s27 }
 0x32f   :  { %1259 = vrot.lane.b32.xlu0 %v1246_v4, %s4779_s24  ;;  %1332 = vrot.lane.b32.xlu1 %v1325_v6, %s4781_s26 }
 0x333   :  { %1262 = vrot.lane.b32.xlu0 %v1246_v4, %s4778_s23  ;;  %1335 = vrot.lane.b32.xlu1 %v1325_v6, %s4780_s25 }
 0x337   :  { %1265 = vrot.lane.b32.xlu0 %v1246_v4, %s4777_s22  ;;  %1338 = vrot.lane.b32.xlu1 %v1325_v6, %s4779_s24 }
 0x33b   :  { %1268 = vrot.lane.b32.xlu0 %v1246_v4, %s4776_s21  ;;  %1341 = vrot.lane.b32.xlu1 %v1325_v6, %s4778_s23 }
 0x33f   :  { %1271 = vrot.lane.b32.xlu0 %v1246_v4, %s4775_s20  ;;  %1344 = vrot.lane.b32.xlu1 %v1325_v6, %s4777_s22 }
 0x343   :  { %1274 = vrot.lane.b32.xlu0 %v1246_v4, %s4774_s19  ;;  %1347 = vrot.lane.b32.xlu1 %v1325_v6, %s4776_s21 }
 0x347   :  { %1277 = vrot.lane.b32.xlu0 %v1246_v4, %s4773_s18  ;;  %1350 = vrot.lane.b32.xlu1 %v1325_v6, %s4775_s20 }
 0x34b   :  { %1280 = vrot.lane.b32.xlu0 %v1246_v4, %s4772_s17  ;;  %1353 = vrot.lane.b32.xlu1 %v1325_v6, %s4774_s19 }
 0x34f   :  { %1283 = vrot.lane.b32.xlu0 %v1246_v4, %s4771_s16  ;;  %1356 = vrot.lane.b32.xlu1 %v1325_v6, %s4773_s18 }
 0x353   :  { %1286 = vrot.lane.b32.xlu0 %v1246_v4, %s4770_s1  ;;  %1359 = vrot.lane.b32.xlu1 %v1325_v6, %s4772_s17 }
 0x357   :  { %1289 = vrot.lane.b32.xlu0 %v1246_v4, %s4769_s30  ;;  %1362 = vrot.lane.b32.xlu1 %v1325_v6, %s4771_s16 }
 0x35b   :  { %1365 = vrot.lane.b32.xlu0 %v1325_v6, %s4770_s1  ;;  %1368 = vrot.lane.b32.xlu1 %v1325_v6, %s4769_s30 }
 0x395   :  { %v1251_v7 = vpop.permute.xlu1 %1250  ;;  %v1248_v33 = vpop.permute.xlu0 %1247 }
 0x396   :  { %v1293_v24 = vsel %vm1292_vm5, %v1239_v1, %v1248_v33 }
 0x397   :  { %v1295_v26 = vsel %vm1294_vm6, %v1293_v24, %v1251_v7 }
 0x399   :  { %v1254_v34 = vpop.permute.xlu0 %1253  ;;  %v1327_v8 = vpop.permute.xlu1 %1326 }
 0x39a   :  { %v1297_v30 = vsel %vm1296_vm7, %v1295_v26, %v1254_v34  ;;  %v1371_v39 = vsel %vm1292_vm5, %v5243_v5, %v1327_v8 }
 0x39d   :  { %v1257_v9 = vpop.permute.xlu0 %1256  ;;  %v1330_v35 = vpop.permute.xlu1 %1329 }
 0x39e   :  { %v1299_v37 = vsel %vm1298_vm8, %v1297_v30, %v1257_v9  ;;  %v1372_v43 = vsel %vm1294_vm6, %v1371_v39, %v1330_v35 }
 0x3a1   :  { %v1260_v10 = vpop.permute.xlu0 %1259  ;;  %v1333_v11 = vpop.permute.xlu1 %1332 }
 0x3a2   :  { %v1301_v38 = vsel %vm1300_vm9, %v1299_v37, %v1260_v10  ;;  %v1373_v45 = vsel %vm1296_vm7, %v1372_v43, %v1333_v11 }
 0x3a5   :  { %v1263_v12 = vpop.permute.xlu0 %1262  ;;  %v1336_v13 = vpop.permute.xlu1 %1335 }
 0x3a6   :  { %v1303_v40 = vsel %vm1302_vm10, %v1301_v38, %v1263_v12  ;;  %v1374_v47 = vsel %vm1298_vm8, %v1373_v45, %v1336_v13 }
 0x3a9   :  { %v1266_v14 = vpop.permute.xlu0 %1265  ;;  %v1339_v15 = vpop.permute.xlu1 %1338 }
 0x3aa   :  { %v1305_v44 = vsel %vm1304_vm11, %v1303_v40, %v1266_v14  ;;  %v1375_v49 = vsel %vm1300_vm9, %v1374_v47, %v1339_v15 }
 0x3ad   :  { %v1269_v16 = vpop.permute.xlu0 %1268  ;;  %v1342_v17 = vpop.permute.xlu1 %1341 }
 0x3ae   :  { %v1306_v46 = vsel %vm99_vm4, %v1305_v44, %v1269_v16  ;;  %v1376_v53 = vsel %vm1302_vm10, %v1375_v49, %v1342_v17 }
 0x3b1   :  { %v1272_v18 = vpop.permute.xlu0 %1271  ;;  %v1345_v19 = vpop.permute.xlu1 %1344 }
 0x3b2   :  { %v1308_v48 = vsel %vm1307_vm12, %v1306_v46, %v1272_v18  ;;  %v1377_v55 = vsel %vm1304_vm11, %v1376_v53, %v1345_v19 }
 0x3b5   :  { %v1275_v20 = vpop.permute.xlu0 %1274  ;;  %v1348_v21 = vpop.permute.xlu1 %1347 }
 0x3b6   :  { %v1310_v50 = vsel %vm6137_vm13, %v1308_v48, %v1275_v20  ;;  %v1378_v57 = vsel %vm99_vm4, %v1377_v55, %v1348_v21 }
 0x3b9   :  { %v1278_v22 = vpop.permute.xlu0 %1277  ;;  %v1351_v23 = vpop.permute.xlu1 %1350 }
 0x3ba   :  { %v1312_v54 = vsel %vm6136_vm14, %v1310_v50, %v1278_v22  ;;  %v1379_v59 = vsel %vm1307_vm12, %v1378_v57, %v1351_v23 }
 0x3bd   :  { %v1281_v28 = vpop.permute.xlu0 %1280  ;;  %v1354_v29 = vpop.permute.xlu1 %1353 }
 0x3be   :  { %v1314_v56 = vsel %vm6135_vm15, %v1312_v54, %v1281_v28  ;;  %v1380_v32 = vsel %vm6137_vm13, %v1379_v59, %v1354_v29 }
 0x3c1   :  { %v1284_v41 = vpop.permute.xlu0 %1283  ;;  %v1357_v42 = vpop.permute.xlu1 %1356 }
 0x3c2   :  { %v1316_v58 = vsel %vm6134_vm0, %v1314_v56, %v1284_v41  ;;  %v1381_v2 = vsel %vm6136_vm14, %v1380_v32, %v1357_v42 }
 0x3c5   :  { %v1287_v51 = vpop.permute.xlu0 %1286  ;;  %v1360_v52 = vpop.permute.xlu1 %1359 }
 0x3c6   :  { %v1318_v60 = vsel %vm1317_vm1, %v1316_v58, %v1287_v51  ;;  %v1382_v4 = vsel %vm6135_vm15, %v1381_v2, %v1360_v52 }
 0x3c9   :  { %v1290_v62 = vpop.permute.xlu0 %1289  ;;  %v1363_v63 = vpop.permute.xlu1 %1362 }
 0x3ca   :  { %v1320_v1 = vsel %vm1319_vm2, %v1318_v60, %v1290_v62  ;;  %v1383_v5 = vsel %vm6134_vm0, %v1382_v4, %v1363_v63 }
 0x3cb   :  { %v1389_v3 = vrot.slane %v1320_v1, %v5237_v0 }
 0x3cd   :  { %v1366_v6 = vpop.permute.xlu0 %1365  ;;  %v1369_v7 = vpop.permute.xlu1 %1368  ;;  %v1390_v34 = vmul.f32 %v1389_v3, %v5187_v27  ;;  %v1391_v9 = vmul.f32 %v5183_v25, %v1389_v3  ;;  %v1392_v35 = vmul.f32 %v1389_v3, %v5195_v36  ;;  %v1393_v10 = vmul.f32 %v5193_v31, %v1389_v3 }
 0x3ce   :  { %v1384_v33 = vsel %vm1317_vm1, %v1383_v5, %v1366_v6 }
 0x3cf   :  { %v1385_v8 = vsel %vm1319_vm2, %v1384_v33, %v1369_v7 }
 0x3d0   :  { %v1397_v11 = vrot.slane %v1385_v8, %v5237_v0 }
 0x3d2   :  { %v1398_v12 = vadd.f32 %v1397_v11, %v1390_v34  ;;  %v1399_v13 = vadd.f32 %v1397_v11, %v1391_v9  ;;  %v1400_v14 = vadd.f32 %v1397_v11, %v1392_v35  ;;  %v1401_v15 = vadd.f32 %v1397_v11, %v1393_v10 }
 0x3d4   :  { %v1402_v16 = vmax.f32 %v1398_v12, 0.0  ;;  %v1403_v17 = vmax.f32 %v1399_v13, 0.0  ;;  %v1404_v18 = vmax.f32 %v1400_v14, 0.0  ;;  %v1405_v19 = vmax.f32 %v1401_v15, 0.0 }
 0x3d6   :  { %1406 = vst [vmem:[%s6133_s7] sm:$0xff] %v1402_v16  ;;  %1407 = vst [vmem:[%s6133_s7 + $0x8] sm:$0xff] %v1403_v17 }
 0x3d7   :  { %1408 = vst [vmem:[%s6133_s7 + $0x10] sm:$0xff] %v1404_v18  ;;  %1409 = vst [vmem:[%s6133_s7 + $0x18] sm:$0xff] %v1405_v19 }
 0x3d8   :  { %vm1451_vm3 = vcmask 1040384   ;;  %vm1429_vm0 = vcmask 64513   ;;  %v4784_v23 = vmov 0.0   ;;  %vm1438_vm15 = vcmask 130113   ;;  %s4785_s22 = smov 8   ;;  %v3173_v29 = vld [vmem:[%s6128_s2 + $0x108] sm:$0xff] }
 0x3d9   :  { %1432 = vst.msk [vmem:[#allocation3 + $0x10] sm:$0xff] %vm1292_vm5, %v4784_v23  ;;  %1436 = vst.msk [vmem:[#allocation3 + $0x40] sm:$0xff] %vm1292_vm5, %v4784_v23  ;;  %vm1440_vm14 = vcmask 130112   ;;  %vm1416_vm13 = vcmp.lt.s32.totalorder %v1243_v61, 144  ;;  %v3172_v61 = vld [vmem:[%s6128_s2 + $0x100] sm:$0xff]  ;;  %v3174_v30 = vld [vmem:[%s6128_s2 + $0x110] sm:$0xff] }
 0x3da   :  { %1430 = vst.msk [vmem:[#allocation3] sm:$0xfe] %vm1429_vm0, %v4784_v23  ;;  %1435 = vst.msk [vmem:[#allocation3 + $0x30] sm:$0xfe] %vm1429_vm0, %v4784_v23  ;;  %v4320_v37 = vpack.c.bf16 %v3173_v29, %v3172_v61  ;;  %v3175_v38 = vld [vmem:[%s6128_s2 + $0x118] sm:$0xff]  ;;  %v3176_v40 = vld [vmem:[%s6128_s2 + $0x120] sm:$0xff] }
 0x3db   :  { %1439 = vst.msk [vmem:[#allocation3 + $0x8] sm:$0xfe] %vm1438_vm15, %v4784_v23  ;;  %1444 = vst.msk [vmem:[#allocation3 + $0x38] sm:$0xfe] %vm1438_vm15, %v4784_v23  ;;  %vm1433_vm15 = vcmask 57344   ;;  %v4324_v39 = vpack.c.bf16 %v3175_v38, %v3174_v30  ;;  %v3177_v41 = vld [vmem:[%s6128_s2 + $0x128] sm:$0xff] }
 0x3dc   :  { %1441 = vst.msk [vmem:[#allocation3 + $0x18] sm:$0xff] %vm1440_vm14, %v4784_v23  ;;  %1445 = vst.msk [vmem:[#allocation3 + $0x48] sm:$0xff] %vm1440_vm14, %v4784_v23  ;;  %vm1442_vm14 = vcmask 122944   ;;  %4321 = vmatprep.subr.bf16.mxu1 %v4320_v37  ;;  %v4328_v42 = vpack.c.bf16 %v3177_v41, %v3176_v40  ;;  %v3178_v43 = vld [vmem:[%s6128_s2 + $0x130] sm:$0xff]  ;;  %v3179_v44 = vld [vmem:[%s6128_s2 + $0x138] sm:$0xff]  ;;  %s4786_s18 = smov 112  }
 0x3dd   :  { %v1410_v25 = vld [vmem:[%s6133_s7] sm:$0xff]  ;;  %v1411_v27 = vld [vmem:[%s6133_s7 + $0x8] sm:$0xff]  ;;  %1418 = vst.msk [vmem:[#allocation3] ss:$8 sm:$0x3] %vm1416_vm13, %v4784_v23  ;;  %4323 = vmatpush3.bf16.msra.mxu1 %v4320_v37  ;;  %v4332_v45 = vpack.c.bf16 %v3179_v44, %v3178_v43  ;;  %v3182_v49 = vld [vmem:[%s6128_s2 + $0x150] sm:$0xff] }
 0x3de   :  { %v1412_v31 = vld [vmem:[%s6133_s7 + $0x10] sm:$0xff]  ;;  %v1452_v36 = vrot.slane %v1410_v25, 7  ;;  %v1453_v20 = vrot.slane %v1411_v27, 7  ;;  %v5338_v22 = vld [vmem:[%s6133_s7 + $0x18] sm:$0xff]  ;;  %1434 = vst.msk [vmem:[#allocation3 + $0x20] sm:$0x1] %vm1433_vm15, %v4784_v23  ;;  %4325 = vmatprep.subr.bf16.mxu1 %v4324_v39 }
 0x3df   :  { %v1455_v21 = vrot.slane %v1412_v31, 7  ;;  %v1456_v24 = vrot.slane %v5338_v22, 7  ;;  %1421 = vst.msk [vmem:[#allocation3 + $0x30] ss:$8 sm:$0x3] %vm1416_vm13, %v4784_v23  ;;  %v3180_v46 = vld [vmem:[%s6128_s2 + $0x140] sm:$0xff] }
 0x3e0   :  { %1458 = vrot.lane.b32.xlu0 %v1452_v36, %s4785_s22  ;;  %v1454_v26 = vsel %vm1451_vm3, %v1452_v36, %v1453_v20  ;;  %1424 = vst.msk [vmem:[#allocation3 + $0x21] ss:$8 sm:$0x3] %vm1416_vm13, %v4784_v23  ;;  %1427 = vst.msk [vmem:[#allocation3 + $0x51] ss:$8 sm:$0x3] %vm1416_vm13, %v4784_v23 }
 0x3e1   :  { %1464 = vrot.lane.b32.xlu1 %v1455_v21, %s4785_s22  ;;  %v1457_v28 = vsel %vm1451_vm3, %v1455_v21, %v1456_v24  ;;  %1443 = vst.msk [vmem:[#allocation3 + $0x28] sm:$0x1] %vm1442_vm14, %v4784_v23  ;;  %1446 = vst.msk [vmem:[#allocation3 + $0x58] sm:$0x1] %vm1442_vm14, %v4784_v23  ;;  %4327 = vmatpush3.bf16.msra.mxu1 %v4324_v39  ;;  %v3181_v47 = vld [vmem:[%s6128_s2 + $0x148] sm:$0xff]  ;;  %v3183_v50 = vld [vmem:[%s6128_s2 + $0x158] sm:$0xff] }
 0x3e2   :  { %1437 = vst.msk [vmem:[#allocation3 + $0x50] sm:$0x1] %vm1433_vm15, %v4784_v23  ;;  %4329 = vmatprep.subr.bf16.mxu1 %v4328_v42  ;;  %v4336_v48 = vpack.c.bf16 %v3181_v47, %v3180_v46  ;;  %v4340_v51 = vpack.c.bf16 %v3183_v50, %v3182_v49  ;;  %v3184_v52 = vld [vmem:[%s6128_s2 + $0x160] sm:$0xff]  ;;  %v3185_v53 = vld [vmem:[%s6128_s2 + $0x168] sm:$0xff]  ;;  %v3186_v57 = vld [vmem:[%s6128_s2 + $0x170] sm:$0xff]  ;;  %vm1476_vm13 = vcmask 1047617  }
 0x3e3   :  { %v4344_v54 = vpack.c.bf16 %v3185_v53, %v3184_v52  ;;  %v3156_v55 = vld [vmem:[%s6128_s2 + $0x80] sm:$0xff]  ;;  %v3157_v56 = vld [vmem:[%s6128_s2 + $0x88] sm:$0xff]  ;;  %v3187_v59 = vld [vmem:[%s6128_s2 + $0x178] sm:$0xff]  ;;  %vm1479_vm3 = vcmask 1047616   ;;  %vm1878_vm14 = vcmask 1046528   ;;  %s4787_s10 = smov 120  }
 0x3e4   :  { %1460 = vrot.lane.b32.xlu0 %v1454_v26, %s4785_s22  ;;  %v4256_v58 = vpack.c.bf16 %v3157_v56, %v3156_v55  ;;  %v4348_v60 = vpack.c.bf16 %v3187_v59, %v3186_v57  ;;  %v3158_v32 = vld [vmem:[%s6128_s2 + $0x90] sm:$0xff]  ;;  %v3159_v1 = vld [vmem:[%s6128_s2 + $0x98] sm:$0xff]  ;;  %v3188_v2 = vld [vmem:[%s6128_s2 + $0x180] sm:$0xff]  ;;  %s4789_s19 = smov 96   ;;  %s4790_s20 = smov 88  }
 0x3e5   :  { %1466 = vrot.lane.b32.xlu1 %v1457_v28, %s4785_s22  ;;  %4331 = vmatpush3.bf16.msra.mxu1 %v4328_v42  ;;  %v4260_v3 = vpack.c.bf16 %v3159_v1, %v3158_v32  ;;  %v3189_v4 = vld [vmem:[%s6128_s2 + $0x188] sm:$0xff]  ;;  %v3160_v33 = vld [vmem:[%s6128_s2 + $0xa0] sm:$0xff]  ;;  %v3162_v37 = vld [vmem:[%s6128_s2 + $0xb0] sm:$0xff]  ;;  %s4791_s21 = smov 80   ;;  %s4792_s23 = smov 72  }
 0x3e6   :  { %4333 = vmatprep.subr.bf16.mxu1 %v4332_v45  ;;  %4257 = vmatprep.subr.bf16.mxu0 %v4256_v58  ;;  %v5425_v7 = vpack.c.bf16 %v3189_v4, %v3188_v2  ;;  %v3161_v34 = vld [vmem:[%s6128_s2 + $0xa8] sm:$0xff]  ;;  %v3163_v39 = vld [vmem:[%s6128_s2 + $0xb8] sm:$0xff]  ;;  %v3164_v44 = vld [vmem:[%s6128_s2 + $0xc0] sm:$0xff]  ;;  %s4793_s24 = smov 64   ;;  %s4794_s25 = smov 56  }
 0x3e7   :  { %4259 = vmatpush3.bf16.msra.mxu0 %v4256_v58  ;;  %v4264_v8 = vpack.c.bf16 %v3161_v34, %v3160_v33  ;;  %v3166_v53 = vld [vmem:[%s6128_s2 + $0xd0] sm:$0xff]  ;;  %v3168_v1 = vld [vmem:[%s6128_s2 + $0xe0] sm:$0xff]  ;;  %v3169_v2 = vld [vmem:[%s6128_s2 + $0xe8] sm:$0xff]  ;;  %s4795_s26 = smov 48   ;;  %s4796_s27 = smov 40  }
 0x3e8   :  { %1462 = vrot.lane.b32.xlu0 %v1453_v20, %s4785_s22  ;;  %4261 = vmatprep.subr.bf16.mxu0 %v4260_v3  ;;  %v3170_v33 = vld [vmem:[%s6128_s2 + $0xf0] sm:$0xff]  ;;  %v3171_v34 = vld [vmem:[%s6128_s2 + $0xf8] sm:$0xff]  ;;  %s4797_s28 = smov 32   ;;  %s4798_s29 = smov 24  }
 0x3e9   :  { %4335 = vmatpush3.bf16.msra.mxu1 %v4332_v45  ;;  %v3165_v45 = vld [vmem:[%s6128_s2 + $0xc8] sm:$0xff]  ;;  %s4799_s8 = smov 16  }
 0x3ea   :  { %4337 = vmatprep.subr.bf16.mxu1 %v4336_v48  ;;  %v4272_v57 = vpack.c.bf16 %v3165_v45, %v3164_v44 }
 0x3eb   :  { %4263 = vmatpush3.bf16.msra.mxu0 %v4260_v3 }
 0x3ec   :  { %4265 = vmatprep.subr.bf16.mxu0 %v4264_v8 }
 0x3ed   :  { %4339 = vmatpush3.bf16.msra.mxu1 %v4336_v48  ;;  %v4268_v48 = vpack.c.bf16 %v3163_v39, %v3162_v37 }
 0x3ee   :  { %4341 = vmatprep.subr.bf16.mxu1 %v4340_v51 }
 0x3ef   :  { %4267 = vmatpush3.bf16.msra.mxu0 %v4264_v8  ;;  %v4284_v8 = vpack.c.bf16 %v3171_v34, %v3170_v33 }
 0x3f0   :  { %4269 = vmatprep.subr.bf16.mxu0 %v4268_v48 }
 0x3f1   :  { %4343 = vmatpush3.bf16.msra.mxu1 %v4340_v51 }
 0x3f2   :  { %4345 = vmatprep.subr.bf16.mxu1 %v4344_v54 }
 0x3f3   :  { %4271 = vmatpush3.bf16.msra.mxu0 %v4268_v48 }
 0x3f4   :  { %4273 = vmatprep.subr.bf16.mxu0 %v4272_v57 }
 0x3f5   :  { %4347 = vmatpush3.bf16.msra.mxu1 %v4344_v54  ;;  %v3167_v54 = vld [vmem:[%s6128_s2 + $0xd8] sm:$0xff] }
 0x3f6   :  { %4349 = vmatprep.subr.bf16.mxu1 %v4348_v60  ;;  %v4276_v32 = vpack.c.bf16 %v3167_v54, %v3166_v53 }
 0x3f7   :  { %4275 = vmatpush3.bf16.msra.mxu0 %v4272_v57 }
 0x3f8   :  { %4277 = vmatprep.subr.bf16.mxu0 %v4276_v32 }
 0x3f9   :  { %4351 = vmatpush3.bf16.msra.mxu1 %v4348_v60 }
 0x3fa   :  { %4353 = vmatprep.subr.bf16.mxu1 %v5425_v7 }
 0x3fb   :  { %4279 = vmatpush3.bf16.msra.mxu0 %v4276_v32 }
 0x452   :  { %v1459_v62 = vpop.permute.xlu0 %1458 }
 0x453   :  { %v1465_v63 = vpop.permute.xlu1 %1464  ;;  %1477 = vst.msk [vmem:[#allocation3] sm:$0xfe] %vm1476_vm13, %v1459_v62 }
 0x454   :  { %1478 = vst.msk [vmem:[#allocation3 + $0x8] sm:$0xfe] %vm1429_vm0, %v1459_v62  ;;  %1486 = vst.msk [vmem:[#allocation3 + $0x38] sm:$0xfe] %vm1429_vm0, %v1465_v63  ;;  %vm1482_vm0 = vcmask 1040448  }
 0x455   :  { %1485 = vst.msk [vmem:[#allocation3 + $0x30] sm:$0xfe] %vm1476_vm13, %v1465_v63  ;;  %vm2311_vm13 = vcmask 1045504  }
 0x456   :  { %v1461_v5 = vpop.permute.xlu0 %1460 }
 0x457   :  { %v1467_v6 = vpop.permute.xlu1 %1466  ;;  %1480 = vst.msk [vmem:[#allocation3 + $0x10] sm:$0xff] %vm1479_vm3, %v1461_v5 }
 0x458   :  { %1481 = vst.msk [vmem:[#allocation3 + $0x18] sm:$0xff] %vm1292_vm5, %v1461_v5  ;;  %1488 = vst.msk [vmem:[#allocation3 + $0x48] sm:$0xff] %vm1292_vm5, %v1467_v6 }
 0x459   :  { %1487 = vst.msk [vmem:[#allocation3 + $0x40] sm:$0xff] %vm1479_vm3, %v1467_v6  ;;  %v4280_v6 = vpack.c.bf16 %v3169_v2, %v3168_v1  ;;  %v3194_v1 = vld [vmem:[%s6128_s2 + $0x1b0] sm:$0xff]  ;;  %v3195_v2 = vld [vmem:[%s6128_s2 + $0x1b8] sm:$0xff] }
 0x45a   :  { %v5436_v9 = vld [vmem:[#allocation3] sm:$0xff]  ;;  %v1463_v10 = vpop.permute.xlu0 %1462 }
 0x45b   :  { %v1511_v35 = vld [vmem:[#allocation3 + $0x8] sm:$0xff]  ;;  %1483 = vst.msk [vmem:[#allocation3 + $0x20] sm:$0x1] %vm1482_vm0, %v1463_v10  ;;  %v1513_v13 = vld [vmem:[#allocation3 + $0x38] sm:$0xff]  ;;  %v1999_v14 = vld [vmem:[#allocation3] sm:$0xfe]  ;;  %4281 = vmatprep.subr.bf16.mxu0 %v4280_v6 }
 0x45c   :  { %v5439_v11 = vpack.i.bf16 %v1511_v35, %v5436_v9  ;;  %1484 = vst.msk [vmem:[#allocation3 + $0x28] sm:$0x1] %vm1433_vm15, %v1463_v10  ;;  %v5443_v12 = vld [vmem:[#allocation3 + $0x30] sm:$0xff]  ;;  %v2000_v15 = vld [vmem:[#allocation3 + $0x8] sm:$0xfe]  ;;  %v2023_v20 = vrot.slane %v1999_v14, 1  ;;  %4283 = vmatpush3.bf16.msra.mxu0 %v4280_v6 }
 0x45d   :  { %v2005_v16 = vld [vmem:[#allocation3 + $0x30] sm:$0xfe]  ;;  %v2006_v17 = vld [vmem:[#allocation3 + $0x38] sm:$0xfe]  ;;  %v5458_v31 = vpack.i.bf16 %v1513_v13, %v5443_v12  ;;  %v2026_v23 = vrot.slane %v2000_v15, 1  ;;  %v1495_v35 = vld [vmem:[%s6128_s2] sm:$0xff]  ;;  %4285 = vmatprep.subr.bf16.mxu0 %v4284_v8 }
 0x45e   :  { %4645 = vrot.lane.b32.xlu1 %v5439_v11, %s4786_s18  ;;  %v5447_v18 = vld [vmem:[#allocation3 + $0x10] sm:$0xff]  ;;  %v2033_v61 = vrot.slane %v2005_v16, 1  ;;  %v2036_v30 = vrot.slane %v2006_v17, 1  ;;  %v1496_v10 = vld [vmem:[%s6128_s2 + $0x8] sm:$0xff]  ;;  %v2432_v14 = vld [vmem:[#allocation3] sm:$0xfc] }
 0x45f   :  { %v5449_v19 = vld [vmem:[#allocation3 + $0x18] sm:$0xff]  ;;  %v5460_v36 = vld [vmem:[#allocation3 + $0x48] sm:$0xff]  ;;  %v5463_v21 = vrot.slane %v5447_v18, 1  ;;  %v5515_v58 = vrot.slane %v5447_v18, 2  ;;  %v5547_v13 = vpack.c.bf16 %v1496_v10, %v1495_v35  ;;  %v2436_v16 = vld [vmem:[#allocation3 + $0x30] sm:$0xfc]  ;;  %v4364_v35 = vpack.c.bf16 %v3195_v2, %v3194_v1 }
 0x460   :  { %v5451_v25 = vld [vmem:[#allocation3 + $0x40] sm:$0xff]  ;;  %v5455_v27 = vpack.i.bf16 %v5449_v19, %v5447_v18  ;;  %v2027_v26 = vrot.slane %v5449_v19, 1  ;;  %v2037_v38 = vrot.slane %v5460_v36, 1  ;;  %v2452_v59 = vrot.slane %v5449_v19, 2  ;;  %4287 = vmatpush3.bf16.msra.mxu0 %v4284_v8  ;;  %v2433_v15 = vld [vmem:[#allocation3 + $0x8] sm:$0xfc] }
 0x461   :  { %v5473_v28 = vpack.i.bf16 %v5460_v36, %v5451_v25  ;;  %v5476_v29 = vrot.slane %v5451_v25, 1  ;;  %v2025_v42 = vsel %vm1878_vm14, %v2023_v20, %v5463_v21  ;;  %4289 = vmatprep.subr.bf16.mxu0 %v5547_v13  ;;  %v2437_v17 = vld [vmem:[#allocation3 + $0x38] sm:$0xfc]  ;;  %v2448_v19 = vrot.slane %v2432_v14, 2  ;;  %v1500_v1 = vld [vmem:[%s6128_s2 + $0x28] sm:$0xff] }
 0x462   :  { %1468 = vrot.lane.b32.xlu1 %v1456_v24, %s4785_s22  ;;  %4650 = vrot.lane.b32.xlu0 %v5455_v27, %s4786_s18  ;;  %v2003_v22 = vld [vmem:[#allocation3 + $0x20] sm:$0x1]  ;;  %v2028_v43 = vsel %vm1878_vm14, %v2026_v23, %v2027_v26  ;;  %v2038_v51 = vsel %vm1878_vm14, %v2036_v30, %v2037_v38  ;;  %v2451_v20 = vrot.slane %v2433_v15, 2  ;;  %v2458_v23 = vrot.slane %v2436_v16, 2  ;;  %v3197_v16 = vld [vmem:[%s6128_s2 + $0x1c8] sm:$0xff] }
 0x463   :  { %v2004_v24 = vld [vmem:[#allocation3 + $0x28] sm:$0x1]  ;;  %v2029_v40 = vrot.slane %v2003_v22, 1  ;;  %v2434_v49 = vld [vmem:[#allocation3 + $0x20] sm:$0x3]  ;;  %v2035_v50 = vsel %vm1878_vm14, %v2033_v61, %v5476_v29  ;;  %v4664_v56 = vpack.i.bf16 %v2028_v43, %v2025_v42  ;;  %v2461_v61 = vrot.slane %v2437_v17, 2 }
 0x464   :  { %v2031_v41 = vrot.slane %v2004_v24, 1  ;;  %v2435_v55 = vld [vmem:[#allocation3 + $0x28] sm:$0x3]  ;;  %v2454_v60 = vrot.slane %v2434_v49, 2  ;;  %v4674_v63 = vpack.i.bf16 %v2038_v51, %v2035_v50  ;;  %v2450_v30 = vsel %vm2311_vm13, %v2448_v19, %v5515_v58  ;;  %v3190_v42 = vld [vmem:[%s6128_s2 + $0x190] sm:$0xff]  ;;  %v3191_v43 = vld [vmem:[%s6128_s2 + $0x198] sm:$0xff] }
 0x465   :  { %v2030_v46 = vsel %vm1878_vm14, %v5463_v21, %v2029_v40  ;;  %v2456_v62 = vrot.slane %v2435_v55, 2  ;;  %v4356_v48 = vpack.c.bf16 %v3191_v43, %v3190_v42  ;;  %v3192_v50 = vld [vmem:[%s6128_s2 + $0x1a0] sm:$0xff]  ;;  %v3193_v51 = vld [vmem:[%s6128_s2 + $0x1a8] sm:$0xff] }
 0x466   :  { %4655 = vrot.lane.b32.xlu0 %v5458_v31, %s4786_s18  ;;  %4660 = vrot.lane.b32.xlu1 %v5473_v28, %s4786_s18  ;;  %v2032_v47 = vsel %vm1878_vm14, %v2027_v26, %v2031_v41  ;;  %v2455_v3 = vsel %vm2311_vm13, %v5515_v58, %v2454_v60  ;;  %v5557_v26 = vrot.slane %v5451_v25, 2  ;;  %v1866_v60 = vld [vmem:[#allocation3] sm:$0xfe] }
 0x467   :  { %v5506_v52 = vpack.i.bf16 %v2032_v47, %v2030_v46  ;;  %v2457_v4 = vsel %vm2311_vm13, %v2452_v59, %v2456_v62  ;;  %v4360_v62 = vpack.c.bf16 %v3193_v51, %v3192_v50  ;;  %v3196_v15 = vld [vmem:[%s6128_s2 + $0x1c0] sm:$0xff]  ;;  %v3205_v51 = vld [vmem:[%s6128_s2 + $0x208] sm:$0xff] }
 0x468   :  { %v5530_v5 = vpack.i.bf16 %v2457_v4, %v2455_v3 }
 0x46a   :  { %4665 = vrot.lane.b32.xlu0 %v4664_v56, %s4787_s10  ;;  %4670 = vrot.lane.b32.xlu1 %v5506_v52, %s4787_s10 }
 0x46e   :  { %4675 = vrot.lane.b32.xlu0 %v4674_v63, %s4787_s10 }
 0x472   :  { %4685 = vrot.lane.b32.xlu0 %v4664_v56, %s4786_s18 }
 0x476   :  { %4695 = vrot.lane.b32.xlu0 %v4674_v63, %s4786_s18 }
 0x47a   :  { %4705 = vrot.lane.b32.xlu0 %v5439_v11, %s4787_s10  ;;  %v2462_v11 = vrot.slane %v5460_v36, 2 }
 0x47c   :  { %v2463_v37 = vsel %vm2311_vm13, %v2461_v61, %v2462_v11 }
 0x47e   :  { %4710 = vrot.lane.b32.xlu0 %v5455_v27, %s4787_s10  ;;  %v2453_v27 = vsel %vm2311_vm13, %v2451_v20, %v2452_v59  ;;  %v4368_v20 = vpack.c.bf16 %v3197_v16, %v3196_v15 }
 0x47f   :  { %v5570_v22 = vpack.i.bf16 %v2453_v27, %v2450_v30  ;;  %v3200_v27 = vld [vmem:[%s6128_s2 + $0x1e0] sm:$0xff] }
 0x482   :  { %4725 = vrot.lane.b32.xlu0 %v5458_v31, %s4787_s10  ;;  %v2460_v31 = vsel %vm2311_vm13, %v2458_v23, %v5557_v26  ;;  %v3199_v23 = vld [vmem:[%s6128_s2 + $0x1d8] sm:$0xff] }
 0x483   :  { %v5574_v24 = vpack.i.bf16 %v2463_v37, %v2460_v31  ;;  %v3201_v31 = vld [vmem:[%s6128_s2 + $0x1e8] sm:$0xff] }
 0x486   :  { %4730 = vrot.lane.b32.xlu0 %v5473_v28, %s4787_s10 }
 0x48a   :  { %4745 = vrot.lane.b32.xlu0 %v5570_v22, %s4786_s18 }
 0x48e   :  { %4755 = vrot.lane.b32.xlu0 %v5574_v24, %s4786_s18 }
 0x4d0   :  { %v4646_v39 = vpop.permute.xlu1 %4645 }
 0x4d1   :  { %v4648_v40 = vunpack.i.h.bf16 %v4646_v39  ;;  %v4647_v28 = vunpack.i.l.bf16 %v4646_v39  ;;  %v4376_v39 = vpack.c.bf16 %v3201_v31, %v3200_v27  ;;  %v3209_v31 = vld [vmem:[%s6128_s2 + $0x228] sm:$0xff] }
 0x4d3   :  { %v1769_v41 = vsel %vm1317_vm1, %v4647_v28, %v4648_v40  ;;  %v3203_v40 = vld [vmem:[%s6128_s2 + $0x1f8] sm:$0xff] }
 0x4d4   :  { %v1469_v44 = vpop.permute.xlu1 %1468  ;;  %3878 = vmatprep.mubr.f32.mxu1 %v1769_v41  ;;  %v4651_v45 = vpop.permute.xlu0 %4650 }
 0x4d5   :  { %1489 = vst.msk [vmem:[#allocation3 + $0x50] sm:$0x1] %vm1482_vm0, %v1469_v44  ;;  %v4653_v46 = vunpack.i.h.bf16 %v4651_v45  ;;  %v4652_v47 = vunpack.i.l.bf16 %v4651_v45 }
 0x4d6   :  { %1490 = vst.msk [vmem:[#allocation3 + $0x58] sm:$0x1] %vm1433_vm15, %v1469_v44  ;;  %vm6138_vm15 = vcmask 654336  }
 0x4d7   :  { %v1770_v49 = vsel %vm1317_vm1, %v4652_v47, %v4653_v46  ;;  %v1497_v47 = vld [vmem:[%s6128_s2 + $0x10] sm:$0xff] }
 0x4d8   :  { %v4656_v53 = vpop.permute.xlu0 %4655  ;;  %3879 = vmatmul.mubr.f32.vlgmr.msra.gmra.mrb[0].mxu1 %v1770_v49  ;;  %v4661_v54 = vpop.permute.xlu1 %4660  ;;  %v1868_v49 = vld [vmem:[#allocation3 + $0x20] sm:$0x1] }
 0x4d9   :  { %v4658_v55 = vunpack.i.h.bf16 %v4656_v53  ;;  %v4657_v56 = vunpack.i.l.bf16 %v4656_v53  ;;  %4355 = vmatpush3.bf16.msra.mxu1 %v5425_v7  ;;  %v4663_v57 = vunpack.i.h.bf16 %v4661_v54  ;;  %v4662_v59 = vunpack.i.l.bf16 %v4661_v54 }
 0x4da   :  { %4357 = vmatprep.subr.bf16.mxu1 %v4356_v48  ;;  %v1879_v7 = vrot.slane %v1866_v60, 1  ;;  %v1882_v60 = vrot.slane %v1868_v49, 1  ;;  %v3212_v49 = vld [vmem:[%s6128_s2 + $0x240] sm:$0xff] }
 0x4db   :  { %v1771_v63 = vsel %vm1317_vm1, %v4657_v56, %v4658_v55  ;;  %v1772_v32 = vsel %vm1317_vm1, %v4662_v59, %v4663_v57  ;;  %v1869_v55 = vld [vmem:[#allocation3 + $0x30] sm:$0xfe] }
 0x4dc   :  { %v5603_v3 = vpop.permute.xlu0 %4665  ;;  %3881 = vmatprep.mubr.f32.mxu1 %v1771_v63  ;;  %v2009_v4 = vld [vmem:[#allocation3 + $0x50] sm:$0x1]  ;;  %v1881_v8 = vsel %vm1878_vm14, %v1879_v7, %v5463_v21  ;;  %v1884_v7 = vrot.slane %v1869_v55, 1 }
 0x4dd   :  { %v2010_v6 = vld [vmem:[#allocation3 + $0x58] sm:$0x1]  ;;  %4359 = vmatpush3.bf16.msra.mxu1 %v4356_v48  ;;  %v2039_v33 = vrot.slane %v2009_v4, 1  ;;  %v2438_v44 = vld [vmem:[#allocation3 + $0x50] sm:$0x3] }
 0x4de   :  { %v2041_v34 = vrot.slane %v2010_v6, 1  ;;  %3882 = vmatmul.mubr.f32.gmra.mrb[2].mxu1 %v1772_v32  ;;  %4361 = vmatprep.subr.bf16.mxu1 %v4360_v62  ;;  %v2439_v45 = vld [vmem:[#allocation3 + $0x58] sm:$0x3]  ;;  %v2464_v56 = vrot.slane %v2438_v44, 2  ;;  %v1499_v32 = vld [vmem:[%s6128_s2 + $0x20] sm:$0xff]  ;;  %v3206_v6 = vld [vmem:[%s6128_s2 + $0x210] sm:$0xff] }
 0x4df   :  { %3916 = vmatprep.mubr.f32.mxu1 %v1881_v8  ;;  %v2040_v10 = vsel %vm1878_vm14, %v5476_v29, %v2039_v33  ;;  %v1498_v48 = vld [vmem:[%s6128_s2 + $0x18] sm:$0xff]  ;;  %v2466_v57 = vrot.slane %v2439_v45, 2  ;;  %v1871_v4 = vld [vmem:[#allocation3 + $0x50] sm:$0x1]  ;;  %v4296_v16 = vpack.c.bf16 %v1500_v1, %v1499_v32 }
 0x4e0   :  { %v2042_v14 = vsel %vm1878_vm14, %v2037_v38, %v2041_v34  ;;  %v5618_v17 = vpop.permute.xlu0 %4675  ;;  %v3198_v38 = vld [vmem:[%s6128_s2 + $0x1d0] sm:$0xff]  ;;  %v4292_v59 = vpack.c.bf16 %v1498_v48, %v1497_v47  ;;  %v3207_v33 = vld [vmem:[%s6128_s2 + $0x218] sm:$0xff] }
 0x4e1   :  { %v4679_v19 = vpack.i.bf16 %v2042_v14, %v2040_v10  ;;  %4363 = vmatpush3.bf16.msra.mxu1 %v4360_v62  ;;  %v4372_v30 = vpack.c.bf16 %v3199_v23, %v3198_v38  ;;  %v2467_v10 = vsel %vm2311_vm13, %v2462_v11, %v2466_v57  ;;  %v1883_v14 = vsel %vm1878_vm14, %v5463_v21, %v1882_v60  ;;  %v1501_v21 = vld [vmem:[%s6128_s2 + $0x30] sm:$0xff]  ;;  %v1502_v23 = vld [vmem:[%s6128_s2 + $0x38] sm:$0xff]  ;;  %v3216_v60 = vld [vmem:[%s6128_s2 + $0x260] sm:$0xff] }
 0x4e2   :  { %4365 = vmatprep.subr.bf16.mxu1 %v4364_v35  ;;  %v4667_v38 = vunpack.i.l.bf16 %v5603_v3  ;;  %v1886_v11 = vsel %vm1878_vm14, %v1884_v7, %v5476_v29  ;;  %v3211_v44 = vld [vmem:[%s6128_s2 + $0x238] sm:$0xff]  ;;  %v1505_v47 = vld [vmem:[%s6128_s2 + $0x50] sm:$0xff] }
 0x4e3   :  { %4680 = vrot.lane.b32.xlu1 %v4679_v19, %s4787_s10  ;;  %v1506_v48 = vld [vmem:[%s6128_s2 + $0x58] sm:$0xff]  ;;  %v1509_v57 = vld [vmem:[%s6128_s2 + $0x70] sm:$0xff] }
 0x4e4   :  { %v5627_v61 = vpop.permute.xlu0 %4685  ;;  %v3218_v1 = vld [vmem:[%s6128_s2 + $0x270] sm:$0xff] }
 0x4e5   :  { %4367 = vmatpush3.bf16.msra.mxu1 %v4364_v35  ;;  %v2465_v35 = vsel %vm2311_vm13, %v5557_v26, %v2464_v56 }
 0x4e6   :  { %4369 = vmatprep.subr.bf16.mxu1 %v4368_v20 }
 0x4e7   :  { %4690 = vrot.lane.b32.xlu1 %v5506_v52, %s4786_s18  ;;  %v3202_v52 = vld [vmem:[%s6128_s2 + $0x1f0] sm:$0xff] }
 0x4e8   :  { %v5637_v37 = vpop.permute.xlu0 %4695  ;;  %v4380_v43 = vpack.c.bf16 %v3203_v40, %v3202_v52  ;;  %v4300_v40 = vpack.c.bf16 %v1502_v23, %v1501_v21  ;;  %v3230_v23 = vld [vmem:[%s6128_s2 + $0x2d0] sm:$0xff] }
 0x4e9   :  { %4371 = vmatpush3.bf16.msra.mxu1 %v4368_v20  ;;  %v4668_v20 = vunpack.i.h.bf16 %v5603_v3  ;;  %v3208_v3 = vld [vmem:[%s6128_s2 + $0x220] sm:$0xff] }
 0x4ea   :  { %4373 = vmatprep.subr.bf16.mxu1 %v4372_v30 }
 0x4eb   :  { %4700 = vrot.lane.b32.xlu1 %v4679_v19, %s4786_s18  ;;  %v4388_v19 = vpack.c.bf16 %v3207_v33, %v3206_v6  ;;  %v3221_v6 = vld [vmem:[%s6128_s2 + $0x288] sm:$0xff]  ;;  %v4671_v33 = vpop.permute.xlu1 %4670 }
 0x4ec   :  { %v4706_v28 = vpop.permute.xlu0 %4705 }
 0x4ed   :  { %4375 = vmatpush3.bf16.msra.mxu1 %v4372_v30  ;;  %v4708_v41 = vunpack.i.h.bf16 %v4706_v28  ;;  %v4707_v42 = vunpack.i.l.bf16 %v4706_v28  ;;  %v1503_v28 = vld [vmem:[%s6128_s2 + $0x40] sm:$0xff] }
 0x4ee   :  { %4377 = vmatprep.subr.bf16.mxu1 %v4376_v39 }
 0x4ef   :  { %4715 = vrot.lane.b32.xlu1 %v5570_v22, %s4787_s10  ;;  %v1557_v46 = vsel %vm1319_vm2, %v4707_v42, %v4708_v41  ;;  %v3204_v22 = vld [vmem:[%s6128_s2 + $0x200] sm:$0xff]  ;;  %v1504_v41 = vld [vmem:[%s6128_s2 + $0x48] sm:$0xff]  ;;  %v2076_v42 = vsel %vm1319_vm2, %v4667_v38, %v4668_v20  ;;  %v3226_v38 = vld [vmem:[%s6128_s2 + $0x2b0] sm:$0xff] }
 0x4f0   :  { %v4711_v50 = vpop.permute.xlu0 %4710  ;;  %3802 = vmatprep.mubr.f32.mxu0 %v1557_v46  ;;  %v4384_v63 = vpack.c.bf16 %v3205_v51, %v3204_v22  ;;  %v4304_v45 = vpack.c.bf16 %v1504_v41, %v1503_v28  ;;  %v1507_v22 = vld [vmem:[%s6128_s2 + $0x60] sm:$0xff]  ;;  %v1508_v51 = vld [vmem:[%s6128_s2 + $0x68] sm:$0xff] }
 0x4f1   :  { %v4713_v53 = vunpack.i.h.bf16 %v4711_v50  ;;  %v4712_v54 = vunpack.i.l.bf16 %v4711_v50  ;;  %4379 = vmatpush3.bf16.msra.mxu1 %v4376_v39  ;;  %v4312_v55 = vpack.c.bf16 %v1508_v51, %v1507_v22  ;;  %v3225_v20 = vld [vmem:[%s6128_s2 + $0x2a8] sm:$0xff]  ;;  %v3236_v41 = vld [vmem:[%s6128_s2 + $0x300] sm:$0xff] }
 0x4f2   :  { %4381 = vmatprep.subr.bf16.mxu1 %v4380_v43 }
 0x4f3   :  { %4720 = vrot.lane.b32.xlu1 %v5530_v5, %s4787_s10  ;;  %v1558_v62 = vsel %vm1319_vm2, %v4712_v54, %v4713_v53  ;;  %v3214_v53 = vld [vmem:[%s6128_s2 + $0x250] sm:$0xff]  ;;  %v3215_v54 = vld [vmem:[%s6128_s2 + $0x258] sm:$0xff] }
 0x4f4   :  { %v4726_v2 = vpop.permute.xlu0 %4725  ;;  %3803 = vmatmul.mubr.f32.vlgmr.msra.gmra.mrb[4].mxu0 %v1558_v62  ;;  %v4404_v56 = vpack.c.bf16 %v3215_v54, %v3214_v53  ;;  %v3217_v62 = vld [vmem:[%s6128_s2 + $0x268] sm:$0xff] }
 0x4f5   :  { %v4728_v34 = vunpack.i.h.bf16 %v4726_v2  ;;  %v4727_v8 = vunpack.i.l.bf16 %v4726_v2  ;;  %4291 = vmatpush3.bf16.msra.mxu0 %v5547_v13  ;;  %4383 = vmatpush3.bf16.msra.mxu1 %v4380_v43  ;;  %v1887_v13 = vrot.slane %v1871_v4, 1  ;;  %v4392_v43 = vpack.c.bf16 %v3209_v31, %v3208_v3  ;;  %v3219_v2 = vld [vmem:[%s6128_s2 + $0x278] sm:$0xff]  ;;  %v3220_v4 = vld [vmem:[%s6128_s2 + $0x280] sm:$0xff]  ;;  %v3233_v31 = vld [vmem:[%s6128_s2 + $0x2e8] sm:$0xff] }
 0x4f6   :  { %4293 = vmatprep.subr.bf16.mxu0 %v4292_v59  ;;  %4385 = vmatprep.subr.bf16.mxu1 %v4384_v63  ;;  %v4408_v32 = vpack.c.bf16 %v3217_v62, %v3216_v60  ;;  %v4412_v7 = vpack.c.bf16 %v3219_v2, %v3218_v1  ;;  %v3232_v3 = vld [vmem:[%s6128_s2 + $0x2e0] sm:$0xff] }
 0x4f7   :  { %4735 = vrot.lane.b32.xlu1 %v5574_v24, %s4787_s10  ;;  %v1559_v15 = vsel %vm1319_vm2, %v4727_v8, %v4728_v34  ;;  %v4739_v24 = vpack.i.bf16 %v2467_v10, %v2465_v35  ;;  %v1888_v39 = vsel %vm1878_vm14, %v5476_v29, %v1887_v13  ;;  %v3210_v29 = vld [vmem:[%s6128_s2 + $0x230] sm:$0xff]  ;;  %v4678_v34 = vunpack.i.h.bf16 %v5618_v17 }
 0x4f8   :  { %3917 = vmatmul.mubr.f32.vlgmr.msra.gmra.mrb[0].mxu1 %v1883_v14  ;;  %v4731_v36 = vpop.permute.xlu0 %4730  ;;  %3805 = vmatprep.mubr.f32.mxu0 %v1559_v15  ;;  %v4396_v46 = vpack.c.bf16 %v3211_v44, %v3210_v29  ;;  %v4677_v8 = vunpack.i.l.bf16 %v5618_v17  ;;  %v4416_v35 = vpack.c.bf16 %v3221_v6, %v3220_v4  ;;  %v4673_v10 = vunpack.i.h.bf16 %v4671_v33  ;;  %v3222_v15 = vld [vmem:[%s6128_s2 + $0x290] sm:$0xff]  ;;  %v3243_v4 = vld [vmem:[%s6128_s2 + $0x338] sm:$0xff] }
 0x4f9   :  { %v4733_v30 = vunpack.i.h.bf16 %v4731_v36  ;;  %v4732_v27 = vunpack.i.l.bf16 %v4731_v36  ;;  %4295 = vmatpush3.bf16.msra.mxu0 %v4292_v59  ;;  %3919 = vmatprep.mubr.f32.mxu1 %v1886_v11  ;;  %v1510_v59 = vld [vmem:[%s6128_s2 + $0x78] sm:$0xff]  ;;  %v4672_v14 = vunpack.i.l.bf16 %v4671_v33  ;;  %v3228_v11 = vld [vmem:[%s6128_s2 + $0x2c0] sm:$0xff]  ;;  %v4688_v29 = vunpack.i.h.bf16 %v5627_v61 }
 0x4fa   :  { %4387 = vmatpush3.bf16.msra.mxu1 %v4384_v63  ;;  %4297 = vmatprep.subr.bf16.mxu0 %v4296_v16  ;;  %v4316_v63 = vpack.c.bf16 %v1510_v59, %v1509_v57  ;;  %v2078_v13 = vsel %vm1319_vm2, %v4677_v8, %v4678_v34  ;;  %v4687_v44 = vunpack.i.l.bf16 %v5627_v61  ;;  %v3240_v57 = vld [vmem:[%s6128_s2 + $0x320] sm:$0xff]  ;;  %v3241_v59 = vld [vmem:[%s6128_s2 + $0x328] sm:$0xff] }
 0x4fb   :  { %4740 = vrot.lane.b32.xlu1 %v4739_v24, %s4787_s10  ;;  %4389 = vmatprep.subr.bf16.mxu1 %v4388_v19  ;;  %v1560_v52 = vsel %vm1319_vm2, %v4732_v27, %v4733_v30  ;;  %v3231_v30 = vld [vmem:[%s6128_s2 + $0x2d8] sm:$0xff]  ;;  %v4456_v1 = vpack.c.bf16 %v3241_v59, %v3240_v57  ;;  %v3244_v34 = vld [vmem:[%s6128_s2 + $0x340] sm:$0xff]  ;;  %v3245_v8 = vld [vmem:[%s6128_s2 + $0x348] sm:$0xff] }
 0x4fc   :  { %3920 = vmatmul.mubr.f32.gmra.mrb[2].mxu1 %v1888_v39  ;;  %3806 = vmatmul.mubr.f32.gmra.mrb[6].mxu0 %v1560_v52  ;;  %v4436_v27 = vpack.c.bf16 %v3231_v30, %v3230_v23  ;;  %v4440_v39 = vpack.c.bf16 %v3233_v31, %v3232_v3  ;;  %v3234_v52 = vld [vmem:[%s6128_s2 + $0x2f0] sm:$0xff]  ;;  %v2206_v61 = vsel %vm1317_vm1, %v4687_v44, %v4688_v29  ;;  %v3255_v23 = vld [vmem:[%s6128_s2 + $0x398] sm:$0xff]  ;;  %v3268_v59 = vld [vmem:[%s6128_s2 + $0x400] sm:$0xff] }
 0x4fd   :  { %4299 = vmatpush3.bf16.msra.mxu0 %v4296_v16  ;;  %3954 = vmatprep.mubr.f32.mxu1 %v2076_v42  ;;  %v3223_v16 = vld [vmem:[%s6128_s2 + $0x298] sm:$0xff]  ;;  %v3237_v42 = vld [vmem:[%s6128_s2 + $0x308] sm:$0xff]  ;;  %v3258_v44 = vld [vmem:[%s6128_s2 + $0x3b0] sm:$0xff] }
 0x4fe   :  { %4391 = vmatpush3.bf16.msra.mxu1 %v4388_v19  ;;  %3840 = vmatprep.mubr.f32.mxu0 %v5436_v9  ;;  %v3213_v9 = vld [vmem:[%s6128_s2 + $0x248] sm:$0xff]  ;;  %v4420_v17 = vpack.c.bf16 %v3223_v16, %v3222_v15  ;;  %v2077_v19 = vsel %vm1319_vm2, %v4672_v14, %v4673_v10  ;;  %v3246_v10 = vld [vmem:[%s6128_s2 + $0x350] sm:$0xff]  ;;  %v3247_v14 = vld [vmem:[%s6128_s2 + $0x358] sm:$0xff] }
 0x4ff   :  { %4750 = vrot.lane.b32.xlu1 %v5530_v5, %s4786_s18  ;;  %4301 = vmatprep.subr.bf16.mxu0 %v4300_v40  ;;  %v4308_v5 = vpack.c.bf16 %v1506_v48, %v1505_v47  ;;  %v4400_v50 = vpack.c.bf16 %v3213_v9, %v3212_v49  ;;  %v3238_v49 = vld [vmem:[%s6128_s2 + $0x310] sm:$0xff]  ;;  %v3239_v9 = vld [vmem:[%s6128_s2 + $0x318] sm:$0xff]  ;;  %v4468_v15 = vpack.c.bf16 %v3247_v14, %v3246_v10  ;;  %v3248_v16 = vld [vmem:[%s6128_s2 + $0x360] sm:$0xff] }
 0x500   :  { %4393 = vmatprep.subr.bf16.mxu1 %v4392_v43  ;;  %v4452_v54 = vpack.c.bf16 %v3239_v9, %v3238_v49  ;;  %v3262_v9 = vld [vmem:[%s6128_s2 + $0x3d0] sm:$0xff]  ;;  %v3272_v10 = vld [vmem:[%s6128_s2 + $0x420] sm:$0xff]  ;;  %v3273_v14 = vld [vmem:[%s6128_s2 + $0x428] sm:$0xff] }
 0x501   :  { %4303 = vmatpush3.bf16.msra.mxu0 %v4300_v40  ;;  %v3235_v40 = vld [vmem:[%s6128_s2 + $0x2f8] sm:$0xff] }
 0x502   :  { %4395 = vmatpush3.bf16.msra.mxu1 %v4392_v43  ;;  %4305 = vmatprep.subr.bf16.mxu0 %v4304_v45  ;;  %v4444_v28 = vpack.c.bf16 %v3235_v40, %v3234_v52  ;;  %v4448_v43 = vpack.c.bf16 %v3237_v42, %v3236_v41  ;;  %v3256_v40 = vld [vmem:[%s6128_s2 + $0x3a0] sm:$0xff] }
 0x503   :  { %4760 = vrot.lane.b32.xlu1 %v4739_v24, %s4786_s18  ;;  %4397 = vmatprep.subr.bf16.mxu1 %v4396_v46  ;;  %v3229_v24 = vld [vmem:[%s6128_s2 + $0x2c8] sm:$0xff] }
 0x504   :  { %v4432_v21 = vpack.c.bf16 %v3229_v24, %v3228_v11 }
 0x505   :  { %4307 = vmatpush3.bf16.msra.mxu0 %v4304_v45 }
 0x506   :  { %4399 = vmatpush3.bf16.msra.mxu1 %v4396_v46  ;;  %4309 = vmatprep.subr.bf16.mxu0 %v4308_v5 }
 0x507   :  { %4401 = vmatprep.subr.bf16.mxu1 %v4400_v50 }
 0x509   :  { %4311 = vmatpush3.bf16.msra.mxu0 %v4308_v5  ;;  %v4698_v5 = vunpack.i.h.bf16 %v5637_v37 }
 0x50a   :  { %4403 = vmatpush3.bf16.msra.mxu1 %v4400_v50  ;;  %4313 = vmatprep.subr.bf16.mxu0 %v4312_v55  ;;  %v4697_v50 = vunpack.i.l.bf16 %v5637_v37 }
 0x50b   :  { %4405 = vmatprep.subr.bf16.mxu1 %v4404_v56 }
 0x50c   :  { %v2208_v60 = vsel %vm1317_vm1, %v4697_v50, %v4698_v5  ;;  %v3263_v5 = vld [vmem:[%s6128_s2 + $0x3d8] sm:$0xff] }
 0x50d   :  { %4315 = vmatpush3.bf16.msra.mxu0 %v4312_v55  ;;  %v4500_v50 = vpack.c.bf16 %v3263_v5, %v3262_v9 }
 0x50e   :  { %4407 = vmatpush3.bf16.msra.mxu1 %v4404_v56  ;;  %4317 = vmatprep.subr.bf16.mxu0 %v4316_v63  ;;  %v2303_v56 = vld [vmem:[#allocation3] sm:$0xfc] }
 0x50f   :  { %4409 = vmatprep.subr.bf16.mxu1 %v4408_v32 }
 0x511   :  { %4319 = vmatpush3.bf16.msra.mxu0 %v4316_v63 }
 0x512   :  { %4411 = vmatpush3.bf16.msra.mxu1 %v4408_v32  ;;  %v2312_v32 = vrot.slane %v2303_v56, 2 }
 0x513   :  { %4413 = vmatprep.subr.bf16.mxu1 %v4412_v7 }
 0x514   :  { %3841 = vmatmul.mubr.f32.vlgmr.msra.gmra.mrb[4].mxu0 %v5447_v18  ;;  %v3224_v18 = vld [vmem:[%s6128_s2 + $0x2a0] sm:$0xff]  ;;  %v2314_v6 = vsel %vm2311_vm13, %v2312_v32, %v5515_v58  ;;  %v3270_v32 = vld [vmem:[%s6128_s2 + $0x410] sm:$0xff] }
 0x515   :  { %3843 = vmatprep.mubr.f32.mxu0 %v5443_v12  ;;  %v4424_v12 = vpack.c.bf16 %v3225_v20, %v3224_v18  ;;  %v3251_v18 = vld [vmem:[%s6128_s2 + $0x378] sm:$0xff] }
 0x516   :  { %4415 = vmatpush3.bf16.msra.mxu1 %v4412_v7  ;;  %v3242_v7 = vld [vmem:[%s6128_s2 + $0x330] sm:$0xff] }
 0x517   :  { %4417 = vmatprep.subr.bf16.mxu1 %v4416_v35  ;;  %v4460_v33 = vpack.c.bf16 %v3243_v4, %v3242_v7 }
 0x518   :  { %3844 = vmatmul.mubr.f32.gmra.mrb[6].mxu0 %v5451_v25  ;;  %v3227_v25 = vld [vmem:[%s6128_s2 + $0x2b8] sm:$0xff] }
 0x519   :  { %3955 = vmatmul.mubr.f32.vlgmr.msra.gmra.mrb[0].mxu1 %v2077_v19  ;;  %v4428_v36 = vpack.c.bf16 %v3227_v25, %v3226_v38  ;;  %v3250_v19 = vld [vmem:[%s6128_s2 + $0x370] sm:$0xff]  ;;  %v3253_v38 = vld [vmem:[%s6128_s2 + $0x388] sm:$0xff]  ;;  %v2304_v25 = vld [vmem:[#allocation3 + $0x20] sm:$0x3] }
 0x51a   :  { %3957 = vmatprep.mubr.f32.mxu1 %v2078_v13  ;;  %4419 = vmatpush3.bf16.msra.mxu1 %v4416_v35  ;;  %v4464_v35 = vpack.c.bf16 %v3245_v8, %v3244_v34  ;;  %v3249_v13 = vld [vmem:[%s6128_s2 + $0x368] sm:$0xff]  ;;  %v4476_v20 = vpack.c.bf16 %v3251_v18, %v3250_v19  ;;  %v2315_v24 = vrot.slane %v2304_v25, 2  ;;  %v3274_v18 = vld [vmem:[%s6128_s2 + $0x430] sm:$0xff]  ;;  %v3276_v25 = vld [vmem:[%s6128_s2 + $0x440] sm:$0xff] }
 0x51b   :  { %4421 = vmatprep.subr.bf16.mxu1 %v4420_v17 }
 0x51e   :  { %4423 = vmatpush3.bf16.msra.mxu1 %v4420_v17  ;;  %v4472_v17 = vpack.c.bf16 %v3249_v13, %v3248_v16 }
 0x51f   :  { %4425 = vmatprep.subr.bf16.mxu1 %v4424_v12 }
 0x522   :  { %4427 = vmatpush3.bf16.msra.mxu1 %v4424_v12  ;;  %v3252_v12 = vld [vmem:[%s6128_s2 + $0x380] sm:$0xff] }
 0x523   :  { %4429 = vmatprep.subr.bf16.mxu1 %v4428_v36  ;;  %v4480_v11 = vpack.c.bf16 %v3253_v38, %v3252_v12 }
 0x526   :  { %4431 = vmatpush3.bf16.msra.mxu1 %v4428_v36  ;;  %v2305_v36 = vld [vmem:[#allocation3 + $0x30] sm:$0xfc] }
 0x527   :  { %4433 = vmatprep.subr.bf16.mxu1 %v4432_v21  ;;  %v2317_v30 = vrot.slane %v2305_v36, 2  ;;  %v3277_v36 = vld [vmem:[%s6128_s2 + $0x448] sm:$0xff] }
 0x52a   :  { %4435 = vmatpush3.bf16.msra.mxu1 %v4432_v21  ;;  %v3254_v21 = vld [vmem:[%s6128_s2 + $0x390] sm:$0xff] }
 0x52b   :  { %4437 = vmatprep.subr.bf16.mxu1 %v4436_v27  ;;  %v4484_v31 = vpack.c.bf16 %v3255_v23, %v3254_v21  ;;  %v3279_v21 = vld [vmem:[%s6128_s2 + $0x458] sm:$0xff] }
 0x52e   :  { %4439 = vmatpush3.bf16.msra.mxu1 %v4436_v27  ;;  %v2306_v27 = vld [vmem:[#allocation3 + $0x50] sm:$0x3] }
 0x52f   :  { %4441 = vmatprep.subr.bf16.mxu1 %v4440_v39  ;;  %v2320_v52 = vrot.slane %v2306_v27, 2  ;;  %v3281_v27 = vld [vmem:[%s6128_s2 + $0x468] sm:$0xff] }
 0x532   :  { %4443 = vmatpush3.bf16.msra.mxu1 %v4440_v39  ;;  %v2316_v39 = vsel %vm2311_vm13, %v5515_v58, %v2315_v24  ;;  %v2321_v58 = vsel %vm2311_vm13, %v5557_v26, %v2320_v52  ;;  %v3278_v24 = vld [vmem:[%s6128_s2 + $0x450] sm:$0xff] }
 0x533   :  { %4445 = vmatprep.subr.bf16.mxu1 %v4444_v28  ;;  %v4532_v23 = vpack.c.bf16 %v3279_v21, %v3278_v24 }
 0x536   :  { %4447 = vmatpush3.bf16.msra.mxu1 %v4444_v28  ;;  %v3257_v28 = vld [vmem:[%s6128_s2 + $0x3a8] sm:$0xff] }
 0x537   :  { %4449 = vmatprep.subr.bf16.mxu1 %v4448_v43  ;;  %v4488_v29 = vpack.c.bf16 %v3257_v28, %v3256_v40 }
 0x555   :  { %v4681_v45 = vpop.permute.xlu1 %4680 }
 0x556   :  { %v4683_v46 = vunpack.i.h.bf16 %v4681_v45  ;;  %v4682_v47 = vunpack.i.l.bf16 %v4681_v45  ;;  %v3259_v45 = vld [vmem:[%s6128_s2 + $0x3b8] sm:$0xff] }
 0x558   :  { %v2079_v48 = vsel %vm1319_vm2, %v4682_v47, %v4683_v46  ;;  %v4492_v47 = vpack.c.bf16 %v3259_v45, %v3258_v44 }
 0x559   :  { %v4691_v22 = vpop.permute.xlu1 %4690  ;;  %3958 = vmatmul.mubr.f32.gmra.mrb[2].mxu1 %v2079_v48  ;;  %v3260_v48 = vld [vmem:[%s6128_s2 + $0x3c0] sm:$0xff] }
 0x55a   :  { %v4693_v51 = vunpack.i.h.bf16 %v4691_v22  ;;  %v4692_v53 = vunpack.i.l.bf16 %v4691_v22  ;;  %3992 = vmatprep.mubr.f32.mxu1 %v2206_v61  ;;  %v3264_v22 = vld [vmem:[%s6128_s2 + $0x3e0] sm:$0xff]  ;;  %v3265_v61 = vld [vmem:[%s6128_s2 + $0x3e8] sm:$0xff] }
 0x55c   :  { %v2207_v55 = vsel %vm1317_vm1, %v4692_v53, %v4693_v51  ;;  %v4504_v53 = vpack.c.bf16 %v3265_v61, %v3264_v22 }
 0x55d   :  { %v4701_v37 = vpop.permute.xlu1 %4700  ;;  %3993 = vmatmul.mubr.f32.vlgmr.msra.gmra.mrb[0].mxu1 %v2207_v55  ;;  %v3267_v55 = vld [vmem:[%s6128_s2 + $0x3f8] sm:$0xff] }
 0x55e   :  { %v4703_v62 = vunpack.i.h.bf16 %v4701_v37  ;;  %v4702_v63 = vunpack.i.l.bf16 %v4701_v37  ;;  %4451 = vmatpush3.bf16.msra.mxu1 %v4448_v43  ;;  %3995 = vmatprep.mubr.f32.mxu1 %v2208_v60  ;;  %v2319_v43 = vsel %vm2311_vm13, %v2317_v30, %v5557_v26  ;;  %v3261_v26 = vld [vmem:[%s6128_s2 + $0x3c8] sm:$0xff]  ;;  %v3280_v30 = vld [vmem:[%s6128_s2 + $0x460] sm:$0xff] }
 0x55f   :  { %4453 = vmatprep.subr.bf16.mxu1 %v4452_v54  ;;  %v4496_v49 = vpack.c.bf16 %v3261_v26, %v3260_v48  ;;  %v3269_v37 = vld [vmem:[%s6128_s2 + $0x408] sm:$0xff] }
 0x560   :  { %v2209_v2 = vsel %vm1317_vm1, %v4702_v63, %v4703_v62  ;;  %v4512_v60 = vpack.c.bf16 %v3269_v37, %v3268_v59 }
 0x561   :  { %3996 = vmatmul.mubr.f32.gmra.mrb[2].mxu1 %v2209_v2  ;;  %v4716_v3 = vpop.permute.xlu1 %4715 }
 0x562   :  { %4455 = vmatpush3.bf16.msra.mxu1 %v4452_v54  ;;  %4030 = vmatprep.mubr.f32.mxu1 %v2314_v6  ;;  %v4718_v41 = vunpack.i.h.bf16 %v4716_v3  ;;  %v4717_v42 = vunpack.i.l.bf16 %v4716_v3  ;;  %v3266_v54 = vld [vmem:[%s6128_s2 + $0x3f0] sm:$0xff]  ;;  %v4746_v6 = vpop.permute.xlu0 %4745  ;;  %v4536_v3 = vpack.c.bf16 %v3281_v27, %v3280_v30 }
 0x563   :  { %4457 = vmatprep.subr.bf16.mxu1 %v4456_v1  ;;  %v4508_v57 = vpack.c.bf16 %v3267_v55, %v3266_v54  ;;  %v4747_v16 = vunpack.i.l.bf16 %v4746_v6 }
 0x564   :  { %v2501_v46 = vsel %vm1319_vm2, %v4717_v42, %v4718_v41 }
 0x565   :  { %v4721_v51 = vpop.permute.xlu1 %4720 }
 0x566   :  { %4459 = vmatpush3.bf16.msra.mxu1 %v4456_v1  ;;  %v4723_v62 = vunpack.i.h.bf16 %v4721_v51  ;;  %v4722_v63 = vunpack.i.l.bf16 %v4721_v51  ;;  %v3271_v1 = vld [vmem:[%s6128_s2 + $0x418] sm:$0xff]  ;;  %v4756_v28 = vpop.permute.xlu0 %4755 }
 0x567   :  { %4461 = vmatprep.subr.bf16.mxu1 %v4460_v33 }
 0x568   :  { %v2502_v34 = vsel %vm1319_vm2, %v4722_v63, %v4723_v62 }
 0x569   :  { %v4736_v56 = vpop.permute.xlu1 %4735 }
 0x56a   :  { %4463 = vmatpush3.bf16.msra.mxu1 %v4460_v33  ;;  %v4738_v2 = vunpack.i.h.bf16 %v4736_v56  ;;  %v4737_v7 = vunpack.i.l.bf16 %v4736_v56  ;;  %v4516_v33 = vpack.c.bf16 %v3271_v1, %v3270_v32 }
 0x56b   :  { %4465 = vmatprep.subr.bf16.mxu1 %v4464_v35 }
 0x56c   :  { %v2503_v13 = vsel %vm1319_vm2, %v4737_v7, %v4738_v2 }
 0x56d   :  { %v4741_v4 = vpop.permute.xlu1 %4740 }
 0x56e   :  { %4467 = vmatpush3.bf16.msra.mxu1 %v4464_v35  ;;  %v4743_v8 = vunpack.i.h.bf16 %v4741_v4  ;;  %v4742_v35 = vunpack.i.l.bf16 %v4741_v4 }
 0x56f   :  { %4469 = vmatprep.subr.bf16.mxu1 %v4468_v15 }
 0x570   :  { %v2504_v19 = vsel %vm1319_vm2, %v4742_v35, %v4743_v8 }
 0x571   :  { %v4751_v52 = vpop.permute.xlu1 %4750 }
 0x572   :  { %4471 = vmatpush3.bf16.msra.mxu1 %v4468_v15  ;;  %v4748_v15 = vunpack.i.h.bf16 %v4746_v6  ;;  %v4753_v41 = vunpack.i.h.bf16 %v4751_v52  ;;  %v4752_v42 = vunpack.i.l.bf16 %v4751_v52 }
 0x573   :  { %4473 = vmatprep.subr.bf16.mxu1 %v4472_v17 }
 0x574   :  { %v2631_v12 = vsel %vm1317_vm1, %v4747_v16, %v4748_v15  ;;  %v2632_v44 = vsel %vm1317_vm1, %v4752_v42, %v4753_v41 }
 0x576   :  { %4475 = vmatpush3.bf16.msra.mxu1 %v4472_v17  ;;  %v4520_v17 = vpack.c.bf16 %v3273_v14, %v3272_v10 }
 0x577   :  { %4477 = vmatprep.subr.bf16.mxu1 %v4476_v20 }
 0x57a   :  { %4479 = vmatpush3.bf16.msra.mxu1 %v4476_v20  ;;  %v3275_v20 = vld [vmem:[%s6128_s2 + $0x438] sm:$0xff] }
 0x57b   :  { %4481 = vmatprep.subr.bf16.mxu1 %v4480_v11  ;;  %v4524_v38 = vpack.c.bf16 %v3275_v20, %v3274_v18 }
 0x57d   :  { %4031 = vmatmul.mubr.f32.vlgmr.msra.gmra.mrb[0].mxu1 %v2316_v39  ;;  %v3283_v39 = vld [vmem:[%s6128_s2 + $0x478] sm:$0xff] }
 0x57e   :  { %4033 = vmatprep.mubr.f32.mxu1 %v2319_v43  ;;  %4483 = vmatpush3.bf16.msra.mxu1 %v4480_v11  ;;  %v4528_v11 = vpack.c.bf16 %v3277_v36, %v3276_v25  ;;  %v4758_v43 = vunpack.i.h.bf16 %v4756_v28 }
 0x57f   :  { %4485 = vmatprep.subr.bf16.mxu1 %v4484_v31 }
 0x581   :  { %4034 = vmatmul.mubr.f32.gmra.mrb[2].mxu1 %v2321_v58  ;;  %v4761_v58 = vpop.permute.xlu1 %4760 }
 0x582   :  { %4487 = vmatpush3.bf16.msra.mxu1 %v4484_v31  ;;  %4068 = vmatprep.mubr.f32.mxu1 %v2501_v46  ;;  %v3282_v31 = vld [vmem:[%s6128_s2 + $0x470] sm:$0xff]  ;;  %v4763_v45 = vunpack.i.h.bf16 %v4761_v58  ;;  %v4762_v46 = vunpack.i.l.bf16 %v4761_v58  ;;  %s4788_s2 = smov 104  }
 0x583   :  { %4489 = vmatprep.subr.bf16.mxu1 %v4488_v29  ;;  %v4540_v40 = vpack.c.bf16 %v3283_v39, %v3282_v31 }
 0x584   :  { %v2634_v48 = vsel %vm1317_vm1, %v4762_v46, %v4763_v45 }
 0x586   :  { %4491 = vmatpush3.bf16.msra.mxu1 %v4488_v29  ;;  %v4757_v29 = vunpack.i.l.bf16 %v4756_v28 }
 0x587   :  { %4493 = vmatprep.subr.bf16.mxu1 %v4492_v47 }
 0x58a   :  { %4495 = vmatpush3.bf16.msra.mxu1 %v4492_v47  ;;  %v2633_v47 = vsel %vm1317_vm1, %v4757_v29, %v4758_v43 }
 0x58b   :  { %4497 = vmatprep.subr.bf16.mxu1 %v4496_v49 }
 0x58e   :  { %4499 = vmatpush3.bf16.msra.mxu1 %v4496_v49 }
 0x58f   :  { %4501 = vmatprep.subr.bf16.mxu1 %v4500_v50 }
 0x592   :  { %4503 = vmatpush3.bf16.msra.mxu1 %v4500_v50 }
 0x593   :  { %4505 = vmatprep.subr.bf16.mxu1 %v4504_v53 }
 0x596   :  { %4507 = vmatpush3.bf16.msra.mxu1 %v4504_v53 }
 0x597   :  { %4509 = vmatprep.subr.bf16.mxu1 %v4508_v57 }
 0x59a   :  { %4511 = vmatpush3.bf16.msra.mxu1 %v4508_v57 }
 0x59b   :  { %4513 = vmatprep.subr.bf16.mxu1 %v4512_v60 }
 0x59d   :  { %4069 = vmatmul.mubr.f32.vlgmr.msra.gmra.mrb[0].mxu1 %v2502_v34 }
 0x59e   :  { %4071 = vmatprep.mubr.f32.mxu1 %v2503_v13  ;;  %4515 = vmatpush3.bf16.msra.mxu1 %v4512_v60 }
 0x59f   :  { %4517 = vmatprep.subr.bf16.mxu1 %v4516_v33 }
 0x5a1   :  { %4072 = vmatmul.mubr.f32.gmra.mrb[2].mxu1 %v2504_v19 }
 0x5a2   :  { %4519 = vmatpush3.bf16.msra.mxu1 %v4516_v33  ;;  %4106 = vmatprep.mubr.f32.mxu1 %v2631_v12 }
 0x5a3   :  { %4521 = vmatprep.subr.bf16.mxu1 %v4520_v17 }
 0x5a6   :  { %4523 = vmatpush3.bf16.msra.mxu1 %v4520_v17 }
 0x5a7   :  { %4525 = vmatprep.subr.bf16.mxu1 %v4524_v38 }
 0x5aa   :  { %4527 = vmatpush3.bf16.msra.mxu1 %v4524_v38 }
 0x5ab   :  { %4529 = vmatprep.subr.bf16.mxu1 %v4528_v11 }
 0x5ae   :  { %4531 = vmatpush3.bf16.msra.mxu1 %v4528_v11 }
 0x5af   :  { %4533 = vmatprep.subr.bf16.mxu1 %v4532_v23 }
 0x5b2   :  { %4535 = vmatpush3.bf16.msra.mxu1 %v4532_v23 }
 0x5b3   :  { %4537 = vmatprep.subr.bf16.mxu1 %v4536_v3 }
 0x5b6   :  { %4539 = vmatpush3.bf16.msra.mxu1 %v4536_v3 }
 0x5b7   :  { %4541 = vmatprep.subr.bf16.mxu1 %v4540_v40 }
 0x5ba   :  { %4543 = vmatpush3.bf16.msra.mxu1 %v4540_v40 }
 0x5bd   :  { %4107 = vmatmul.mubr.f32.vlgmr.msra.gmra.mrb[0].mxu1 %v2632_v44 }
 0x5be   :  { %4109 = vmatprep.mubr.f32.mxu1 %v2633_v47 }
 0x5c1   :  { %4110 = vmatmul.mubr.f32.gmra.mrb[2].mxu1 %v2634_v48 }
 0x5e7   :  { %v3842_v26 = vpop.f32.mrb[4].mxu0 }
 0x5e8   :  { %v1716_v49 = vpop.f32.mrb[5].mxu0 }
 0x5eb   :  { %v3845_v9 = vpop.f32.mrb[6].mxu0 }
 0x5ec   :  { %v1726_v5 = vpop.f32.mrb[7].mxu0 }
 0x690   :  { %v4108_v50 = vpop.f32.mrb[0].mxu1 }
 0x691   :  { %v5990_v22 = vadd.f32 %v4108_v50, %v3842_v26  ;;  %v2705_v61 = vpop.f32.mrb[1].mxu1 }
 0x692   :  { %v5992_v51 = vadd.f32 %v2705_v61, %v1716_v49 }
 0x693   :  { %v2740_v53 = vmul.f32 %v5990_v22, %v5990_v22 }
 0x694   :  { %v2739_v54 = vmul.f32 %v5992_v51, %v5992_v51  ;;  %v4111_v55 = vpop.f32.mrb[2].mxu1  ;;  %v2730_v59 = vadd.f32 %v5992_v51, %v5990_v22 }
 0x695   :  { %v5998_v56 = vadd.f32 %v4111_v55, %v3845_v9  ;;  %v2715_v57 = vpop.f32.mrb[3].mxu1 }
 0x696   :  { %v6002_v37 = vadd.f32 %v2715_v57, %v1726_v5  ;;  %v2743_v60 = vadd.f32 %v2740_v53, %v2739_v54 }
 0x697   :  { %v2742_v32 = vmul.f32 %v5998_v56, %v5998_v56 }
 0x698   :  { %v2731_v62 = vadd.f32 %v6002_v37, %v2730_v59  ;;  %v2741_v63 = vmul.f32 %v6002_v37, %v6002_v37 }
 0x69a   :  { %v2732_v1 = vadd.f32 %v5998_v56, %v2731_v62  ;;  %v2744_v2 = vadd.f32 %v2743_v60, %v2741_v63 }
 0x69c   :  { %v2733_v7 = vrot.slane %v2732_v1, 4  ;;  %v2745_v4 = vadd.f32 %v2744_v2, %v2742_v32 }
 0x69e   :  { %v2734_v6 = vadd.f32 %v2733_v7, %v2732_v1  ;;  %v2746_v33 = vrot.slane %v2745_v4, 4 }
 0x6a0   :  { %v2735_v34 = vrot.slane %v2734_v6, 2  ;;  %v2747_v8 = vadd.f32 %v2746_v33, %v2745_v4 }
 0x6a2   :  { %v2736_v35 = vadd.f32 %v2735_v34, %v2734_v6  ;;  %v2748_v10 = vrot.slane %v2747_v8, 2 }
 0x6a4   :  { %v2737_v14 = vrot.slane %v2736_v35, 1  ;;  %v2749_v15 = vadd.f32 %v2748_v10, %v2747_v8 }
 0x6a6   :  { %v2738_v16 = vadd.f32 %v2737_v14, %v2736_v35  ;;  %v2750_v13 = vrot.slane %v2749_v15, 1 }
 0x6a8   :  { %v2751_v17 = vadd.f32 %v2750_v13, %v2749_v15  ;;  %2755 = vrot.lane.b32.xlu0 %v2738_v16, %s4787_s10 }
 0x6aa   :  { %2760 = vrot.lane.b32.xlu1 %v2751_v17, %s4787_s10 }
 0x6ac   :  { %2764 = vrot.lane.b32.xlu0 %v2738_v16, %s4786_s18 }
 0x6ae   :  { %2768 = vrot.lane.b32.xlu1 %v2751_v17, %s4786_s18 }
 0x6b0   :  { %2772 = vrot.lane.b32.xlu0 %v2738_v16, %s4788_s2 }
 0x6b2   :  { %2776 = vrot.lane.b32.xlu1 %v2751_v17, %s4788_s2 }
 0x6b4   :  { %2780 = vrot.lane.b32.xlu0 %v2738_v16, %s4789_s19 }
 0x6b6   :  { %2784 = vrot.lane.b32.xlu1 %v2751_v17, %s4789_s19 }
 0x6b8   :  { %2788 = vrot.lane.b32.xlu0 %v2738_v16, %s4790_s20 }
 0x6ba   :  { %2792 = vrot.lane.b32.xlu1 %v2751_v17, %s4790_s20 }
 0x6bc   :  { %2796 = vrot.lane.b32.xlu0 %v2738_v16, %s4791_s21 }
 0x6be   :  { %2800 = vrot.lane.b32.xlu1 %v2751_v17, %s4791_s21 }
 0x6c0   :  { %2804 = vrot.lane.b32.xlu0 %v2738_v16, %s4792_s23 }
 0x6c2   :  { %2808 = vrot.lane.b32.xlu1 %v2751_v17, %s4792_s23 }
 0x6c4   :  { %2812 = vrot.lane.b32.xlu0 %v2738_v16, %s4793_s24 }
 0x6c6   :  { %2816 = vrot.lane.b32.xlu1 %v2751_v17, %s4793_s24 }
 0x6c8   :  { %2820 = vrot.lane.b32.xlu0 %v2738_v16, %s4794_s25 }
 0x6ca   :  { %2824 = vrot.lane.b32.xlu1 %v2751_v17, %s4794_s25 }
 0x6cc   :  { %2828 = vrot.lane.b32.xlu0 %v2738_v16, %s4795_s26 }
 0x6ce   :  { %2832 = vrot.lane.b32.xlu1 %v2751_v17, %s4795_s26 }
 0x6d0   :  { %2836 = vrot.lane.b32.xlu0 %v2738_v16, %s4796_s27 }
 0x6d2   :  { %2840 = vrot.lane.b32.xlu1 %v2751_v17, %s4796_s27 }
 0x6d4   :  { %2844 = vrot.lane.b32.xlu0 %v2738_v16, %s4797_s28 }
 0x6d6   :  { %2848 = vrot.lane.b32.xlu1 %v2751_v17, %s4797_s28 }
 0x6d8   :  { %2852 = vrot.lane.b32.xlu0 %v2738_v16, %s4798_s29 }
 0x6da   :  { %2856 = vrot.lane.b32.xlu1 %v2751_v17, %s4798_s29 }
 0x6dc   :  { %2860 = vrot.lane.b32.xlu0 %v2738_v16, %s4799_s8 }
 0x6de   :  { %2864 = vrot.lane.b32.xlu1 %v2751_v17, %s4799_s8 }
 0x6e0   :  { %2868 = vrot.lane.b32.xlu0 %v2738_v16, %s4785_s22 }
 0x6e2   :  { %2872 = vrot.lane.b32.xlu1 %v2751_v17, %s4785_s22 }
 0x71a   :  { %v2756_v19 = vpop.permute.xlu0 %2755 }
 0x71b   :  { %v2758_v39 = vadd.f32 %v2756_v19, %v2738_v16 }
 0x71c   :  { %v2761_v18 = vpop.permute.xlu1 %2760 }
 0x71d   :  { %v2763_v40 = vadd.f32 %v2761_v18, %v2751_v17 }
 0x71e   :  { %v2765_v20 = vpop.permute.xlu0 %2764 }
 0x71f   :  { %v2767_v28 = vadd.f32 %v2765_v20, %v2758_v39 }
 0x720   :  { %v2769_v12 = vpop.permute.xlu1 %2768 }
 0x721   :  { %v2771_v42 = vadd.f32 %v2769_v12, %v2763_v40 }
 0x722   :  { %v2773_v38 = vpop.permute.xlu0 %2772 }
 0x723   :  { %v2775_v43 = vadd.f32 %v2773_v38, %v2767_v28 }
 0x724   :  { %v2777_v25 = vpop.permute.xlu1 %2776 }
 0x725   :  { %v2779_v58 = vadd.f32 %v2777_v25, %v2771_v42 }
 0x726   :  { %v2781_v36 = vpop.permute.xlu0 %2780 }
 0x727   :  { %v2783_v44 = vadd.f32 %v2781_v36, %v2775_v43 }
 0x728   :  { %v2785_v11 = vpop.permute.xlu1 %2784 }
 0x729   :  { %v2787_v46 = vadd.f32 %v2785_v11, %v2779_v58  ;;  %v2728_v11 = vld [vmem:[%s6131_s5] sm:$0x1] }
 0x72a   :  { %v2789_v24 = vpop.permute.xlu0 %2788 }
 0x72b   :  { %v2791_v47 = vadd.f32 %v2789_v24, %v2783_v44 }
 0x72c   :  { %v2793_v21 = vpop.permute.xlu1 %2792 }
 0x72d   :  { %v2795_v26 = vadd.f32 %v2793_v21, %v2787_v46 }
 0x72e   :  { %v2797_v23 = vpop.permute.xlu0 %2796 }
 0x72f   :  { %v2799_v49 = vadd.f32 %v2797_v23, %v2791_v47  ;;  %v2729_v23 = vld [vmem:[%s6132_s6] sm:$0x1] }
 0x730   :  { %v2801_v30 = vpop.permute.xlu1 %2800 }
 0x731   :  { %v2803_v5 = vadd.f32 %v2801_v30, %v2795_v26 }
 0x732   :  { %v2805_v27 = vpop.permute.xlu0 %2804 }
 0x733   :  { %v2807_v50 = vadd.f32 %v2805_v27, %v2799_v49 }
 0x734   :  { %v2809_v3 = vpop.permute.xlu1 %2808 }
 0x735   :  { %v2811_v53 = vadd.f32 %v2809_v3, %v2803_v5 }
 0x736   :  { %v2813_v31 = vpop.permute.xlu0 %2812 }
 0x737   :  { %v2815_v54 = vadd.f32 %v2813_v31, %v2807_v50 }
 0x738   :  { %v2817_v52 = vpop.permute.xlu1 %2816 }
 0x739   :  { %v2819_v57 = vadd.f32 %v2817_v52, %v2811_v53 }
 0x73a   :  { %v2821_v41 = vpop.permute.xlu0 %2820 }
 0x73b   :  { %v2823_v59 = vadd.f32 %v2821_v41, %v2815_v54 }
 0x73c   :  { %v2825_v29 = vpop.permute.xlu1 %2824 }
 0x73d   :  { %v2827_v62 = vadd.f32 %v2825_v29, %v2819_v57 }
 0x73e   :  { %v2829_v45 = vpop.permute.xlu0 %2828 }
 0x73f   :  { %v2831_v63 = vadd.f32 %v2829_v45, %v2823_v59 }
 0x740   :  { %v2833_v48 = vpop.permute.xlu1 %2832 }
 0x741   :  { %v2835_v1 = vadd.f32 %v2833_v48, %v2827_v62 }
 0x742   :  { %v2837_v9 = vpop.permute.xlu0 %2836 }
 0x743   :  { %v2839_v2 = vadd.f32 %v2837_v9, %v2831_v63 }
 0x744   :  { %v2841_v61 = vpop.permute.xlu1 %2840 }
 0x745   :  { %v2843_v4 = vadd.f32 %v2841_v61, %v2835_v1 }
 0x746   :  { %v2845_v55 = vpop.permute.xlu0 %2844 }
 0x747   :  { %v2847_v6 = vadd.f32 %v2845_v55, %v2839_v2 }
 0x748   :  { %v2849_v60 = vpop.permute.xlu1 %2848 }
 0x749   :  { %v2851_v34 = vadd.f32 %v2849_v60, %v2843_v4 }
 0x74a   :  { %v2853_v32 = vpop.permute.xlu0 %2852 }
 0x74b   :  { %v2855_v8 = vadd.f32 %v2853_v32, %v2847_v6 }
 0x74c   :  { %v2857_v7 = vpop.permute.xlu1 %2856 }
 0x74d   :  { %v2859_v10 = vadd.f32 %v2857_v7, %v2851_v34 }
 0x74e   :  { %v2861_v33 = vpop.permute.xlu0 %2860 }
 0x74f   :  { %v2863_v14 = vadd.f32 %v2861_v33, %v2855_v8 }
 0x750   :  { %v2865_v35 = vpop.permute.xlu1 %2864 }
 0x751   :  { %v2867_v16 = vadd.f32 %v2865_v35, %v2859_v10 }
 0x752   :  { %v2869_v15 = vpop.permute.xlu0 %2868 }
 0x753   :  { %v2871_v13 = vadd.f32 %v2869_v15, %v2863_v14 }
 0x754   :  { %v2873_v17 = vpop.permute.xlu1 %2872 }
 0x755   :  { %v2876_v19 = vmul.f32 0.001953125, %v2871_v13  ;;  %v2875_v18 = vadd.f32 %v2873_v17, %v2867_v16 }
 0x757   :  { %v2878_v20 = vmul.f32 %v2876_v19, %v2876_v19  ;;  %v2877_v12 = vmul.f32 0.001953125, %v2875_v18 }
 0x759   :  { %v2879_v38 = vsub.f32 %v2877_v12, %v2878_v20 }
 0x75b   :  { %v2880_v25 = vmax.f32 %v2879_v38, 0.0 }
 0x75d   :  { %v2881_v36 = vadd.f32 1e-05, %v2880_v25 }
 0x75f   :  { %4764 = vrsqrt.f32 %v2881_v36 }
 0x769   :  { %v4765_v24 = vpop.eup %4764 }
 0x76a   :  { %v2883_v21 = vmul.f32 %v4765_v24, %v2728_v11 }
 0x76c   :  { %v2884_v30 = vmul.f32 %v2883_v21, %v2876_v19  ;;  %v2890_v27 = vrot.slane %v2883_v21, %v5237_v0 }
 0x76e   :  { %v2885_v3 = vsub.f32 %v2729_v23, %v2884_v30  ;;  %2894 = vrot.lane.b32.xlu1 %v2890_v27, %s4799_s8  ;;  %2891 = vrot.lane.b32.xlu0 %v2890_v27, %s4785_s22 }
 0x770   :  { %v2967_v31 = vrot.slane %v2885_v3, %v5237_v0 }
 0x772   :  { %2897 = vrot.lane.b32.xlu0 %v2890_v27, %s4798_s29  ;;  %2968 = vrot.lane.b32.xlu1 %v2967_v31, %s4785_s22 }
 0x776   :  { %2900 = vrot.lane.b32.xlu0 %v2890_v27, %s4797_s28  ;;  %2971 = vrot.lane.b32.xlu1 %v2967_v31, %s4799_s8 }
 0x77a   :  { %2903 = vrot.lane.b32.xlu0 %v2890_v27, %s4796_s27  ;;  %2974 = vrot.lane.b32.xlu1 %v2967_v31, %s4798_s29 }
 0x77e   :  { %2906 = vrot.lane.b32.xlu0 %v2890_v27, %s4795_s26  ;;  %2977 = vrot.lane.b32.xlu1 %v2967_v31, %s4797_s28 }
 0x782   :  { %2909 = vrot.lane.b32.xlu0 %v2890_v27, %s4794_s25  ;;  %2980 = vrot.lane.b32.xlu1 %v2967_v31, %s4796_s27 }
 0x786   :  { %2912 = vrot.lane.b32.xlu0 %v2890_v27, %s4793_s24  ;;  %2983 = vrot.lane.b32.xlu1 %v2967_v31, %s4795_s26 }
 0x78a   :  { %2915 = vrot.lane.b32.xlu0 %v2890_v27, %s4792_s23  ;;  %2986 = vrot.lane.b32.xlu1 %v2967_v31, %s4794_s25 }
 0x78e   :  { %2918 = vrot.lane.b32.xlu0 %v2890_v27, %s4791_s21  ;;  %2989 = vrot.lane.b32.xlu1 %v2967_v31, %s4793_s24 }
 0x792   :  { %2921 = vrot.lane.b32.xlu0 %v2890_v27, %s4790_s20  ;;  %2992 = vrot.lane.b32.xlu1 %v2967_v31, %s4792_s23 }
 0x796   :  { %2924 = vrot.lane.b32.xlu0 %v2890_v27, %s4789_s19  ;;  %2995 = vrot.lane.b32.xlu1 %v2967_v31, %s4791_s21 }
 0x79a   :  { %2927 = vrot.lane.b32.xlu0 %v2890_v27, %s4788_s2  ;;  %2998 = vrot.lane.b32.xlu1 %v2967_v31, %s4790_s20 }
 0x79e   :  { %2930 = vrot.lane.b32.xlu0 %v2890_v27, %s4786_s18  ;;  %3001 = vrot.lane.b32.xlu1 %v2967_v31, %s4789_s19 }
 0x7a2   :  { %2933 = vrot.lane.b32.xlu0 %v2890_v27, %s4787_s10  ;;  %3004 = vrot.lane.b32.xlu1 %v2967_v31, %s4788_s2 }
 0x7a6   :  { %3007 = vrot.lane.b32.xlu0 %v2967_v31, %s4786_s18  ;;  %3010 = vrot.lane.b32.xlu1 %v2967_v31, %s4787_s10 }
 0x7e0   :  { %v2895_v39 = vpop.permute.xlu1 %2894  ;;  %v2892_v52 = vpop.permute.xlu0 %2891 }
 0x7e1   :  { %v2936_v53 = vsel %vm1292_vm5, %v2883_v21, %v2892_v52 }
 0x7e2   :  { %v2938_v54 = vsel %vm1294_vm6, %v2936_v53, %v2895_v39 }
 0x7e4   :  { %v2898_v40 = vpop.permute.xlu0 %2897  ;;  %v2969_v28 = vpop.permute.xlu1 %2968 }
 0x7e5   :  { %v2940_v59 = vsel %vm1296_vm7, %v2938_v54, %v2898_v40  ;;  %v3013_v63 = vsel %vm1292_vm5, %v2885_v3, %v2969_v28  ;;  %vm6139_vm5 = vcmask 719872  }
 0x7e8   :  { %v2901_v41 = vpop.permute.xlu0 %2900  ;;  %v2972_v42 = vpop.permute.xlu1 %2971 }
 0x7e9   :  { %v2942_v60 = vsel %vm1298_vm8, %v2940_v59, %v2901_v41  ;;  %v3014_v7 = vsel %vm1294_vm6, %v3013_v63, %v2972_v42  ;;  %vm6140_vm6 = vcmask 785408  }
 0x7ec   :  { %v2904_v43 = vpop.permute.xlu0 %2903  ;;  %v2975_v29 = vpop.permute.xlu1 %2974 }
 0x7ed   :  { %v2944_v62 = vsel %vm1300_vm9, %v2942_v60, %v2904_v43  ;;  %v3015_v6 = vsel %vm1296_vm7, %v3014_v7, %v2975_v29  ;;  %vm6141_vm7 = vcmask 850944  }
 0x7f0   :  { %v2907_v58 = vpop.permute.xlu0 %2906  ;;  %v2978_v44 = vpop.permute.xlu1 %2977 }
 0x7f1   :  { %v2946_v32 = vsel %vm1302_vm10, %v2944_v62, %v2907_v58  ;;  %v3016_v34 = vsel %vm1298_vm8, %v3015_v6, %v2978_v44  ;;  %vm6142_vm8 = vmmov %vm6138_vm15 }
 0x7f4   :  { %v2910_v45 = vpop.permute.xlu0 %2909  ;;  %v2981_v46 = vpop.permute.xlu1 %2980 }
 0x7f5   :  { %v2948_v4 = vsel %vm1304_vm11, %v2946_v32, %v2910_v45  ;;  %v3017_v35 = vsel %vm1300_vm9, %v3016_v34, %v2981_v46  ;;  %vm6143_vm9 = vmmov %vm6139_vm5 }
 0x7f8   :  { %v2913_v47 = vpop.permute.xlu0 %2912  ;;  %v2984_v48 = vpop.permute.xlu1 %2983 }
 0x7f9   :  { %v2950_v33 = vsel %vm99_vm4, %v2948_v4, %v2913_v47  ;;  %v3018_v16 = vsel %vm1302_vm10, %v3017_v35, %v2984_v48  ;;  %vm6144_vm10 = vmmov %vm6140_vm6 }
 0x7fc   :  { %v2916_v26 = vpop.permute.xlu0 %2915  ;;  %v2987_v49 = vpop.permute.xlu1 %2986 }
 0x7fd   :  { %v2952_v8 = vsel %vm1307_vm12, %v2950_v33, %v2916_v26  ;;  %v3019_v17 = vsel %vm1304_vm11, %v3018_v16, %v2987_v49  ;;  %vm6145_vm11 = vmmov %vm6141_vm7 }
 0x800   :  { %v2919_v9 = vpop.permute.xlu0 %2918  ;;  %v2990_v5 = vpop.permute.xlu1 %2989 }
 0x801   :  { %v2954_v10 = vsel %vm6138_vm15, %v2952_v8, %v2919_v9  ;;  %v3020_v18 = vsel %vm99_vm4, %v3019_v17, %v2990_v5 }
 0x804   :  { %v2922_v50 = vpop.permute.xlu0 %2921  ;;  %v2993_v61 = vpop.permute.xlu1 %2992 }
 0x805   :  { %v2956_v13 = vsel %vm6139_vm5, %v2954_v10, %v2922_v50  ;;  %v3021_v12 = vsel %vm1307_vm12, %v3020_v18, %v2993_v61 }
 0x808   :  { %v2925_v55 = vpop.permute.xlu0 %2924  ;;  %v2996_v57 = vpop.permute.xlu1 %2995 }
 0x809   :  { %v2958_v19 = vsel %vm6140_vm6, %v2956_v13, %v2925_v55  ;;  %v3022_v11 = vsel %vm6142_vm8, %v3021_v12, %v2996_v57 }
 0x80c   :  { %v2928_v1 = vpop.permute.xlu0 %2927  ;;  %v2999_v2 = vpop.permute.xlu1 %2998 }
 0x80d   :  { %v2960_v20 = vsel %vm6141_vm7, %v2958_v19, %v2928_v1  ;;  %v3023_v21 = vsel %vm6143_vm9, %v3022_v11, %v2999_v2 }
 0x810   :  { %v2931_v14 = vpop.permute.xlu0 %2930  ;;  %v3002_v15 = vpop.permute.xlu1 %3001 }
 0x811   :  { %v2961_v38 = vsel %vm1317_vm1, %v2960_v20, %v2931_v14  ;;  %v3024_v30 = vsel %vm6144_vm10, %v3023_v21, %v3002_v15 }
 0x814   :  { %v2934_v25 = vpop.permute.xlu0 %2933  ;;  %v3005_v36 = vpop.permute.xlu1 %3004 }
 0x815   :  { %v2962_v24 = vsel %vm1319_vm2, %v2961_v38, %v2934_v25  ;;  %v3025_v27 = vsel %vm6145_vm11, %v3024_v30, %v3005_v36 }
 0x816   :  { %v3031_v23 = vrot.slane %v2962_v24, %v5237_v0 }
 0x818   :  { %v3008_v3 = vpop.permute.xlu0 %3007  ;;  %v3011_v31 = vpop.permute.xlu1 %3010  ;;  %v3032_v52 = vmul.f32 %v5992_v51, %v3031_v23  ;;  %v3033_v28 = vmul.f32 %v5990_v22, %v3031_v23  ;;  %v3034_v41 = vmul.f32 %v6002_v37, %v3031_v23  ;;  %v3035_v42 = vmul.f32 %v5998_v56, %v3031_v23 }
 0x819   :  { %v3026_v39 = vsel %vm1317_vm1, %v3025_v27, %v3008_v3 }
 0x81a   :  { %v3027_v40 = vsel %vm1319_vm2, %v3026_v39, %v3011_v31 }
 0x81b   :  { %v3039_v43 = vrot.slane %v3027_v40, %v5237_v0 }
 0x81d   :  { %v3040_v29 = vadd.f32 %v3039_v43, %v3032_v52  ;;  %v3041_v58 = vadd.f32 %v3039_v43, %v3033_v28  ;;  %v3042_v44 = vadd.f32 %v3039_v43, %v3034_v41  ;;  %v3043_v45 = vadd.f32 %v3039_v43, %v3035_v42 }
 0x81f   :  { %v3044_v46 = vmax.f32 %v3040_v29, 0.0  ;;  %v3045_v47 = vmax.f32 %v3041_v58, 0.0  ;;  %v3046_v48 = vmax.f32 %v3042_v44, 0.0  ;;  %v3047_v26 = vmax.f32 %v3043_v45, 0.0 }
 0x821   :  { %3048 = vst [vmem:[%s6133_s7] sm:$0xff] %v3044_v46  ;;  %3049 = vst [vmem:[%s6133_s7 + $0x8] sm:$0xff] %v3045_v47 }
 0x822   :  { %3050 = vst [vmem:[%s6133_s7 + $0x10] sm:$0xff] %v3046_v48  ;;  %3051 = vst [vmem:[%s6133_s7 + $0x18] sm:$0xff] %v3047_v26 }

</bundles_post_ra>
